<compile_context>
chip_gen: v6e
topology: v6e:2x2x1
jax: 0.10.0
libtpu: 0.0.40
codegen_flags: <defaults>
</compile_context>

<pallas_src>
import math

import jax
import jax.numpy as jnp
from jax.experimental import pallas as pl
from jax.experimental.pallas import tpu as pltpu


def _make_dense_block_kernel(H, W, C0, g, L):
    """Builds the fused dense-block kernel for static (H, W, C0, growth, L)."""
    HW = H * W
    Ctot = C0 + L * g

    def kernel(*refs):
        x_in = refs[0]                       # (1, C0, HW)  f32
        params = refs[1:1 + 4 * L]
        out_ref = refs[1 + 4 * L]            # (1, Ctot, HW) bf16: growing activation

        # Original input sits in the channel TAIL; each new y_l is written just in
        # front of it, so the final buffer is already in torch channel order.
        out_ref[:, L * g:Ctot, :] = x_in[...].astype(jnp.bfloat16)

        # Lane-position masks realizing the zero padding of the 3x3 conv.
        # Hoisted out of the layer loop (layer independent).
        lane = jax.lax.broadcasted_iota(jnp.int32, (1, HW), 1)
        wpos = lane % W
        m_w0 = wpos > 0              # source column w-1 exists
        m_w2 = wpos < (W - 1)        # source column w+1 exists
        m_h0 = lane >= W             # source row h-1 exists
        m_h2 = lane < (H - 1) * W    # source row h+1 exists

        dw_taps = ((1, m_w0), (0, None), (HW - 1, m_w2))   # reads w-1 / w / w+1
        dh_taps = ((W, m_h0), (0, None), (HW - W, m_h2))   # reads h-1 / h / h+1

        for l in range(L):
            Cl = C0 + l * g              # layer-l input channel count
            off = (L - l) * g            # channel offset of x_l inside out_ref
            scale_ref, bias_ref, w_ref, cb_ref = params[4 * l:4 * l + 4]

            # BatchNorm (folded eval-mode affine) + ReLU in f32 on the VPU.
            xv = out_ref[:, off:Ctot, :].reshape(Cl, HW).astype(jnp.float32)
            av = jnp.maximum(xv * scale_ref[...] + bias_ref[...], 0.0)    # (Cl, HW)

            # Column (dw) shifts of the zero-padded window: XLU lane rolls + masks,
            # stacked once along the channel/sublane axis -> contraction K = 3*Cl.
            pieces = []
            for shift, mask in dw_taps:
                p = av if shift == 0 else pltpu.roll(av, shift, axis=1)
                if mask is not None:
                    p = jnp.where(mask, p, 0.0)
                pieces.append(p)
            a3 = jnp.concatenate(pieces, axis=0)             # (3*Cl, HW) f32

            # Row (dh) shifts are whole-row lane rolls of the same slab; 3 chained
            # MXU matmuls (bf16 operands, f32 acc, conv bias folded into the init).
            acc = jnp.broadcast_to(cb_ref[...], (g, HW))      # (g, HW) f32
            for dh, (shift, mask) in enumerate(dh_taps):
                op = a3 if shift == 0 else pltpu.roll(a3, shift, axis=1)
                if mask is not None:
                    op = jnp.where(mask, op, 0.0)
                acc = acc + jnp.dot(w_ref[dh], op.astype(jnp.bfloat16),
                                    preferred_element_type=jnp.float32)

            # y_l goes directly in front of x_l  (== torch.cat([y, x], dim=1)).
            out_ref[:, off - g:off, :] = acc.astype(jnp.bfloat16).reshape(1, g, HW)

    return kernel


def dense_block_fused(x_nchw, kernel_params):
    """Runs the whole dense block in one pallas_call.

    x_nchw: (N, C0, H, W) float32, PyTorch NCHW layout (consumed directly).
    Returns (N, C0 + L*growth, H, W) bfloat16 in torch channel order.
    """
    N, C0, H, W = x_nchw.shape
    HW = H * W
    L = len(kernel_params)
    g = kernel_params[0][3].shape[0]          # cb has shape (g, 1)
    Ctot = C0 + L * g

    x_flat = x_nchw.reshape(N, C0, HW)        # free reshape, no transpose

    flat_args = [x_flat]
    in_specs = [pl.BlockSpec((1, C0, HW), lambda n: (n, 0, 0))]
    for scale, bias, w_slab, cb in kernel_params:
        flat_args += [scale, bias, w_slab, cb]
        in_specs += [
            pl.BlockSpec(scale.shape, lambda n: (0, 0)),
            pl.BlockSpec(bias.shape, lambda n: (0, 0)),
            pl.BlockSpec(w_slab.shape, lambda n: (0, 0, 0)),
            pl.BlockSpec(cb.shape, lambda n: (0, 0)),
        ]

    # Advisory cost for XLA's scheduler around the custom call.
    flops = 2 * N * HW * g * sum(9 * (C0 + l * g) for l in range(L))
    bytes_accessed = (int(x_flat.size) * x_flat.dtype.itemsize
                      + N * Ctot * HW * 2
                      + sum(int(a.size) * a.dtype.itemsize for a in flat_args[1:]))
    cost = pl.CostEstimate(flops=int(flops), transcendentals=0,
                           bytes_accessed=int(bytes_accessed))

    grid_spec = pltpu.PrefetchScalarGridSpec(
        num_scalar_prefetch=0,
        grid=(N,),
        in_specs=in_specs,
        out_specs=pl.BlockSpec((1, Ctot, HW), lambda n: (n, 0, 0)),
    )

    # NOTE: per-block VMEM here is tiny (~100 KiB), well under every generation's
    # default scoped limit; for production DenseNet shapes set
    # pltpu.CompilerParams(vmem_limit_bytes=...) explicitly (v7x has only 64 MiB).
    out_flat = pl.pallas_call(
        _make_dense_block_kernel(H, W, C0, g, L),
        out_shape=jax.ShapeDtypeStruct((N, Ctot, HW), jnp.bfloat16),
        grid_spec=grid_spec,
        compiler_params=pltpu.CompilerParams(
            dimension_semantics=("parallel",)),
        cost_estimate=cost,
    )(*flat_args)

    return out_flat.reshape(N, Ctot, H, W)


def dense_layer_forward(x_nchw, kernel_params):
    """DenseLayer.forward (eval mode). NCHW in, NCHW out (bf16 activations)."""
    return dense_block_fused(x_nchw, kernel_params)


def init_params(key, in_channels, growth_rate, layers_per_block, eps=1e-5):
    """Deterministic synthetic parameters in PyTorch layouts (one dict per layer)."""
    params = []
    c = in_channels
    for layer_idx in range(layers_per_block):
        k = jax.random.fold_in(key, layer_idx)
        k1, k2, k3, k4, k5, k6 = jax.random.split(k, 6)
        gamma = 1.0 + 0.1 * jax.random.normal(k1, (c,), jnp.float32)
        beta = 0.1 * jax.random.normal(k2, (c,), jnp.float32)
        r_mean = 0.1 * jax.random.normal(k3, (c,), jnp.float32)
        r_var = jnp.abs(1.0 + 0.1 * jax.random.normal(k4, (c,), jnp.float32))
        # PyTorch Conv2d weight layout (Cout, Cin, 3, 3), bias (Cout,)
        w_oihw = jax.random.normal(k5, (growth_rate, c, 3, 3), jnp.float32)
        w_oihw = w_oihw * (1.0 / math.sqrt(9.0 * c))
        cbias = 0.01 * jax.random.normal(k6, (growth_rate,), jnp.float32)
        params.append(dict(gamma=gamma, beta=beta, mean=r_mean, var=r_var,
                           w_oihw=w_oihw, cbias=cbias, eps=eps))
        c += growth_rate
    return params


def fold_params(params):
    """Fold eval-mode BN into per-channel affines and reshape conv weights into the
    channel-major (3, Cout, 3*Cin) bf16 slabs (column index = dw*Cin + cin)."""
    kp = []
    for p in params:
        c = p["gamma"].shape[0]
        g = p["cbias"].shape[0]
        scale = p["gamma"] / jnp.sqrt(p["var"] + p["eps"])
        bias = p["beta"] - p["mean"] * scale
        w_hwio = jnp.transpose(p["w_oihw"], (2, 3, 1, 0))            # (kh, kw, cin, cout)
        w_slab = jnp.transpose(w_hwio.reshape(3, 3 * c, g), (0, 2, 1))  # (3, cout, 3*cin)
        kp.append((scale.reshape(c, 1).astype(jnp.float32),
                   bias.reshape(c, 1).astype(jnp.float32),
                   w_slab.astype(jnp.bfloat16),
                   p["cbias"].reshape(g, 1).astype(jnp.float32)))
    return kp


def _reference_forward(x_nchw, params):
    """Pure-JAX f32 reference (lax.conv) for validation."""
    x = jnp.transpose(x_nchw, (0, 2, 3, 1))
    for p in params:
        scale = p["gamma"] / jnp.sqrt(p["var"] + p["eps"])
        bias = p["beta"] - p["mean"] * scale
        a = jnp.maximum(x * scale + bias, 0.0)
        w_hwio = jnp.transpose(p["w_oihw"], (2, 3, 1, 0))
        y = jax.lax.conv_general_dilated(
            a, w_hwio, window_strides=(1, 1), padding="SAME",
            dimension_numbers=("NHWC", "HWIO", "NHWC")) + p["cbias"]
        x = jnp.concatenate([y, x], axis=-1)                 # == torch.cat([y, x], 1)
    return jnp.transpose(x, (0, 3, 1, 2))


if __name__ == "__main__":
    # Small shapes consistent with the module (scaled-down DenseNet block).
    N, C0, H, W = 2, 16, 16, 16
    growth_rate, layers_per_block = 8, 4

    key = jax.random.PRNGKey(0)
    kx, kp = jax.random.split(key)
    x = jax.random.normal(kx, (N, C0, H, W), jnp.float32)    # NCHW like PyTorch
    params = init_params(kp, C0, growth_rate, layers_per_block)
    kernel_params = fold_params(params)

    out = jax.jit(dense_layer_forward)(x, kernel_params)
    out = jax.block_until_ready(out)

    expected_channels = C0 + layers_per_block * growth_rate
    assert out.shape == (N, expected_channels, H, W), out.shape

    ref = _reference_forward(x, params)
    out_f32 = out.astype(jnp.float32)
    max_err = float(jnp.max(jnp.abs(out_f32 - ref)))
    assert jnp.allclose(out_f32, ref, rtol=5e-2, atol=5e-2), max_err

    print("KERNEL_OK")
</pallas_src>

<mosaic_0001>
module attributes {stable_mosaic.version = 11 : i64} {
  func.func @kernel(%arg0: i32, %arg1: memref<1x16x256xf32, #tpu.memory_space<vmem>>, %arg2: memref<16x1xf32, #tpu.memory_space<vmem>>, %arg3: memref<16x1xf32, #tpu.memory_space<vmem>>, %arg4: memref<3x8x48xbf16, #tpu.memory_space<vmem>>, %arg5: memref<8x1xf32, #tpu.memory_space<vmem>>, %arg6: memref<24x1xf32, #tpu.memory_space<vmem>>, %arg7: memref<24x1xf32, #tpu.memory_space<vmem>>, %arg8: memref<3x8x72xbf16, #tpu.memory_space<vmem>>, %arg9: memref<8x1xf32, #tpu.memory_space<vmem>>, %arg10: memref<32x1xf32, #tpu.memory_space<vmem>>, %arg11: memref<32x1xf32, #tpu.memory_space<vmem>>, %arg12: memref<3x8x96xbf16, #tpu.memory_space<vmem>>, %arg13: memref<8x1xf32, #tpu.memory_space<vmem>>, %arg14: memref<40x1xf32, #tpu.memory_space<vmem>>, %arg15: memref<40x1xf32, #tpu.memory_space<vmem>>, %arg16: memref<3x8x120xbf16, #tpu.memory_space<vmem>>, %arg17: memref<8x1xf32, #tpu.memory_space<vmem>>, %arg18: memref<1x48x256xbf16, #tpu.memory_space<vmem>>) attributes {dimension_semantics = [#tpu.dimension_semantics<parallel>], iteration_bounds = array<i64: 2>, scalar_prefetch = 0 : i64, scratch_operands = 0 : i64, tpu.core_type = #tpu.core_type<tc>, window_params = [{transform_indices = @transform_0, window_bounds = array<i64: 1, 16, 256>}, {pipeline_mode = #tpu.pipeline_mode<synchronous>, transform_indices = @transform_1, window_bounds = array<i64: 16, 1>}, {pipeline_mode = #tpu.pipeline_mode<synchronous>, transform_indices = @transform_2, window_bounds = array<i64: 16, 1>}, {pipeline_mode = #tpu.pipeline_mode<synchronous>, transform_indices = @transform_3, window_bounds = array<i64: 3, 8, 48>}, {pipeline_mode = #tpu.pipeline_mode<synchronous>, transform_indices = @transform_4, window_bounds = array<i64: 8, 1>}, {pipeline_mode = #tpu.pipeline_mode<synchronous>, transform_indices = @transform_5, window_bounds = array<i64: 24, 1>}, {pipeline_mode = #tpu.pipeline_mode<synchronous>, transform_indices = @transform_6, window_bounds = array<i64: 24, 1>}, {pipeline_mode = #tpu.pipeline_mode<synchronous>, transform_indices = @transform_7, window_bounds = array<i64: 3, 8, 72>}, {pipeline_mode = #tpu.pipeline_mode<synchronous>, transform_indices = @transform_8, window_bounds = array<i64: 8, 1>}, {pipeline_mode = #tpu.pipeline_mode<synchronous>, transform_indices = @transform_9, window_bounds = array<i64: 32, 1>}, {pipeline_mode = #tpu.pipeline_mode<synchronous>, transform_indices = @transform_10, window_bounds = array<i64: 32, 1>}, {pipeline_mode = #tpu.pipeline_mode<synchronous>, transform_indices = @transform_11, window_bounds = array<i64: 3, 8, 96>}, {pipeline_mode = #tpu.pipeline_mode<synchronous>, transform_indices = @transform_12, window_bounds = array<i64: 8, 1>}, {pipeline_mode = #tpu.pipeline_mode<synchronous>, transform_indices = @transform_13, window_bounds = array<i64: 40, 1>}, {pipeline_mode = #tpu.pipeline_mode<synchronous>, transform_indices = @transform_14, window_bounds = array<i64: 40, 1>}, {pipeline_mode = #tpu.pipeline_mode<synchronous>, transform_indices = @transform_15, window_bounds = array<i64: 3, 8, 120>}, {pipeline_mode = #tpu.pipeline_mode<synchronous>, transform_indices = @transform_16, window_bounds = array<i64: 8, 1>}, {transform_indices = @transform_17, window_bounds = array<i64: 1, 48, 256>}]} {
    %c0 = arith.constant 0 : index
    %c0_0 = arith.constant 0 : index
    %c0_1 = arith.constant 0 : index
    %0 = vector.load %arg1[%c0, %c0_0, %c0_1] : memref<1x16x256xf32, #tpu.memory_space<vmem>>, vector<1x16x256xf32>
    %1 = arith.truncf %0 : vector<1x16x256xf32> to vector<1x16x256xbf16>
    %c0_2 = arith.constant 0 : index
    %c32 = arith.constant 32 : index
    %c0_3 = arith.constant 0 : index
    %2 = vector.load %arg18[%c0_2, %c32, %c0_3] : memref<1x48x256xbf16, #tpu.memory_space<vmem>>, vector<1x16x256xbf16>
    tpu.vector_store %arg18[%c0_2, %c32, %c0_3], %1 {strides = array<i32>} : memref<1x48x256xbf16, #tpu.memory_space<vmem>>, vector<1x16x256xbf16>,
    %3 = tpu.iota {dimensions = array<i32: 1>} : vector<1x256xi32>
    %c16_i32 = arith.constant 16 : i32
    %c0_i32 = arith.constant 0 : i32
    %4 = arith.cmpi eq, %c16_i32, %c0_i32 : i32
    %c1_i32 = arith.constant 1 : i32
    %5 = arith.select %4, %c1_i32, %c16_i32 : i32
    %6 = vector.broadcast %5 : i32 to vector<1x256xi32>
    %7 = arith.remsi %3, %6 : vector<1x256xi32>
    %c0_i32_4 = arith.constant 0 : i32
    %8 = vector.broadcast %c0_i32_4 : i32 to vector<1x256xi32>
    %9 = arith.cmpi ne, %7, %8 : vector<1x256xi32>
    %c0_i32_5 = arith.constant 0 : i32
    %10 = vector.broadcast %c0_i32_5 : i32 to vector<1x256xi32>
    %11 = arith.cmpi slt, %7, %10 : vector<1x256xi32>
    %c0_i32_6 = arith.constant 0 : i32
    %12 = arith.cmpi slt, %5, %c0_i32_6 : i32
    %13 = vector.broadcast %12 : i1 to vector<1x256xi1>
    %14 = vector.broadcast %13 : vector<1x256xi1> to vector<1x256xi1>
    %15 = arith.xori %11, %14 : vector<1x256xi1>
    %16 = arith.andi %15, %9 : vector<1x256xi1>
    %17 = vector.broadcast %5 : i32 to vector<1x256xi32>
    %18 = arith.addi %7, %17 : vector<1x256xi32>
    %19 = arith.select %16, %18, %7 : vector<1x256xi1>, vector<1x256xi32>
    %c0_i32_7 = arith.constant 0 : i32
    %20 = vector.broadcast %c0_i32_7 : i32 to vector<1x256xi32>
    %21 = arith.cmpi sgt, %19, %20 : vector<1x256xi32>
    %c15_i32 = arith.constant 15 : i32
    %22 = vector.broadcast %c15_i32 : i32 to vector<1x256xi32>
    %23 = arith.cmpi slt, %19, %22 : vector<1x256xi32>
    %c16_i32_8 = arith.constant 16 : i32
    %24 = vector.broadcast %c16_i32_8 : i32 to vector<1x256xi32>
    %25 = arith.cmpi sge, %3, %24 : vector<1x256xi32>
    %c240_i32 = arith.constant 240 : i32
    %26 = vector.broadcast %c240_i32 : i32 to vector<1x256xi32>
    %27 = arith.cmpi slt, %3, %26 : vector<1x256xi32>
    %c0_9 = arith.constant 0 : index
    %c32_10 = arith.constant 32 : index
    %c0_11 = arith.constant 0 : index
    %28 = vector.load %arg18[%c0_9, %c32_10, %c0_11] : memref<1x48x256xbf16, #tpu.memory_space<vmem>>, vector<1x16x256xbf16>
    %29 = vector.shape_cast %28 : vector<1x16x256xbf16> to vector<16x256xbf16>
    %30 = arith.extf %29 : vector<16x256xbf16> to vector<16x256xf32>
    %c0_12 = arith.constant 0 : index
    %c0_13 = arith.constant 0 : index
    %31 = vector.load %arg2[%c0_12, %c0_13] : memref<16x1xf32, #tpu.memory_space<vmem>>, vector<16x1xf32>
    %32 = vector.broadcast %31 : vector<16x1xf32> to vector<16x256xf32>
    %33 = arith.mulf %30, %32 : vector<16x256xf32>
    %c0_14 = arith.constant 0 : index
    %c0_15 = arith.constant 0 : index
    %34 = vector.load %arg3[%c0_14, %c0_15] : memref<16x1xf32, #tpu.memory_space<vmem>>, vector<16x1xf32>
    %35 = vector.broadcast %34 : vector<16x1xf32> to vector<16x256xf32>
    %36 = arith.addf %33, %35 : vector<16x256xf32>
    %cst = arith.constant 0.000000e+00 : f32
    %37 = vector.broadcast %cst : f32 to vector<16x256xf32>
    %38 = arith.maximumf %36, %37 : vector<16x256xf32>
    %c1_i32_16 = arith.constant 1 : i32
    %39 = tpu.dynamic_rotate %38 by %c1_i32_16 dim 1 : vector<16x256xf32>, i32 -> vector<16x256xf32>
    %cst_17 = arith.constant 0.000000e+00 : f32
    %40 = vector.shape_cast %21 : vector<1x256xi1> to vector<1x256xi1>
    %41 = vector.broadcast %40 : vector<1x256xi1> to vector<16x256xi1>
    %42 = vector.broadcast %cst_17 : f32 to vector<16x256xf32>
    %43 = arith.select %41, %39, %42 : vector<16x256xi1>, vector<16x256xf32>
    %c255_i32 = arith.constant 255 : i32
    %44 = tpu.dynamic_rotate %38 by %c255_i32 dim 1 : vector<16x256xf32>, i32 -> vector<16x256xf32>
    %cst_18 = arith.constant 0.000000e+00 : f32
    %45 = vector.shape_cast %23 : vector<1x256xi1> to vector<1x256xi1>
    %46 = vector.broadcast %45 : vector<1x256xi1> to vector<16x256xi1>
    %47 = vector.broadcast %cst_18 : f32 to vector<16x256xf32>
    %48 = arith.select %46, %44, %47 : vector<16x256xi1>, vector<16x256xf32>
    %49 = tpu.concatenate %43, %38, %48 in 0 : vector<16x256xf32>, vector<16x256xf32>, vector<16x256xf32> -> vector<48x256xf32>
    %c0_19 = arith.constant 0 : index
    %c0_20 = arith.constant 0 : index
    %50 = vector.load %arg5[%c0_19, %c0_20] : memref<8x1xf32, #tpu.memory_space<vmem>>, vector<8x1xf32>
    %51 = vector.shape_cast %50 : vector<8x1xf32> to vector<8x1xf32>
    %52 = vector.broadcast %51 : vector<8x1xf32> to vector<8x256xf32>
    %c16_i32_21 = arith.constant 16 : i32
    %53 = tpu.dynamic_rotate %49 by %c16_i32_21 dim 1 : vector<48x256xf32>, i32 -> vector<48x256xf32>
    %cst_22 = arith.constant 0.000000e+00 : f32
    %54 = vector.shape_cast %25 : vector<1x256xi1> to vector<1x256xi1>
    %55 = vector.broadcast %54 : vector<1x256xi1> to vector<48x256xi1>
    %56 = vector.broadcast %cst_22 : f32 to vector<48x256xf32>
    %57 = arith.select %55, %53, %56 : vector<48x256xi1>, vector<48x256xf32>
    %c0_23 = arith.constant 0 : index
    %c0_24 = arith.constant 0 : index
    %c0_25 = arith.constant 0 : index
    %58 = vector.load %arg4[%c0_23, %c0_24, %c0_25] : memref<3x8x48xbf16, #tpu.memory_space<vmem>>, vector<1x8x48xbf16>
    %59 = vector.shape_cast %58 : vector<1x8x48xbf16> to vector<8x48xbf16>
    %60 = arith.truncf %57 : vector<48x256xf32> to vector<48x256xbf16>
    %cst_26 = arith.constant dense<0.000000e+00> : vector<8x256xf32>
    %61 = tpu.matmul %59, %60, %cst_26 {dimension_numbers = #tpu.dot_dimension_numbers<[1], [0], [0], [1], [0, 0, 1, 1], [], []>} : vector<8x48xbf16>, vector<48x256xbf16>, vector<8x256xf32> -> vector<8x256xf32>
    %62 = arith.addf %52, %61 : vector<8x256xf32>
    %c1 = arith.constant 1 : index
    %c0_27 = arith.constant 0 : index
    %c0_28 = arith.constant 0 : index
    %63 = vector.load %arg4[%c1, %c0_27, %c0_28] : memref<3x8x48xbf16, #tpu.memory_space<vmem>>, vector<1x8x48xbf16>
    %64 = vector.shape_cast %63 : vector<1x8x48xbf16> to vector<8x48xbf16>
    %65 = arith.truncf %49 : vector<48x256xf32> to vector<48x256xbf16>
    %cst_29 = arith.constant dense<0.000000e+00> : vector<8x256xf32>
    %66 = tpu.matmul %64, %65, %cst_29 {dimension_numbers = #tpu.dot_dimension_numbers<[1], [0], [0], [1], [0, 0, 1, 1], [], []>} : vector<8x48xbf16>, vector<48x256xbf16>, vector<8x256xf32> -> vector<8x256xf32>
    %67 = arith.addf %62, %66 : vector<8x256xf32>
    %c240_i32_30 = arith.constant 240 : i32
    %68 = tpu.dynamic_rotate %49 by %c240_i32_30 dim 1 : vector<48x256xf32>, i32 -> vector<48x256xf32>
    %cst_31 = arith.constant 0.000000e+00 : f32
    %69 = vector.shape_cast %27 : vector<1x256xi1> to vector<1x256xi1>
    %70 = vector.broadcast %69 : vector<1x256xi1> to vector<48x256xi1>
    %71 = vector.broadcast %cst_31 : f32 to vector<48x256xf32>
    %72 = arith.select %70, %68, %71 : vector<48x256xi1>, vector<48x256xf32>
    %c2 = arith.constant 2 : index
    %c0_32 = arith.constant 0 : index
    %c0_33 = arith.constant 0 : index
    %73 = vector.load %arg4[%c2, %c0_32, %c0_33] : memref<3x8x48xbf16, #tpu.memory_space<vmem>>, vector<1x8x48xbf16>
    %74 = vector.shape_cast %73 : vector<1x8x48xbf16> to vector<8x48xbf16>
    %75 = arith.truncf %72 : vector<48x256xf32> to vector<48x256xbf16>
    %cst_34 = arith.constant dense<0.000000e+00> : vector<8x256xf32>
    %76 = tpu.matmul %74, %75, %cst_34 {dimension_numbers = #tpu.dot_dimension_numbers<[1], [0], [0], [1], [0, 0, 1, 1], [], []>} : vector<8x48xbf16>, vector<48x256xbf16>, vector<8x256xf32> -> vector<8x256xf32>
    %77 = arith.addf %67, %76 : vector<8x256xf32>
    %78 = arith.truncf %77 : vector<8x256xf32> to vector<8x256xbf16>
    %79 = vector.shape_cast %78 : vector<8x256xbf16> to vector<1x8x256xbf16>
    %c0_35 = arith.constant 0 : index
    %c24 = arith.constant 24 : index
    %c0_36 = arith.constant 0 : index
    %80 = vector.load %arg18[%c0_35, %c24, %c0_36] : memref<1x48x256xbf16, #tpu.memory_space<vmem>>, vector<1x8x256xbf16>
    tpu.vector_store %arg18[%c0_35, %c24, %c0_36], %79 {strides = array<i32>} : memref<1x48x256xbf16, #tpu.memory_space<vmem>>, vector<1x8x256xbf16>,
    %c0_37 = arith.constant 0 : index
    %c24_38 = arith.constant 24 : index
    %c0_39 = arith.constant 0 : index
    %81 = vector.load %arg18[%c0_37, %c24_38, %c0_39] : memref<1x48x256xbf16, #tpu.memory_space<vmem>>, vector<1x24x256xbf16>
    %82 = vector.shape_cast %81 : vector<1x24x256xbf16> to vector<24x256xbf16>
    %83 = arith.extf %82 : vector<24x256xbf16> to vector<24x256xf32>
    %c0_40 = arith.constant 0 : index
    %c0_41 = arith.constant 0 : index
    %84 = vector.load %arg6[%c0_40, %c0_41] : memref<24x1xf32, #tpu.memory_space<vmem>>, vector<24x1xf32>
    %85 = vector.broadcast %84 : vector<24x1xf32> to vector<24x256xf32>
    %86 = arith.mulf %83, %85 : vector<24x256xf32>
    %c0_42 = arith.constant 0 : index
    %c0_43 = arith.constant 0 : index
    %87 = vector.load %arg7[%c0_42, %c0_43] : memref<24x1xf32, #tpu.memory_space<vmem>>, vector<24x1xf32>
    %88 = vector.broadcast %87 : vector<24x1xf32> to vector<24x256xf32>
    %89 = arith.addf %86, %88 : vector<24x256xf32>
    %cst_44 = arith.constant 0.000000e+00 : f32
    %90 = vector.broadcast %cst_44 : f32 to vector<24x256xf32>
    %91 = arith.maximumf %89, %90 : vector<24x256xf32>
    %c1_i32_45 = arith.constant 1 : i32
    %92 = tpu.dynamic_rotate %91 by %c1_i32_45 dim 1 : vector<24x256xf32>, i32 -> vector<24x256xf32>
    %cst_46 = arith.constant 0.000000e+00 : f32
    %93 = vector.shape_cast %21 : vector<1x256xi1> to vector<1x256xi1>
    %94 = vector.broadcast %93 : vector<1x256xi1> to vector<24x256xi1>
    %95 = vector.broadcast %cst_46 : f32 to vector<24x256xf32>
    %96 = arith.select %94, %92, %95 : vector<24x256xi1>, vector<24x256xf32>
    %c255_i32_47 = arith.constant 255 : i32
    %97 = tpu.dynamic_rotate %91 by %c255_i32_47 dim 1 : vector<24x256xf32>, i32 -> vector<24x256xf32>
    %cst_48 = arith.constant 0.000000e+00 : f32
    %98 = vector.shape_cast %23 : vector<1x256xi1> to vector<1x256xi1>
    %99 = vector.broadcast %98 : vector<1x256xi1> to vector<24x256xi1>
    %100 = vector.broadcast %cst_48 : f32 to vector<24x256xf32>
    %101 = arith.select %99, %97, %100 : vector<24x256xi1>, vector<24x256xf32>
    %102 = tpu.concatenate %96, %91, %101 in 0 : vector<24x256xf32>, vector<24x256xf32>, vector<24x256xf32> -> vector<72x256xf32>
    %c0_49 = arith.constant 0 : index
    %c0_50 = arith.constant 0 : index
    %103 = vector.load %arg9[%c0_49, %c0_50] : memref<8x1xf32, #tpu.memory_space<vmem>>, vector<8x1xf32>
    %104 = vector.shape_cast %103 : vector<8x1xf32> to vector<8x1xf32>
    %105 = vector.broadcast %104 : vector<8x1xf32> to vector<8x256xf32>
    %c16_i32_51 = arith.constant 16 : i32
    %106 = tpu.dynamic_rotate %102 by %c16_i32_51 dim 1 : vector<72x256xf32>, i32 -> vector<72x256xf32>
    %cst_52 = arith.constant 0.000000e+00 : f32
    %107 = vector.shape_cast %25 : vector<1x256xi1> to vector<1x256xi1>
    %108 = vector.broadcast %107 : vector<1x256xi1> to vector<72x256xi1>
    %109 = vector.broadcast %cst_52 : f32 to vector<72x256xf32>
    %110 = arith.select %108, %106, %109 : vector<72x256xi1>, vector<72x256xf32>
    %c0_53 = arith.constant 0 : index
    %c0_54 = arith.constant 0 : index
    %c0_55 = arith.constant 0 : index
    %111 = vector.load %arg8[%c0_53, %c0_54, %c0_55] : memref<3x8x72xbf16, #tpu.memory_space<vmem>>, vector<1x8x72xbf16>
    %112 = vector.shape_cast %111 : vector<1x8x72xbf16> to vector<8x72xbf16>
    %113 = arith.truncf %110 : vector<72x256xf32> to vector<72x256xbf16>
    %cst_56 = arith.constant dense<0.000000e+00> : vector<8x256xf32>
    %114 = tpu.matmul %112, %113, %cst_56 {dimension_numbers = #tpu.dot_dimension_numbers<[1], [0], [0], [1], [0, 0, 1, 1], [], []>} : vector<8x72xbf16>, vector<72x256xbf16>, vector<8x256xf32> -> vector<8x256xf32>
    %115 = arith.addf %105, %114 : vector<8x256xf32>
    %c1_57 = arith.constant 1 : index
    %c0_58 = arith.constant 0 : index
    %c0_59 = arith.constant 0 : index
    %116 = vector.load %arg8[%c1_57, %c0_58, %c0_59] : memref<3x8x72xbf16, #tpu.memory_space<vmem>>, vector<1x8x72xbf16>
    %117 = vector.shape_cast %116 : vector<1x8x72xbf16> to vector<8x72xbf16>
    %118 = arith.truncf %102 : vector<72x256xf32> to vector<72x256xbf16>
    %cst_60 = arith.constant dense<0.000000e+00> : vector<8x256xf32>
    %119 = tpu.matmul %117, %118, %cst_60 {dimension_numbers = #tpu.dot_dimension_numbers<[1], [0], [0], [1], [0, 0, 1, 1], [], []>} : vector<8x72xbf16>, vector<72x256xbf16>, vector<8x256xf32> -> vector<8x256xf32>
    %120 = arith.addf %115, %119 : vector<8x256xf32>
    %c240_i32_61 = arith.constant 240 : i32
    %121 = tpu.dynamic_rotate %102 by %c240_i32_61 dim 1 : vector<72x256xf32>, i32 -> vector<72x256xf32>
    %cst_62 = arith.constant 0.000000e+00 : f32
    %122 = vector.shape_cast %27 : vector<1x256xi1> to vector<1x256xi1>
    %123 = vector.broadcast %122 : vector<1x256xi1> to vector<72x256xi1>
    %124 = vector.broadcast %cst_62 : f32 to vector<72x256xf32>
    %125 = arith.select %123, %121, %124 : vector<72x256xi1>, vector<72x256xf32>
    %c2_63 = arith.constant 2 : index
    %c0_64 = arith.constant 0 : index
    %c0_65 = arith.constant 0 : index
    %126 = vector.load %arg8[%c2_63, %c0_64, %c0_65] : memref<3x8x72xbf16, #tpu.memory_space<vmem>>, vector<1x8x72xbf16>
    %127 = vector.shape_cast %126 : vector<1x8x72xbf16> to vector<8x72xbf16>
    %128 = arith.truncf %125 : vector<72x256xf32> to vector<72x256xbf16>
    %cst_66 = arith.constant dense<0.000000e+00> : vector<8x256xf32>
    %129 = tpu.matmul %127, %128, %cst_66 {dimension_numbers = #tpu.dot_dimension_numbers<[1], [0], [0], [1], [0, 0, 1, 1], [], []>} : vector<8x72xbf16>, vector<72x256xbf16>, vector<8x256xf32> -> vector<8x256xf32>
    %130 = arith.addf %120, %129 : vector<8x256xf32>
    %131 = arith.truncf %130 : vector<8x256xf32> to vector<8x256xbf16>
    %132 = vector.shape_cast %131 : vector<8x256xbf16> to vector<1x8x256xbf16>
    %c0_67 = arith.constant 0 : index
    %c16 = arith.constant 16 : index
    %c0_68 = arith.constant 0 : index
    %133 = vector.load %arg18[%c0_67, %c16, %c0_68] : memref<1x48x256xbf16, #tpu.memory_space<vmem>>, vector<1x8x256xbf16>
    tpu.vector_store %arg18[%c0_67, %c16, %c0_68], %132 {strides = array<i32>} : memref<1x48x256xbf16, #tpu.memory_space<vmem>>, vector<1x8x256xbf16>,
    %c0_69 = arith.constant 0 : index
    %c16_70 = arith.constant 16 : index
    %c0_71 = arith.constant 0 : index
    %134 = vector.load %arg18[%c0_69, %c16_70, %c0_71] : memref<1x48x256xbf16, #tpu.memory_space<vmem>>, vector<1x32x256xbf16>
    %135 = vector.shape_cast %134 : vector<1x32x256xbf16> to vector<32x256xbf16>
    %136 = arith.extf %135 : vector<32x256xbf16> to vector<32x256xf32>
    %c0_72 = arith.constant 0 : index
    %c0_73 = arith.constant 0 : index
    %137 = vector.load %arg10[%c0_72, %c0_73] : memref<32x1xf32, #tpu.memory_space<vmem>>, vector<32x1xf32>
    %138 = vector.broadcast %137 : vector<32x1xf32> to vector<32x256xf32>
    %139 = arith.mulf %136, %138 : vector<32x256xf32>
    %c0_74 = arith.constant 0 : index
    %c0_75 = arith.constant 0 : index
    %140 = vector.load %arg11[%c0_74, %c0_75] : memref<32x1xf32, #tpu.memory_space<vmem>>, vector<32x1xf32>
    %141 = vector.broadcast %140 : vector<32x1xf32> to vector<32x256xf32>
    %142 = arith.addf %139, %141 : vector<32x256xf32>
    %cst_76 = arith.constant 0.000000e+00 : f32
    %143 = vector.broadcast %cst_76 : f32 to vector<32x256xf32>
    %144 = arith.maximumf %142, %143 : vector<32x256xf32>
    %c1_i32_77 = arith.constant 1 : i32
    %145 = tpu.dynamic_rotate %144 by %c1_i32_77 dim 1 : vector<32x256xf32>, i32 -> vector<32x256xf32>
    %cst_78 = arith.constant 0.000000e+00 : f32
    %146 = vector.shape_cast %21 : vector<1x256xi1> to vector<1x256xi1>
    %147 = vector.broadcast %146 : vector<1x256xi1> to vector<32x256xi1>
    %148 = vector.broadcast %cst_78 : f32 to vector<32x256xf32>
    %149 = arith.select %147, %145, %148 : vector<32x256xi1>, vector<32x256xf32>
    %c255_i32_79 = arith.constant 255 : i32
    %150 = tpu.dynamic_rotate %144 by %c255_i32_79 dim 1 : vector<32x256xf32>, i32 -> vector<32x256xf32>
    %cst_80 = arith.constant 0.000000e+00 : f32
    %151 = vector.shape_cast %23 : vector<1x256xi1> to vector<1x256xi1>
    %152 = vector.broadcast %151 : vector<1x256xi1> to vector<32x256xi1>
    %153 = vector.broadcast %cst_80 : f32 to vector<32x256xf32>
    %154 = arith.select %152, %150, %153 : vector<32x256xi1>, vector<32x256xf32>
    %155 = tpu.concatenate %149, %144, %154 in 0 : vector<32x256xf32>, vector<32x256xf32>, vector<32x256xf32> -> vector<96x256xf32>
    %c0_81 = arith.constant 0 : index
    %c0_82 = arith.constant 0 : index
    %156 = vector.load %arg13[%c0_81, %c0_82] : memref<8x1xf32, #tpu.memory_space<vmem>>, vector<8x1xf32>
    %157 = vector.shape_cast %156 : vector<8x1xf32> to vector<8x1xf32>
    %158 = vector.broadcast %157 : vector<8x1xf32> to vector<8x256xf32>
    %c16_i32_83 = arith.constant 16 : i32
    %159 = tpu.dynamic_rotate %155 by %c16_i32_83 dim 1 : vector<96x256xf32>, i32 -> vector<96x256xf32>
    %cst_84 = arith.constant 0.000000e+00 : f32
    %160 = vector.shape_cast %25 : vector<1x256xi1> to vector<1x256xi1>
    %161 = vector.broadcast %160 : vector<1x256xi1> to vector<96x256xi1>
    %162 = vector.broadcast %cst_84 : f32 to vector<96x256xf32>
    %163 = arith.select %161, %159, %162 : vector<96x256xi1>, vector<96x256xf32>
    %c0_85 = arith.constant 0 : index
    %c0_86 = arith.constant 0 : index
    %c0_87 = arith.constant 0 : index
    %164 = vector.load %arg12[%c0_85, %c0_86, %c0_87] : memref<3x8x96xbf16, #tpu.memory_space<vmem>>, vector<1x8x96xbf16>
    %165 = vector.shape_cast %164 : vector<1x8x96xbf16> to vector<8x96xbf16>
    %166 = arith.truncf %163 : vector<96x256xf32> to vector<96x256xbf16>
    %cst_88 = arith.constant dense<0.000000e+00> : vector<8x256xf32>
    %167 = tpu.matmul %165, %166, %cst_88 {dimension_numbers = #tpu.dot_dimension_numbers<[1], [0], [0], [1], [0, 0, 1, 1], [], []>} : vector<8x96xbf16>, vector<96x256xbf16>, vector<8x256xf32> -> vector<8x256xf32>
    %168 = arith.addf %158, %167 : vector<8x256xf32>
    %c1_89 = arith.constant 1 : index
    %c0_90 = arith.constant 0 : index
    %c0_91 = arith.constant 0 : index
    %169 = vector.load %arg12[%c1_89, %c0_90, %c0_91] : memref<3x8x96xbf16, #tpu.memory_space<vmem>>, vector<1x8x96xbf16>
    %170 = vector.shape_cast %169 : vector<1x8x96xbf16> to vector<8x96xbf16>
    %171 = arith.truncf %155 : vector<96x256xf32> to vector<96x256xbf16>
    %cst_92 = arith.constant dense<0.000000e+00> : vector<8x256xf32>
    %172 = tpu.matmul %170, %171, %cst_92 {dimension_numbers = #tpu.dot_dimension_numbers<[1], [0], [0], [1], [0, 0, 1, 1], [], []>} : vector<8x96xbf16>, vector<96x256xbf16>, vector<8x256xf32> -> vector<8x256xf32>
    %173 = arith.addf %168, %172 : vector<8x256xf32>
    %c240_i32_93 = arith.constant 240 : i32
    %174 = tpu.dynamic_rotate %155 by %c240_i32_93 dim 1 : vector<96x256xf32>, i32 -> vector<96x256xf32>
    %cst_94 = arith.constant 0.000000e+00 : f32
    %175 = vector.shape_cast %27 : vector<1x256xi1> to vector<1x256xi1>
    %176 = vector.broadcast %175 : vector<1x256xi1> to vector<96x256xi1>
    %177 = vector.broadcast %cst_94 : f32 to vector<96x256xf32>
    %178 = arith.select %176, %174, %177 : vector<96x256xi1>, vector<96x256xf32>
    %c2_95 = arith.constant 2 : index
    %c0_96 = arith.constant 0 : index
    %c0_97 = arith.constant 0 : index
    %179 = vector.load %arg12[%c2_95, %c0_96, %c0_97] : memref<3x8x96xbf16, #tpu.memory_space<vmem>>, vector<1x8x96xbf16>
    %180 = vector.shape_cast %179 : vector<1x8x96xbf16> to vector<8x96xbf16>
    %181 = arith.truncf %178 : vector<96x256xf32> to vector<96x256xbf16>
    %cst_98 = arith.constant dense<0.000000e+00> : vector<8x256xf32>
    %182 = tpu.matmul %180, %181, %cst_98 {dimension_numbers = #tpu.dot_dimension_numbers<[1], [0], [0], [1], [0, 0, 1, 1], [], []>} : vector<8x96xbf16>, vector<96x256xbf16>, vector<8x256xf32> -> vector<8x256xf32>
    %183 = arith.addf %173, %182 : vector<8x256xf32>
    %184 = arith.truncf %183 : vector<8x256xf32> to vector<8x256xbf16>
    %185 = vector.shape_cast %184 : vector<8x256xbf16> to vector<1x8x256xbf16>
    %c0_99 = arith.constant 0 : index
    %c8 = arith.constant 8 : index
    %c0_100 = arith.constant 0 : index
    %186 = vector.load %arg18[%c0_99, %c8, %c0_100] : memref<1x48x256xbf16, #tpu.memory_space<vmem>>, vector<1x8x256xbf16>
    tpu.vector_store %arg18[%c0_99, %c8, %c0_100], %185 {strides = array<i32>} : memref<1x48x256xbf16, #tpu.memory_space<vmem>>, vector<1x8x256xbf16>,
    %c0_101 = arith.constant 0 : index
    %c8_102 = arith.constant 8 : index
    %c0_103 = arith.constant 0 : index
    %187 = vector.load %arg18[%c0_101, %c8_102, %c0_103] : memref<1x48x256xbf16, #tpu.memory_space<vmem>>, vector<1x40x256xbf16>
    %188 = vector.shape_cast %187 : vector<1x40x256xbf16> to vector<40x256xbf16>
    %189 = arith.extf %188 : vector<40x256xbf16> to vector<40x256xf32>
    %c0_104 = arith.constant 0 : index
    %c0_105 = arith.constant 0 : index
    %190 = vector.load %arg14[%c0_104, %c0_105] : memref<40x1xf32, #tpu.memory_space<vmem>>, vector<40x1xf32>
    %191 = vector.broadcast %190 : vector<40x1xf32> to vector<40x256xf32>
    %192 = arith.mulf %189, %191 : vector<40x256xf32>
    %c0_106 = arith.constant 0 : index
    %c0_107 = arith.constant 0 : index
    %193 = vector.load %arg15[%c0_106, %c0_107] : memref<40x1xf32, #tpu.memory_space<vmem>>, vector<40x1xf32>
    %194 = vector.broadcast %193 : vector<40x1xf32> to vector<40x256xf32>
    %195 = arith.addf %192, %194 : vector<40x256xf32>
    %cst_108 = arith.constant 0.000000e+00 : f32
    %196 = vector.broadcast %cst_108 : f32 to vector<40x256xf32>
    %197 = arith.maximumf %195, %196 : vector<40x256xf32>
    %c1_i32_109 = arith.constant 1 : i32
    %198 = tpu.dynamic_rotate %197 by %c1_i32_109 dim 1 : vector<40x256xf32>, i32 -> vector<40x256xf32>
    %cst_110 = arith.constant 0.000000e+00 : f32
    %199 = vector.shape_cast %21 : vector<1x256xi1> to vector<1x256xi1>
    %200 = vector.broadcast %199 : vector<1x256xi1> to vector<40x256xi1>
    %201 = vector.broadcast %cst_110 : f32 to vector<40x256xf32>
    %202 = arith.select %200, %198, %201 : vector<40x256xi1>, vector<40x256xf32>
    %c255_i32_111 = arith.constant 255 : i32
    %203 = tpu.dynamic_rotate %197 by %c255_i32_111 dim 1 : vector<40x256xf32>, i32 -> vector<40x256xf32>
    %cst_112 = arith.constant 0.000000e+00 : f32
    %204 = vector.shape_cast %23 : vector<1x256xi1> to vector<1x256xi1>
    %205 = vector.broadcast %204 : vector<1x256xi1> to vector<40x256xi1>
    %206 = vector.broadcast %cst_112 : f32 to vector<40x256xf32>
    %207 = arith.select %205, %203, %206 : vector<40x256xi1>, vector<40x256xf32>
    %208 = tpu.concatenate %202, %197, %207 in 0 : vector<40x256xf32>, vector<40x256xf32>, vector<40x256xf32> -> vector<120x256xf32>
    %c0_113 = arith.constant 0 : index
    %c0_114 = arith.constant 0 : index
    %209 = vector.load %arg17[%c0_113, %c0_114] : memref<8x1xf32, #tpu.memory_space<vmem>>, vector<8x1xf32>
    %210 = vector.shape_cast %209 : vector<8x1xf32> to vector<8x1xf32>
    %211 = vector.broadcast %210 : vector<8x1xf32> to vector<8x256xf32>
    %c16_i32_115 = arith.constant 16 : i32
    %212 = tpu.dynamic_rotate %208 by %c16_i32_115 dim 1 : vector<120x256xf32>, i32 -> vector<120x256xf32>
    %cst_116 = arith.constant 0.000000e+00 : f32
    %213 = vector.shape_cast %25 : vector<1x256xi1> to vector<1x256xi1>
    %214 = vector.broadcast %213 : vector<1x256xi1> to vector<120x256xi1>
    %215 = vector.broadcast %cst_116 : f32 to vector<120x256xf32>
    %216 = arith.select %214, %212, %215 : vector<120x256xi1>, vector<120x256xf32>
    %c0_117 = arith.constant 0 : index
    %c0_118 = arith.constant 0 : index
    %c0_119 = arith.constant 0 : index
    %217 = vector.load %arg16[%c0_117, %c0_118, %c0_119] : memref<3x8x120xbf16, #tpu.memory_space<vmem>>, vector<1x8x120xbf16>
    %218 = vector.shape_cast %217 : vector<1x8x120xbf16> to vector<8x120xbf16>
    %219 = arith.truncf %216 : vector<120x256xf32> to vector<120x256xbf16>
    %cst_120 = arith.constant dense<0.000000e+00> : vector<8x256xf32>
    %220 = tpu.matmul %218, %219, %cst_120 {dimension_numbers = #tpu.dot_dimension_numbers<[1], [0], [0], [1], [0, 0, 1, 1], [], []>} : vector<8x120xbf16>, vector<120x256xbf16>, vector<8x256xf32> -> vector<8x256xf32>
    %221 = arith.addf %211, %220 : vector<8x256xf32>
    %c1_121 = arith.constant 1 : index
    %c0_122 = arith.constant 0 : index
    %c0_123 = arith.constant 0 : index
    %222 = vector.load %arg16[%c1_121, %c0_122, %c0_123] : memref<3x8x120xbf16, #tpu.memory_space<vmem>>, vector<1x8x120xbf16>
    %223 = vector.shape_cast %222 : vector<1x8x120xbf16> to vector<8x120xbf16>
    %224 = arith.truncf %208 : vector<120x256xf32> to vector<120x256xbf16>
    %cst_124 = arith.constant dense<0.000000e+00> : vector<8x256xf32>
    %225 = tpu.matmul %223, %224, %cst_124 {dimension_numbers = #tpu.dot_dimension_numbers<[1], [0], [0], [1], [0, 0, 1, 1], [], []>} : vector<8x120xbf16>, vector<120x256xbf16>, vector<8x256xf32> -> vector<8x256xf32>
    %226 = arith.addf %221, %225 : vector<8x256xf32>
    %c240_i32_125 = arith.constant 240 : i32
    %227 = tpu.dynamic_rotate %208 by %c240_i32_125 dim 1 : vector<120x256xf32>, i32 -> vector<120x256xf32>
    %cst_126 = arith.constant 0.000000e+00 : f32
    %228 = vector.shape_cast %27 : vector<1x256xi1> to vector<1x256xi1>
    %229 = vector.broadcast %228 : vector<1x256xi1> to vector<120x256xi1>
    %230 = vector.broadcast %cst_126 : f32 to vector<120x256xf32>
    %231 = arith.select %229, %227, %230 : vector<120x256xi1>, vector<120x256xf32>
    %c2_127 = arith.constant 2 : index
    %c0_128 = arith.constant 0 : index
    %c0_129 = arith.constant 0 : index
    %232 = vector.load %arg16[%c2_127, %c0_128, %c0_129] : memref<3x8x120xbf16, #tpu.memory_space<vmem>>, vector<1x8x120xbf16>
    %233 = vector.shape_cast %232 : vector<1x8x120xbf16> to vector<8x120xbf16>
    %234 = arith.truncf %231 : vector<120x256xf32> to vector<120x256xbf16>
    %cst_130 = arith.constant dense<0.000000e+00> : vector<8x256xf32>
    %235 = tpu.matmul %233, %234, %cst_130 {dimension_numbers = #tpu.dot_dimension_numbers<[1], [0], [0], [1], [0, 0, 1, 1], [], []>} : vector<8x120xbf16>, vector<120x256xbf16>, vector<8x256xf32> -> vector<8x256xf32>
    %236 = arith.addf %226, %235 : vector<8x256xf32>
    %237 = arith.truncf %236 : vector<8x256xf32> to vector<8x256xbf16>
    %238 = vector.shape_cast %237 : vector<8x256xbf16> to vector<1x8x256xbf16>
    %c0_131 = arith.constant 0 : index
    %c0_132 = arith.constant 0 : index
    %c0_133 = arith.constant 0 : index
    %239 = vector.load %arg18[%c0_131, %c0_132, %c0_133] : memref<1x48x256xbf16, #tpu.memory_space<vmem>>, vector<1x8x256xbf16>
    tpu.vector_store %arg18[%c0_131, %c0_132, %c0_133], %238 {strides = array<i32>} : memref<1x48x256xbf16, #tpu.memory_space<vmem>>, vector<1x8x256xbf16>,
    return
  }
  func.func @transform_0(%arg0: i32) -> (i32, i32, i32) {
    %c0_i32 = arith.constant 0 : i32
    %c0_i32_0 = arith.constant 0 : i32
    %c0_i32_1 = arith.constant 0 : i32
    return %arg0, %c0_i32, %c0_i32_0 : i32, i32, i32
  }
  func.func @transform_1(%arg0: i32) -> (i32, i32) {
    %c0_i32 = arith.constant 0 : i32
    %c0_i32_0 = arith.constant 0 : i32
    %c0_i32_1 = arith.constant 0 : i32
    return %c0_i32, %c0_i32_0 : i32, i32
  }
  func.func @transform_2(%arg0: i32) -> (i32, i32) {
    %c0_i32 = arith.constant 0 : i32
    %c0_i32_0 = arith.constant 0 : i32
    %c0_i32_1 = arith.constant 0 : i32
    return %c0_i32, %c0_i32_0 : i32, i32
  }
  func.func @transform_3(%arg0: i32) -> (i32, i32, i32) {
    %c0_i32 = arith.constant 0 : i32
    %c0_i32_0 = arith.constant 0 : i32
    %c0_i32_1 = arith.constant 0 : i32
    %c0_i32_2 = arith.constant 0 : i32
    return %c0_i32, %c0_i32_0, %c0_i32_1 : i32, i32, i32
  }
  func.func @transform_4(%arg0: i32) -> (i32, i32) {
    %c0_i32 = arith.constant 0 : i32
    %c0_i32_0 = arith.constant 0 : i32
    %c0_i32_1 = arith.constant 0 : i32
    return %c0_i32, %c0_i32_0 : i32, i32
  }
  func.func @transform_5(%arg0: i32) -> (i32, i32) {
    %c0_i32 = arith.constant 0 : i32
    %c0_i32_0 = arith.constant 0 : i32
    %c0_i32_1 = arith.constant 0 : i32
    return %c0_i32, %c0_i32_0 : i32, i32
  }
  func.func @transform_6(%arg0: i32) -> (i32, i32) {
    %c0_i32 = arith.constant 0 : i32
    %c0_i32_0 = arith.constant 0 : i32
    %c0_i32_1 = arith.constant 0 : i32
    return %c0_i32, %c0_i32_0 : i32, i32
  }
  func.func @transform_7(%arg0: i32) -> (i32, i32, i32) {
    %c0_i32 = arith.constant 0 : i32
    %c0_i32_0 = arith.constant 0 : i32
    %c0_i32_1 = arith.constant 0 : i32
    %c0_i32_2 = arith.constant 0 : i32
    return %c0_i32, %c0_i32_0, %c0_i32_1 : i32, i32, i32
  }
  func.func @transform_8(%arg0: i32) -> (i32, i32) {
    %c0_i32 = arith.constant 0 : i32
    %c0_i32_0 = arith.constant 0 : i32
    %c0_i32_1 = arith.constant 0 : i32
    return %c0_i32, %c0_i32_0 : i32, i32
  }
  func.func @transform_9(%arg0: i32) -> (i32, i32) {
    %c0_i32 = arith.constant 0 : i32
    %c0_i32_0 = arith.constant 0 : i32
    %c0_i32_1 = arith.constant 0 : i32
    return %c0_i32, %c0_i32_0 : i32, i32
  }
  func.func @transform_10(%arg0: i32) -> (i32, i32) {
    %c0_i32 = arith.constant 0 : i32
    %c0_i32_0 = arith.constant 0 : i32
    %c0_i32_1 = arith.constant 0 : i32
    return %c0_i32, %c0_i32_0 : i32, i32
  }
  func.func @transform_11(%arg0: i32) -> (i32, i32, i32) {
    %c0_i32 = arith.constant 0 : i32
    %c0_i32_0 = arith.constant 0 : i32
    %c0_i32_1 = arith.constant 0 : i32
    %c0_i32_2 = arith.constant 0 : i32
    return %c0_i32, %c0_i32_0, %c0_i32_1 : i32, i32, i32
  }
  func.func @transform_12(%arg0: i32) -> (i32, i32) {
    %c0_i32 = arith.constant 0 : i32
    %c0_i32_0 = arith.constant 0 : i32
    %c0_i32_1 = arith.constant 0 : i32
    return %c0_i32, %c0_i32_0 : i32, i32
  }
  func.func @transform_13(%arg0: i32) -> (i32, i32) {
    %c0_i32 = arith.constant 0 : i32
    %c0_i32_0 = arith.constant 0 : i32
    %c0_i32_1 = arith.constant 0 : i32
    return %c0_i32, %c0_i32_0 : i32, i32
  }
  func.func @transform_14(%arg0: i32) -> (i32, i32) {
    %c0_i32 = arith.constant 0 : i32
    %c0_i32_0 = arith.constant 0 : i32
    %c0_i32_1 = arith.constant 0 : i32
    return %c0_i32, %c0_i32_0 : i32, i32
  }
  func.func @transform_15(%arg0: i32) -> (i32, i32, i32) {
    %c0_i32 = arith.constant 0 : i32
    %c0_i32_0 = arith.constant 0 : i32
    %c0_i32_1 = arith.constant 0 : i32
    %c0_i32_2 = arith.constant 0 : i32
    return %c0_i32, %c0_i32_0, %c0_i32_1 : i32, i32, i32
  }
  func.func @transform_16(%arg0: i32) -> (i32, i32) {
    %c0_i32 = arith.constant 0 : i32
    %c0_i32_0 = arith.constant 0 : i32
    %c0_i32_1 = arith.constant 0 : i32
    return %c0_i32, %c0_i32_0 : i32, i32
  }
  func.func @transform_17(%arg0: i32) -> (i32, i32, i32) {
    %c0_i32 = arith.constant 0 : i32
    %c0_i32_0 = arith.constant 0 : i32
    %c0_i32_1 = arith.constant 0 : i32
    return %arg0, %c0_i32, %c0_i32_0 : i32, i32, i32
  }
}

</mosaic_0001>

<bundles_post_ra>
// kernel: dense_layer_forward.1
= control target key start
LH: loop header
LB: loop body
LE: loop exit
PB: predicated region body
PF: predicated region fallthrough
CT: control target
= control target key end

     0   :  { %s3607_s24 = smov 0   ;;  %s5039_s0 = inlined_call_operand.vmem [shape: f32[2,16,256], index: 0, kind: input, shape index: {}]   ;;  %s5040_s1 = inlined_call_operand.vmem [shape: f32[16,1], index: 1, kind: input, shape index: {}]   ;;  %s5041_s2 = inlined_call_operand.vmem [shape: f32[16,1], index: 2, kind: input, shape index: {}]   ;;  %s5042_s3 = inlined_call_operand.vmem [shape: bf16[3,8,48], index: 3, kind: input, shape index: {}]   ;;  %s5043_s4 = inlined_call_operand.vmem [shape: f32[8,1], index: 4, kind: input, shape index: {}]   ;;  %s5044_s5 = inlined_call_operand.vmem [shape: f32[24,1], index: 5, kind: input, shape index: {}]   ;;  %s5045_s6 = inlined_call_operand.vmem [shape: f32[24,1], index: 6, kind: input, shape index: {}]   ;;  %s5046_s7 = inlined_call_operand.vmem [shape: bf16[3,8,72], index: 7, kind: input, shape index: {}]   ;;  %s5047_s8 = inlined_call_operand.vmem [shape: f32[8,1], index: 8, kind: input, shape index: {}]   ;;  %s5048_s9 = inlined_call_operand.vmem [shape: f32[32,1], index: 9, kind: input, shape index: {}]   ;;  %s5049_s10 = inlined_call_operand.vmem [shape: f32[32,1], index: 10, kind: input, shape index: {}]   ;;  %s5050_s11 = inlined_call_operand.vmem [shape: bf16[3,8,96], index: 11, kind: input, shape index: {}]   ;;  %s5051_s12 = inlined_call_operand.vmem [shape: f32[8,1], index: 12, kind: input, shape index: {}]   ;;  %s5052_s13 = inlined_call_operand.vmem [shape: f32[40,1], index: 13, kind: input, shape index: {}]   ;;  %s5053_s14 = inlined_call_operand.vmem [shape: f32[40,1], index: 14, kind: input, shape index: {}]   ;;  %s5054_s15 = inlined_call_operand.vmem [shape: bf16[3,8,120], index: 15, kind: input, shape index: {}]   ;;  %s5055_s16 = inlined_call_operand.vmem [shape: f32[8,1], index: 16, kind: input, shape index: {}]   ;;  %s5056_s17 = inlined_call_operand.vmem [shape: bf16[2,48,256], index: 17, kind: output, shape index: {}]  }
   0x1   :  { %5078 = sst [smem:[#allocation2_spill]] %s5039_s0 }
   0x2   :  { %5079 = sst [smem:[#allocation3_spill]] %s5040_s1 }
   0x3   :  { %5080 = sst [smem:[#allocation4_spill]] %s5041_s2 }
   0x4 LB: > { %s2673_s25 = sadd.s32 4294967295, %s3509_s24   ;;  %p2677_p0 = scmp.ge.s32.totalorder %s3509_s24, 1  ;;  %s3509_s24 = sphi %s3607_s24, %s27_s24  }
   0x5   : > { %p487_p1 = scmp.lt.s32.totalorder %s3509_s24, 3 }
   0x7   : > { %p488_p2 = pnand %p2677_p0, %p487_p1 }
   0x8   : > { %s5081_s2 = sld [smem:[#allocation4_spill]] (!%p488_p2)  ;;  %p539_p3 = scmp.lt.s32.totalorder (!%p488_p2), %s2673_s25, 1 }
   0x9   : > { %491 = sbr.rel (%p488_p2) target bundleno = 2125 (0x84d), region = 88  ;;  %s5082_s0 = sld [smem:[#allocation3_spill]] (!%p488_p2) }
   0xa   : > { %s5083_s26 = sld [smem:[#allocation2_spill]] (!%p488_p2)  ;;  %s5066_s18 = smov (!%p488_p2), 1  }
   0xb   : > { %s5060_s19 = smov (!%p488_p2), 16   ;;  %s5058_s1 = smov (!%p488_p2), 112  }
   0xc   : > { %s5110_s23 = smov (!%p488_p2), 112  }
   0xe   : > { %v625_v0 = vld [vmem:[%s5081_s2] sm:$0xff]  ;;  %v3511_v2 = vmov 0   ;;  %s5272_s25 = smov (!%p539_p3, %s2673_s25), 1  ;;  %v626_v3 = vld [vmem:[%s5081_s2 + $0x8] sm:$0xff]  ;;  %v568_v35 = vlaneseq  ;;  %vm753_vm10 = vcmask 392192  }
   0xf   : > { %v609_v1 = vld [vmem:[%s5082_s0] sm:$0xff]  ;;  %2942 = vset.pattern.permute.xlu1 %v3511_v2  ;;  %2941 = vset.pattern.permute.xlu0 %v3511_v2  ;;  %v610_v4 = vld [vmem:[%s5082_s0 + $0x8] sm:$0xff]  ;;  %s2919_s20 = sshll.u32 %s5272_s25, 5  ;;  %s2926_s21 = smul.u32 48, %s5272_s25 }
  0x10   : > { %629 = vperm.xlu1 %2942, %v625_v0   ;;  %613 = vperm.xlu0 %2941, %v609_v1   ;;  %s543_s27 = scalar_lea.vmem %s5083_s26, %s2919_s20  ;;  %s5068_s25 = smov 127   ;;  %v3675_v36 = vand.u32 127, %v568_v35 }
  0x11   : > { %789 = vmatprep.mubr.bf16.mxu0 %v3511_v2  ;;  %1213 = vmatprep.mubr.bf16.mxu1 %v3511_v2  ;;  %v550_v5 = vld [vmem:[%s543_s27] sm:$0xff]  ;;  %v551_v6 = vld [vmem:[%s543_s27 + $0x8] sm:$0xff]  ;;  %v552_v7 = vld [vmem:[%s543_s27 + $0x10] sm:$0xff]  ;;  %s3639_s30 = scalar_lea.vmem %s5056_s17, %s2926_s21  ;;  %s5104_s20 = smov 16  }
  0x12   : > { %v3634_v8 = vpack.c.bf16 %v551_v6, %v550_v5  ;;  %v553_v9 = vld [vmem:[%s543_s27 + $0x18] sm:$0xff]  ;;  %v3678_v37 = vadd.s32 128, %v3675_v36  ;;  %v575_v39 = vand.u32 15, %v3675_v36  ;;  %vm5063_vm1 = vcmp.lt.s32.totalorder %v3675_v36, 127  ;;  %s5130_s26 = smov 127   ;;  %s5135_s27 = smov 1  }
  0x13   : > { %v3641_v10 = vpack.c.bf16 %v553_v9, %v552_v7  ;;  %vm5070_vm3 = vcmp.lt.s32.totalorder %v3675_v36, 1  ;;  %vm5072_vm6 = vcmp.lt.s32.totalorder %v3675_v36, 16  ;;  %vm5062_vm7 = vcmp.ge.s32.totalorder %v3675_v36, 16 }
  0x14   : > { %634 = vperm.xlu1 %2942, %v626_v3   ;;  %618 = vperm.xlu0 %2941, %v610_v4   ;;  %566 = vst [vmem:[%s3639_s30 + $0x20] sm:$0xff] %v3634_v8  ;;  %v605_v11 = vunpack.c.l.bf16 %v3634_v8  ;;  %v606_v12 = vunpack.c.h.bf16 %v3634_v8  ;;  %v582_v38 = vand.u32 15, %v3678_v37  ;;  %vm3687_vm2 = vcmp.lt.s32.totalorder %v575_v39, 15  ;;  %vm3814_vm8 = vmpackc.low %vm5062_vm7, %vm5062_vm7 }
  0x15   : > { %567 = vst [vmem:[%s3639_s30 + $0x28] sm:$0xff] %v3641_v10  ;;  %v607_v17 = vunpack.c.l.bf16 %v3641_v10  ;;  %v608_v18 = vunpack.c.h.bf16 %v3641_v10  ;;  %vm3747_vm5 = vcmp.gt.s32.totalorder %v575_v39, 0  ;;  %vm3858_vm11 = vmpackc.low %vm3687_vm2, %vm3687_vm2  ;;  %vm5065_vm12 = vcmp.lt.s32.totalorder %v3675_v36, 112 }
  0x16   : > { %vm3682_vm0 = vcmp.lt.s32.totalorder %v582_v38, 15  ;;  %vm3736_vm4 = vcmp.gt.s32.totalorder %v582_v38, 0  ;;  %vm5064_vm13 = vcmp.lt.s32.totalorder %v3678_v37, 240  ;;  %vm3892_vm15 = vmpackc.low %vm3747_vm5, %vm3747_vm5 }
  0x17   : > { %vm3841_vm9 = vmpackc.low %vm3682_vm0, %vm3682_vm0 }
  0x18   : > { %vm3875_vm14 = vmpackc.low %vm3736_vm4, %vm3736_vm4 }
  0x19   : > { %vm3899_vm7 = vmpackc.low %vm5064_vm13, %vm5064_vm13 }
  0x8b   : > { %v630_v13 = vpop.permute.xlu1 %629  ;;  %v614_v14 = vpop.permute.xlu0 %613 }
  0x8c   : > { %v621_v15 = vmul.f32 %v614_v14, %v605_v11  ;;  %v622_v16 = vmul.f32 %v614_v14, %v606_v12 }
  0x8e   : > { %v637_v20 = vadd.f32 %v630_v13, %v621_v15  ;;  %v638_v21 = vadd.f32 %v630_v13, %v622_v16 }
  0x8f   : > { %v619_v19 = vpop.permute.xlu0 %618  ;;  %v635_v24 = vpop.permute.xlu1 %634 }
  0x90   : > { %v623_v22 = vmul.f32 %v619_v19, %v607_v17  ;;  %v624_v23 = vmul.f32 %v619_v19, %v608_v18  ;;  %v641_v27 = vmax.f32 %v637_v20, 0.0  ;;  %v642_v28 = vmax.f32 %v638_v21, 0.0 }
  0x92   : > { %v639_v25 = vadd.f32 %v635_v24, %v623_v22  ;;  %v640_v26 = vadd.f32 %v635_v24, %v624_v23  ;;  %v981_v23 = vld [vmem:[%s5044_s5 + $0x10] sm:$0xff]  ;;  %v687_v24 = vld [vmem:[%s5043_s4] sm:$0xff] }
  0x94   : > { %v643_v29 = vmax.f32 %v639_v25, 0.0  ;;  %v644_v30 = vmax.f32 %v640_v26, 0.0  ;;  %v979_v25 = vld [vmem:[%s5044_s5] sm:$0xff]  ;;  %v1005_v26 = vld [vmem:[%s5045_s6 + $0x10] sm:$0xff] }
  0x96   : > { %v3659_v31 = vpack.i.bf16 %v644_v30, %v642_v28  ;;  %v3661_v32 = vpack.i.bf16 %v643_v29, %v641_v27  ;;  %v3663_v33 = vpack.c.bf16 %v644_v30, %v642_v28  ;;  %v3665_v34 = vpack.c.bf16 %v643_v29, %v641_v27  ;;  %v1003_v27 = vld [vmem:[%s5045_s6] sm:$0xff]  ;;  %v980_v28 = vld [vmem:[%s5044_s5 + $0x8] sm:$0xff] }
  0x97   : > { %v1004_v29 = vld [vmem:[%s5045_s6 + $0x8] sm:$0xff] }
  0x98   : > { %2949 = vrot.lane.b32.xlu1 %v3659_v31, %s5068_s25  ;;  %2944 = vrot.lane.b32.xlu0 %v3661_v32, %s5068_s25 }
  0x9c   : > { %2959 = vrot.lane.b32.xlu1 %v3659_v31, %s5066_s18  ;;  %2954 = vrot.lane.b32.xlu0 %v3661_v32, %s5066_s18 }
 0x10a   : > { %v2950_v40 = vpop.permute.xlu1 %2949  ;;  %v2945_v41 = vpop.permute.xlu0 %2944 }
 0x10b   : > { %v2952_v44 = vunpack.i.h.bf16 %v2950_v40  ;;  %v2951_v45 = vunpack.i.l.bf16 %v2950_v40  ;;  %v2947_v46 = vunpack.i.h.bf16 %v2945_v41  ;;  %v2946_v47 = vunpack.i.l.bf16 %v2945_v41 }
 0x10d   : > { %v3694_v48 = vsel %vm5063_vm1, %v2951_v45, %v2946_v47  ;;  %v3698_v49 = vsel %vm5063_vm1, %v2952_v44, %v2947_v46  ;;  %v3702_v50 = vsel %vm5063_vm1, %v2946_v47, %v2951_v45  ;;  %v3706_v51 = vsel %vm5063_vm1, %v2947_v46, %v2952_v44 }
 0x10e   : > { %v2960_v52 = vpop.permute.xlu1 %2959  ;;  %v2955_v53 = vpop.permute.xlu0 %2954  ;;  %v684_v54 = vsel %vm3682_vm0, %v3694_v48, 0.0  ;;  %v686_v55 = vsel %vm3682_vm0, %v3698_v49, 0.0  ;;  %v2695_v56 = vpack.c.bf16 %v3698_v49, %v3694_v48  ;;  %v683_v57 = vsel %vm3687_vm2, %v3702_v50, 0.0  ;;  %v2153_v48 = vld [vmem:[%s5055_s16] sm:$0xff] }
 0x10f   : > { %v2962_v58 = vunpack.i.h.bf16 %v2960_v52  ;;  %v2961_v59 = vunpack.i.l.bf16 %v2960_v52  ;;  %v2957_v60 = vunpack.i.h.bf16 %v2955_v53  ;;  %v2956_v61 = vunpack.i.l.bf16 %v2955_v53 }
 0x110   : > { %v2973_v62 = vpack.i.bf16 %v686_v55, %v684_v54  ;;  %v685_v63 = vsel %vm3687_vm2, %v3706_v51, 0.0  ;;  %v2698_v0 = vpack.c.bf16 %v3706_v51, %v3702_v50 }
 0x111   : > { %v2963_v1 = vpack.i.bf16 %v685_v63, %v683_v57  ;;  %v3726_v3 = vsel %vm5070_vm3, %v2956_v61, %v2961_v59  ;;  %v3730_v4 = vsel %vm5070_vm3, %v2957_v60, %v2962_v58  ;;  %v3734_v5 = vsel %vm5070_vm3, %v2961_v59, %v2956_v61 }
 0x112   : > { %2974 = vrot.lane.b32.xlu1 %v2973_v62, %s5060_s19  ;;  %v2701_v7 = vpack.c.bf16 %v3730_v4, %v3726_v3  ;;  %v3745_v9 = vsel %vm5070_vm3, %v2962_v58, %v2957_v60  ;;  %v663_v15 = vsel %vm3736_vm4, %v3726_v3, 0.0  ;;  %v665_v16 = vsel %vm3736_vm4, %v3730_v4, 0.0 }
 0x113   : > { %2964 = vrot.lane.b32.xlu0 %v2963_v1, %s5060_s19  ;;  %v2704_v14 = vpack.c.bf16 %v3745_v9, %v3734_v5  ;;  %v662_v19 = vsel %vm3747_vm5, %v3734_v5, 0.0  ;;  %v664_v20 = vsel %vm3747_vm5, %v3745_v9, 0.0  ;;  %v2988_v21 = vpack.i.bf16 %v665_v16, %v663_v15 }
 0x114   : > { %v2983_v22 = vpack.i.bf16 %v664_v20, %v662_v19 }
 0x116   : > { %2979 = vrot.lane.b32.xlu1 %v3659_v31, %s5060_s19 }
 0x117   : > { %2969 = vrot.lane.b32.xlu0 %v3661_v32, %s5060_s19 }
 0x11a   : > { %2989 = vrot.lane.b32.xlu1 %v2988_v21, %s5060_s19 }
 0x11b   : > { %2984 = vrot.lane.b32.xlu0 %v2983_v22, %s5060_s19 }
 0x11e   : > { %3004 = vrot.lane.b32.xlu1 %v2973_v62, %s5058_s1 }
 0x11f   : > { %2994 = vrot.lane.b32.xlu0 %v2963_v1, %s5058_s1 }
 0x122   : > { %3009 = vrot.lane.b32.xlu1 %v3659_v31, %s5058_s1 }
 0x123   : > { %2999 = vrot.lane.b32.xlu0 %v3661_v32, %s5058_s1 }
 0x126   : > { %3019 = vrot.lane.b32.xlu1 %v2988_v21, %s5058_s1 }
 0x127   : > { %3014 = vrot.lane.b32.xlu0 %v2983_v22, %s5058_s1 }
 0x12a   : > { %994 = vperm.xlu1 %2942, %v981_v23  }
 0x12b   : > { %690 = vperm.xlu0 %2941, %v687_v24  }
 0x12e   : > { %984 = vperm.xlu1 %2942, %v979_v25  }
 0x12f   : > { %1018 = vperm.xlu0 %2941, %v1005_v26  }
 0x132   : > { %1008 = vperm.xlu1 %2942, %v1003_v27  }
 0x133   : > { %989 = vperm.xlu0 %2941, %v980_v28  }
 0x137   : > { %1013 = vperm.xlu0 %2941, %v1004_v29  }
 0x184   : > { %v2975_v30 = vpop.permute.xlu1 %2974 }
 0x185   : > { %v2977_v31 = vunpack.i.h.bf16 %v2975_v30  ;;  %v2976_v32 = vunpack.i.l.bf16 %v2975_v30  ;;  %v2965_v35 = vpop.permute.xlu0 %2964 }
 0x186   : > { %v2967_v38 = vunpack.i.h.bf16 %v2965_v35  ;;  %v2966_v39 = vunpack.i.l.bf16 %v2965_v35  ;;  %v746_v35 = vld [vmem:[%s5042_s3] sm:$0xf] }
 0x188   : > { %v2980_v40 = vpop.permute.xlu1 %2979  ;;  %v722_v41 = vsel %vm5072_vm6, %v2966_v39, %v2976_v32  ;;  %v723_v44 = vsel %vm5072_vm6, %v2967_v38, %v2977_v31  ;;  %v728_v45 = vsel %vm5072_vm6, %v2976_v32, %v2966_v39  ;;  %v729_v46 = vsel %vm5072_vm6, %v2977_v31, %v2967_v38 }
 0x189   : > { %v2982_v47 = vunpack.i.h.bf16 %v2980_v40  ;;  %v2981_v52 = vunpack.i.l.bf16 %v2980_v40  ;;  %v2970_v53 = vpop.permute.xlu0 %2969  ;;  %v752_v54 = vpack.c.bf16 %v723_v44, %v722_v41  ;;  %v2684_v57 = vpack.c.bf16 %v729_v46, %v728_v45 }
 0x18a   : > { %v2972_v58 = vunpack.i.h.bf16 %v2970_v53  ;;  %v2971_v59 = vunpack.i.l.bf16 %v2970_v53  ;;  %v5100_v53 = vmov 0 }
 0x18b   : > { %767 = vmatprep.subr.bf16.mxu0 %v752_v54  ;;  %v5101_v53 = vsel %vm3892_vm15, 4294967295, %v5100_v53 }
 0x18c   : > { %v727_v60 = vsel %vm5072_vm6, %v2982_v47, %v2972_v58  ;;  %v726_v61 = vsel %vm5072_vm6, %v2981_v52, %v2971_v59  ;;  %2685 = vmatpush1.bf16.msk.msra.mxu0 %vm3814_vm8, %v2684_v57  ;;  %v2990_v62 = vpop.permute.xlu1 %2989  ;;  %v720_v63 = vsel %vm5072_vm6, %v2971_v59, %v2981_v52  ;;  %v721_v1 = vsel %vm5072_vm6, %v2972_v58, %v2982_v47 }
 0x18d   : > { %v2992_v15 = vunpack.i.h.bf16 %v2990_v62  ;;  %v2991_v16 = vunpack.i.l.bf16 %v2990_v62  ;;  %v2985_v19 = vpop.permute.xlu0 %2984  ;;  %v750_v20 = vpack.c.bf16 %v721_v1, %v720_v63  ;;  %v2687_v21 = vpack.c.bf16 %v727_v60, %v726_v61  ;;  %v2693_v62 = vld [vmem:[%s5042_s3 + $0x4] sm:$0xf] }
 0x18e   : > { %v2987_v22 = vunpack.i.h.bf16 %v2985_v19  ;;  %v2986_v23 = vunpack.i.l.bf16 %v2985_v19 }
 0x18f   : > { %769 = vmatprep.subr.bf16.mxu0 %v750_v20 }
 0x190   : > { %v725_v24 = vsel %vm5072_vm6, %v2992_v15, %v2987_v22  ;;  %v724_v25 = vsel %vm5072_vm6, %v2991_v16, %v2986_v23  ;;  %2688 = vmatpush1.bf16.msk.msra.mxu0 %vm3814_vm8, %v2687_v21  ;;  %v718_v26 = vsel %vm5072_vm6, %v2986_v23, %v2991_v16  ;;  %v719_v27 = vsel %vm5072_vm6, %v2987_v22, %v2992_v15  ;;  %v3005_v28 = vpop.permute.xlu1 %3004 }
 0x191   : > { %v2995_v29 = vpop.permute.xlu0 %2994  ;;  %v748_v30 = vpack.c.bf16 %v719_v27, %v718_v26  ;;  %v2690_v31 = vpack.c.bf16 %v725_v24, %v724_v25  ;;  %v3007_v41 = vunpack.i.h.bf16 %v3005_v28  ;;  %v3006_v44 = vunpack.i.l.bf16 %v3005_v28 }
 0x192   : > { %v2997_v45 = vunpack.i.h.bf16 %v2995_v29  ;;  %v2996_v46 = vunpack.i.l.bf16 %v2995_v29 }
 0x193   : > { %771 = vmatprep.subr.bf16.mxu0 %v748_v30  ;;  %v2707_v30 = vld [vmem:[%s5042_s3 + $0x8] sm:$0xf] }
 0x194   : > { %2691 = vmatpush1.bf16.msk.msra.mxu0 %vm3814_vm8, %v2690_v31  ;;  %v3010_v39 = vpop.permute.xlu1 %3009  ;;  %v884_v3 = vsel %vm5065_vm12, %v2997_v45, %v3007_v41  ;;  %v883_v4 = vsel %vm5065_vm12, %v2996_v46, %v3006_v44 }
 0x195   : > { %2696 = vmatprep.subr.msk.bf16.mxu0 %vm3841_vm9, %v2695_v56  ;;  %v3000_v40 = vpop.permute.xlu0 %2999  ;;  %v3012_v49 = vunpack.i.h.bf16 %v3010_v39  ;;  %v3011_v50 = vunpack.i.l.bf16 %v3010_v39  ;;  %v913_v63 = vpack.c.bf16 %v884_v3, %v883_v4 }
 0x196   : > { %v3002_v51 = vunpack.i.h.bf16 %v3000_v40  ;;  %v3001_v56 = vunpack.i.l.bf16 %v3000_v40 }
 0x197   : > { %2692 = vmatmul.mubr.msk.bf16.vlgmr.msra.gmra.mxu0 %vm753_vm10, %v746_v35 }
 0x198   : > { %2699 = vmatpush1.bf16.msk.msra.mxu0 %vm3858_vm11, %v2698_v0  ;;  %843 = vmatprep.mubr.bf16.mxu0 %v3511_v2  ;;  %v890_v0 = vsel %vm5065_vm12, %v3007_v41, %v2997_v45  ;;  %v3020_v47 = vpop.permute.xlu1 %3019  ;;  %v887_v54 = vsel %vm5065_vm12, %v3011_v50, %v3001_v56  ;;  %v882_v1 = vsel %vm5065_vm12, %v3002_v51, %v3012_v49 }
 0x199   : > { %823 = vmatprep.subr.bf16.mxu0 %v3663_v33  ;;  %v889_v33 = vsel %vm5065_vm12, %v3006_v44, %v2996_v46  ;;  %v3015_v52 = vpop.permute.xlu0 %3014  ;;  %v3022_v58 = vunpack.i.h.bf16 %v3020_v47  ;;  %v3021_v59 = vunpack.i.l.bf16 %v3020_v47  ;;  %v881_v15 = vsel %vm5065_vm12, %v3001_v56, %v3011_v50 }
 0x19a   : > { %v2709_v57 = vpack.c.bf16 %v890_v0, %v889_v33  ;;  %v3017_v60 = vunpack.i.h.bf16 %v3015_v52  ;;  %v3016_v61 = vunpack.i.l.bf16 %v3015_v52  ;;  %v911_v20 = vpack.c.bf16 %v882_v1, %v881_v15 }
 0x19c   : > { %824 = vmatpush1.bf16.msra.mxu0 %v3665_v34  ;;  %v886_v9 = vsel %vm5065_vm12, %v3022_v58, %v3017_v60  ;;  %v880_v21 = vsel %vm5065_vm12, %v3017_v60, %v3022_v58  ;;  %v879_v22 = vsel %vm5065_vm12, %v3016_v61, %v3021_v59 }
 0x19d   : > { %2702 = vmatprep.subr.msk.bf16.mxu0 %vm3875_vm14, %v2701_v7  ;;  %v888_v7 = vsel %vm5065_vm12, %v3012_v49, %v3002_v51  ;;  %v909_v27 = vpack.c.bf16 %v880_v21, %v879_v22 }
 0x19e   : > { %v2712_v5 = vpack.c.bf16 %v888_v7, %v887_v54 }
 0x1a0   : > { %2705 = vmatpush1.bf16.msk.msra.mxu0 %vm3892_vm15, %v2704_v14  ;;  %v885_v14 = vsel %vm5065_vm12, %v3021_v59, %v3016_v61 }
 0x1a1   : > { %2710 = vmatprep.subr.msk.bf16.mxu0 %vm3899_vm7, %v2709_v57  ;;  %v2715_v23 = vpack.c.bf16 %v886_v9, %v885_v14 }
 0x1a3   : > { %2706 = vmatmul.mubr.msk.bf16.vlgmr.msra.gmra.mxu0 %vm753_vm10, %v2693_v62 }
 0x1a4   : > { %929 = vmatpush1.bf16.msra.mxu0 %v913_v63  ;;  %950 = vmatprep.mubr.bf16.mxu0 %v3511_v2 }
 0x1a5   : > { %2713 = vmatprep.subr.msk.bf16.mxu0 %vm3899_vm7, %v2712_v5  ;;  %v995_v16 = vpop.permute.xlu1 %994 }
 0x1a6   : > { %v691_v19 = vpop.permute.xlu0 %690  ;;  %v1001_v24 = vmul.f32 %v995_v16, %v607_v17  ;;  %v1002_v25 = vmul.f32 %v995_v16, %v608_v18 }
 0x1a8   : > { %931 = vmatpush1.bf16.msra.mxu0 %v911_v20 }
 0x1a9   : > { %2716 = vmatprep.subr.msk.bf16.mxu0 %vm3899_vm7, %v2715_v23  ;;  %v985_v17 = vpop.permute.xlu1 %984 }
 0x1aa   : > { %v1019_v26 = vpop.permute.xlu0 %1018 }
 0x1ab   : > { %v1025_v28 = vadd.f32 %v1019_v26, %v1001_v24  ;;  %v1026_v29 = vadd.f32 %v1019_v26, %v1002_v25 }
 0x1ac   : > { %933 = vmatpush1.bf16.msra.mxu0 %v909_v27 }
 0x1ad   : > { %v3946_v31 = vmax.f32 %v1025_v28, 0.0  ;;  %v3948_v35 = vmax.f32 %v1026_v29, 0.0  ;;  %v1009_v18 = vpop.permute.xlu1 %1008 }
 0x1ae   : > { %v990_v60 = vpop.permute.xlu0 %989 }
 0x1af   : > { %2717 = vmatmul.mubr.msk.bf16.vlgmr.msra.gmra.mxu0 %vm753_vm10, %v2707_v30  ;;  %v3023_v10 = vpack.i.bf16 %v3948_v35, %v3946_v31  ;;  %vm5071_vm10 = vcmask 1043456   ;;  %v999_v21 = vmul.f32 %v990_v60, %v605_v11  ;;  %v1000_v22 = vmul.f32 %v990_v60, %v606_v12 }
 0x1b0   : > { %1277 = vmatprep.mubr.bf16.mxu0 %v3511_v2 }
 0x1b1   : > { %3024 = vrot.lane.b32.xlu1 %v3023_v10, %s5068_s25 }
 0x1b2   : > { %v1014_v16 = vpop.permute.xlu0 %1013 }
 0x1b3   : > { %v1023_v24 = vadd.f32 %v1014_v16, %v999_v21  ;;  %v1024_v25 = vadd.f32 %v1014_v16, %v1000_v22 }
 0x1b5   : > { %v1029_v11 = vmax.f32 %v1023_v24, 0.0  ;;  %v1030_v30 = vmax.f32 %v1024_v25, 0.0  ;;  %v5105_v25 = vmov 0 }
 0x1b7   : > { %v1230_v16 = vpack.c.bf16 %v3946_v31, %v1029_v11 }
 0x223   : > { %v3025_v39 = vpop.permute.xlu1 %3024 }
 0x224   : > { %v3027_v40 = vunpack.i.h.bf16 %v3025_v39  ;;  %v3026_v41 = vunpack.i.l.bf16 %v3025_v39 }
 0x226   : > { %v1071_v44 = vsel %vm5063_vm1, %v3026_v41, %v3027_v40  ;;  %v1074_v45 = vsel %vm5063_vm1, %v3027_v40, %v3026_v41 }
 0x227   : > { %v1080_v46 = vsel %vm3682_vm0, %v1074_v45, 0.0  ;;  %v1079_v49 = vsel %vm3687_vm2, %v1071_v44, 0.0 }
 0x228   : > { %v1235_v50 = vpack.c.bf16 %v1080_v46, %v1080_v46  ;;  %v1234_v51 = vpack.c.bf16 %v1079_v49, %v1079_v49  ;;  %v3963_v56 = vpack.i.bf16 %v1080_v46, %v1079_v49 }
 0x22a   : > { %2734 = vmatprep.subr.msk.bf16.mxu0 %vm5071_vm10, %v1235_v50  ;;  %v1240_v0 = vsel %vm5071_vm10, %v1234_v51, 0 }
 0x22b   : > { %1252 = vmatpush1.bf16.msra.mxu0 %v1240_v0 }
 0x257   : > { %v791_v33 = vpop.f32.mrf.mxu0 }
 0x258   : > { %v798_v58 = vadd.f32 %v791_v33, %v691_v19 }
 0x259   : > { %v793_v47 = vpop.f32.mrf.mxu0 }
 0x25a   : > { %v799_v59 = vadd.f32 %v793_v47, %v691_v19 }
 0x25b   : > { %v795_v52 = vpop.f32.mrf.mxu0 }
 0x25d   : > { %v796_v3 = vpop.f32.mrf.mxu0 }
 0x263   : > { %v845_v4 = vpop.f32.mrf.mxu0 }
 0x264   : > { %v852_v62 = vadd.f32 %v845_v4, %v798_v58 }
 0x265   : > { %v847_v7 = vpop.f32.mrf.mxu0 }
 0x266   : > { %v853_v63 = vadd.f32 %v847_v7, %v799_v59 }
 0x267   : > { %v849_v54 = vpop.f32.mrf.mxu0 }
 0x269   : > { %v850_v57 = vpop.f32.mrf.mxu0 }
 0x26a   : > { %v1231_v57 = vpack.c.bf16 %v3948_v35, %v1030_v30 }
 0x26f   : > { %v952_v61 = vpop.f32.mrf.mxu0 }
 0x270   : > { %v959_v15 = vadd.f32 %v952_v61, %v852_v62 }
 0x271   : > { %v954_v1 = vpop.f32.mrf.mxu0 }
 0x272   : > { %v960_v5 = vadd.f32 %v954_v1, %v853_v63 }
 0x273   : > { %v956_v9 = vpop.f32.mrf.mxu0 }
 0x274   : > { %v3967_v14 = vpack.c.bf16 %v960_v5, %v959_v15 }
 0x275   : > { %v957_v20 = vpop.f32.mrf.mxu0 }
 0x276   : > { %969 = vst [vmem:[%s3639_s30 + $0x18] sm:$0xff] %v3967_v14  ;;  %v974_v19 = vunpack.c.h.bf16 %v3967_v14  ;;  %v973_v23 = vunpack.c.l.bf16 %v3967_v14 }
 0x278   : > { %v998_v26 = vmul.f32 %v985_v17, %v974_v19  ;;  %v997_v27 = vmul.f32 %v985_v17, %v973_v23 }
 0x27a   : > { %v1022_v28 = vadd.f32 %v1009_v18, %v998_v26  ;;  %v1021_v29 = vadd.f32 %v1009_v18, %v997_v27  ;;  %v3073_v26 = vpack.i.bf16 %v3948_v35, %v1030_v30  ;;  %v5107_v35 = vmov 0 }
 0x27c   : > { %v3981_v8 = vmax.f32 %v1022_v28, 0.0  ;;  %v3983_v12 = vmax.f32 %v1021_v29, 0.0 }
 0x27e   : > { %v3033_v39 = vpack.i.bf16 %v1030_v30, %v3981_v8  ;;  %v3028_v40 = vpack.i.bf16 %v1029_v11, %v3983_v12 }
 0x280   : > { %3034 = vrot.lane.b32.xlu1 %v3033_v39, %s5068_s25  ;;  %3029 = vrot.lane.b32.xlu0 %v3028_v40, %s5068_s25 }
 0x284   : > { %3044 = vrot.lane.b32.xlu1 %v3028_v40, %s5066_s18  ;;  %3039 = vrot.lane.b32.xlu0 %v3023_v10, %s5066_s18 }
 0x288   : > { %3054 = vrot.lane.b32.xlu1 %v3963_v56, %s5104_s20  ;;  %3049 = vrot.lane.b32.xlu0 %v3033_v39, %s5066_s18  ;;  %v3063_v39 = vpack.i.bf16 %v3946_v31, %v1029_v11 }
 0x2f2   : > { %v3035_v17 = vpop.permute.xlu1 %3034  ;;  %v3030_v18 = vpop.permute.xlu0 %3029 }
 0x2f3   : > { %v3037_v41 = vunpack.i.h.bf16 %v3035_v17  ;;  %v3036_v44 = vunpack.i.l.bf16 %v3035_v17  ;;  %v3032_v45 = vunpack.i.h.bf16 %v3030_v18  ;;  %v3031_v46 = vunpack.i.l.bf16 %v3030_v18 }
 0x2f5   : > { %v1070_v49 = vsel %vm5063_vm1, %v3032_v45, %v3037_v41  ;;  %v1073_v50 = vsel %vm5063_vm1, %v3037_v41, %v3032_v45  ;;  %v1069_v10 = vsel %vm5063_vm1, %v3031_v46, %v3036_v44  ;;  %v1072_v51 = vsel %vm5063_vm1, %v3036_v44, %v3031_v46 }
 0x2f6   : > { %v2739_v0 = vpack.c.bf16 %v1070_v49, %v1069_v10  ;;  %v3045_v33 = vpop.permute.xlu1 %3044  ;;  %v3040_v47 = vpop.permute.xlu0 %3039  ;;  %v2736_v52 = vpack.c.bf16 %v1073_v50, %v1072_v51  ;;  %v1076_v3 = vsel %vm3682_vm0, %v1072_v51, 0.0  ;;  %v1078_v4 = vsel %vm3682_vm0, %v1073_v50, 0.0 }
 0x2f7   : > { %v3042_v7 = vunpack.i.h.bf16 %v3040_v47  ;;  %v3041_v54 = vunpack.i.l.bf16 %v3040_v47  ;;  %v4009_v58 = vpack.i.bf16 %v1078_v4, %v1076_v3  ;;  %v1075_v59 = vsel %vm3687_vm2, %v1069_v10, 0.0  ;;  %v2733_v4 = vld [vmem:[%s5046_s7 + $0x4] sm:$0xf] }
 0x2f8   : > { %2737 = vmatprep.subr.msk.bf16.mxu0 %vm3841_vm9, %v2736_v52  ;;  %v1077_v60 = vsel %vm3687_vm2, %v1070_v49, 0.0  ;;  %v3047_v63 = vunpack.i.h.bf16 %v3045_v33  ;;  %v3046_v1 = vunpack.i.l.bf16 %v3045_v33  ;;  %vm3516_vm1 = vmmov 1  }
 0x2f9   : > { %v1047_v61 = vsel %vm5070_vm3, %v3041_v54, %v3042_v7  ;;  %2740 = vmatpush1.bf16.msk.msra.mxu0 %vm3858_vm11, %v2739_v0  ;;  %v3058_v62 = vpack.i.bf16 %v1077_v60, %v1075_v59  ;;  %v1050_v15 = vsel %vm5070_vm3, %v3042_v7, %v3041_v54  ;;  %3069 = vrot.lane.b32.xlu1 %v4009_v58, %s5104_s20  ;;  %vm4027_vm13 = vmpackc.low %vm3516_vm1, %vm3736_vm4  ;;  %v1081_v7 = vld [vmem:[%s5047_s8] sm:$0xff]  ;;  %v1447_v54 = vld [vmem:[%s5048_s9 + $0x10] sm:$0xff] }
 0x2fa   : > { %v3055_v5 = vpop.permute.xlu1 %3054  ;;  %v3050_v9 = vpop.permute.xlu0 %3049  ;;  %1255 = vmatprep.subr.bf16.mxu0 %v1231_v57  ;;  %v5106_v25 = vsel %vm4027_vm13, 4294967295, %v5105_v25  ;;  %v2742_v27 = vpack.c.bf16 %v3981_v8, %v1047_v61  ;;  %v1056_v40 = vsel %vm3736_vm4, %v1047_v61, 0.0  ;;  %v2745_v17 = vpack.c.bf16 %v3983_v12, %v1050_v15  ;;  %vm4046_vm12 = vmpackc.low %vm3516_vm1, %vm3747_vm5  ;;  %v1480_v57 = vld [vmem:[%s5049_s10 + $0x18] sm:$0xff]  ;;  %v1446_v59 = vld [vmem:[%s5048_s9 + $0x8] sm:$0xff] }
 0x2fb   : > { %3059 = vrot.lane.b32.xlu0 %v3058_v62, %s5104_s20  ;;  %v3057_v20 = vunpack.i.h.bf16 %v3055_v5  ;;  %v3056_v21 = vunpack.i.l.bf16 %v3055_v5  ;;  %v3052_v22 = vunpack.i.h.bf16 %v3050_v9  ;;  %v3051_v24 = vunpack.i.l.bf16 %v3050_v9  ;;  %v1445_v60 = vld [vmem:[%s5048_s9] sm:$0xff]  ;;  %v1478_v61 = vld [vmem:[%s5049_s10 + $0x8] sm:$0xff] }
 0x2fc   : > { %v5108_v35 = vsel %vm4046_vm12, 4294967295, %v5107_v35  ;;  %v1055_v31 = vsel %vm3747_vm5, %v1050_v15, 0.0  ;;  %vm5109_vm1 = vcmp.ge.s32.totalorder %v3675_v36, 16  ;;  %v3083_v46 = vpack.i.bf16 %v3981_v8, %v1056_v40 }
 0x2fd   : > { %v1046_v28 = vsel %vm5070_vm3, %v3047_v63, %v3052_v22  ;;  %v1045_v29 = vsel %vm5070_vm3, %v3046_v1, %v3051_v24  ;;  %1256 = vmatpush1.bf16.msra.mxu0 %v1230_v16  ;;  %3074 = vrot.lane.b32.xlu1 %v3073_v26, %s5104_s20  ;;  %v1131_v30 = vsel %vm5072_vm6, %v3056_v21, %v3057_v20 }
 0x2fe   : > { %2743 = vmatprep.subr.msk.bf16.mxu0 %vm4027_vm13, %v2742_v27  ;;  %v1140_v11 = vsel %vm5072_vm6, %v3057_v20, %v3056_v21  ;;  %v1049_v18 = vsel %vm5070_vm3, %v3052_v22, %v3047_v63  ;;  %v1048_v41 = vsel %vm5070_vm3, %v3051_v24, %v3046_v1  ;;  %v1169_v44 = vpack.c.bf16 %v1131_v30, %v1131_v30 }
 0x2ff   : > { %3064 = vrot.lane.b32.xlu0 %v3063_v39, %s5104_s20  ;;  %v1157_v45 = vsel %vm5109_vm1, %v1140_v11, 0.0  ;;  %v2748_v50 = vpack.c.bf16 %v1046_v28, %v1045_v29  ;;  %v3078_v10 = vpack.i.bf16 %v3983_v12, %v1055_v31  ;;  %v1052_v51 = vsel %vm3736_vm4, %v1045_v29, 0.0 }
 0x300   : > { %v1168_v49 = vpack.c.bf16 %v1157_v45, %v1157_v45  ;;  %2719 = vmatprep.subr.msk.bf16.mxu1 %vm5071_vm10, %v1169_v44  ;;  %v1054_v0 = vsel %vm3736_vm4, %v1046_v28, 0.0  ;;  %v1051_v8 = vsel %vm3747_vm5, %v1048_v41, 0.0  ;;  %v1053_v47 = vsel %vm3747_vm5, %v1049_v18, 0.0 }
 0x301   : > { %2746 = vmatpush1.bf16.msk.msra.mxu0 %vm4046_vm12, %v2745_v17  ;;  %3084 = vrot.lane.b32.xlu1 %v3083_v46, %s5104_s20  ;;  %v2751_v12 = vpack.c.bf16 %v1049_v18, %v1048_v41  ;;  %v3093_v52 = vpack.i.bf16 %v1054_v0, %v1052_v51  ;;  %v3088_v3 = vpack.i.bf16 %v1053_v47, %v1051_v8  ;;  %vm1170_vm1 = vcmask 588800  }
 0x302   : > { %v1176_v33 = vsel %vm5071_vm10, %v1168_v49, 0  ;;  %2749 = vmatprep.subr.msk.bf16.mxu0 %vm3875_vm14, %v2748_v50  ;;  %vm5111_vm3 = vcmp.lt.s32.totalorder %v3675_v36, 112 }
 0x303   : > { %3079 = vrot.lane.b32.xlu0 %v3078_v10, %s5104_s20  ;;  %1188 = vmatpush1.bf16.msra.mxu1 %v1176_v33  ;;  %vm5112_vm10 = vmmov %vm5111_vm3 }
 0x304   : > { %vm5115_vm12 = vmmov %vm5112_vm10 }
 0x305   : > { %2752 = vmatpush1.bf16.msk.msra.mxu0 %vm3892_vm15, %v2751_v12  ;;  %3094 = vrot.lane.b32.xlu1 %v3093_v52, %s5104_s20  ;;  %vm5116_vm13 = vmmov %vm5112_vm10 }
 0x307   : > { %3089 = vrot.lane.b32.xlu0 %v3088_v3, %s5104_s20 }
 0x308   : > { %2753 = vmatmul.mubr.msk.bf16.vlgmr.msra.gmra.mxu0 %vm1170_vm1, %v2733_v4 }
 0x309   : > { %1732 = vmatprep.mubr.bf16.mxu0 %v3511_v2  ;;  %3104 = vrot.lane.b32.xlu1 %v3058_v62, %s5110_s23  ;;  %v1477_v62 = vld [vmem:[%s5049_s10] sm:$0xff] }
 0x30b   : > { %3099 = vrot.lane.b32.xlu0 %v3963_v56, %s5110_s23  ;;  %v1448_v56 = vld [vmem:[%s5048_s9 + $0x18] sm:$0xff] }
 0x30d   : > { %3109 = vrot.lane.b32.xlu1 %v3063_v39, %s5110_s23 }
 0x30f   : > { %3114 = vrot.lane.b32.xlu0 %v4009_v58, %s5110_s23  ;;  %v1479_v58 = vld [vmem:[%s5049_s10 + $0x10] sm:$0xff] }
 0x311   : > { %3124 = vrot.lane.b32.xlu1 %v3078_v10, %s5110_s23 }
 0x313   : > { %3119 = vrot.lane.b32.xlu0 %v3073_v26, %s5110_s23 }
 0x315   : > { %3134 = vrot.lane.b32.xlu1 %v3088_v3, %s5110_s23 }
 0x317   : > { %3129 = vrot.lane.b32.xlu0 %v3083_v46, %s5110_s23 }
 0x319   : > { %1084 = vperm.xlu1 %2942, %v1081_v7  }
 0x31b   : > { %3139 = vrot.lane.b32.xlu0 %v3093_v52, %s5110_s23 }
 0x31d   : > { %1466 = vperm.xlu1 %2942, %v1448_v56  }
 0x31f   : > { %1461 = vperm.xlu0 %2941, %v1447_v54  }
 0x321   : > { %1498 = vperm.xlu1 %2942, %v1480_v57  }
 0x323   : > { %1493 = vperm.xlu0 %2941, %v1479_v58  }
 0x325   : > { %1456 = vperm.xlu1 %2942, %v1446_v59  }
 0x327   : > { %1451 = vperm.xlu0 %2941, %v1445_v60  }
 0x329   : > { %1488 = vperm.xlu1 %2942, %v1478_v61  }
 0x32b   : > { %1483 = vperm.xlu0 %2941, %v1477_v62  }
 0x36b   : > { %v3070_v63 = vpop.permute.xlu1 %3069 }
 0x36c   : > { %v3072_v1 = vunpack.i.h.bf16 %v3070_v63  ;;  %v3071_v15 = vunpack.i.l.bf16 %v3070_v63 }
 0x36d   : > { %v3060_v5 = vpop.permute.xlu0 %3059 }
 0x36e   : > { %v3062_v9 = vunpack.i.h.bf16 %v3060_v5  ;;  %v3061_v16 = vunpack.i.l.bf16 %v3060_v5 }
 0x36f   : > { %v3075_v22 = vpop.permute.xlu1 %3074 }
 0x370   : > { %v1139_v20 = vsel %vm5072_vm6, %v3072_v1, %v3062_v9  ;;  %v1138_v21 = vsel %vm5072_vm6, %v3071_v15, %v3061_v16  ;;  %v1129_v24 = vsel %vm5072_vm6, %v3061_v16, %v3071_v15  ;;  %v1130_v26 = vsel %vm5072_vm6, %v3062_v9, %v3072_v1 }
 0x371   : > { %v3077_v27 = vunpack.i.h.bf16 %v3075_v22  ;;  %v3076_v28 = vunpack.i.l.bf16 %v3075_v22  ;;  %v3065_v29 = vpop.permute.xlu0 %3064  ;;  %v1167_v39 = vpack.c.bf16 %v1130_v26, %v1129_v24  ;;  %v2721_v40 = vpack.c.bf16 %v1139_v20, %v1138_v21  ;;  %v1159_v22 = vld [vmem:[%s5046_s7] sm:$0xf] }
 0x372   : > { %v3067_v17 = vunpack.i.h.bf16 %v3065_v29  ;;  %v3066_v30 = vunpack.i.l.bf16 %v3065_v29 }
 0x373   : > { %1189 = vmatprep.subr.bf16.mxu1 %v1167_v39  ;;  %v3085_v18 = vpop.permute.xlu1 %3084 }
 0x374   : > { %v1137_v31 = vsel %vm5072_vm6, %v3077_v27, %v3067_v17  ;;  %v1136_v11 = vsel %vm5072_vm6, %v3076_v28, %v3066_v30  ;;  %2722 = vmatpush1.bf16.msk.msra.mxu1 %vm3814_vm8, %v2721_v40  ;;  %v1127_v41 = vsel %vm5072_vm6, %v3066_v30, %v3076_v28  ;;  %v1128_v44 = vsel %vm5072_vm6, %v3067_v17, %v3077_v27 }
 0x375   : > { %v3087_v45 = vunpack.i.h.bf16 %v3085_v18  ;;  %v3086_v46 = vunpack.i.l.bf16 %v3085_v18  ;;  %v3080_v49 = vpop.permute.xlu0 %3079  ;;  %v1165_v50 = vpack.c.bf16 %v1128_v44, %v1127_v41  ;;  %v2724_v10 = vpack.c.bf16 %v1137_v31, %v1136_v11 }
 0x376   : > { %v3082_v51 = vunpack.i.h.bf16 %v3080_v49  ;;  %v3081_v0 = vunpack.i.l.bf16 %v3080_v49 }
 0x377   : > { %1191 = vmatprep.subr.bf16.mxu1 %v1165_v50  ;;  %v3095_v47 = vpop.permute.xlu1 %3094 }
 0x378   : > { %v1135_v33 = vsel %vm5072_vm6, %v3087_v45, %v3082_v51  ;;  %v1134_v8 = vsel %vm5072_vm6, %v3086_v46, %v3081_v0  ;;  %2725 = vmatpush1.bf16.msk.msra.mxu1 %vm3814_vm8, %v2724_v10  ;;  %v1125_v12 = vsel %vm5072_vm6, %v3081_v0, %v3086_v46  ;;  %v1126_v52 = vsel %vm5072_vm6, %v3082_v51, %v3087_v45 }
 0x379   : > { %v3097_v3 = vunpack.i.h.bf16 %v3095_v47  ;;  %v3096_v4 = vunpack.i.l.bf16 %v3095_v47  ;;  %v3090_v7 = vpop.permute.xlu0 %3089  ;;  %v1163_v56 = vpack.c.bf16 %v1126_v52, %v1125_v12  ;;  %v2727_v54 = vpack.c.bf16 %v1135_v33, %v1134_v8 }
 0x37a   : > { %v3092_v57 = vunpack.i.h.bf16 %v3090_v7  ;;  %v3091_v58 = vunpack.i.l.bf16 %v3090_v7 }
 0x37b   : > { %1193 = vmatprep.subr.bf16.mxu1 %v1163_v56  ;;  %v3105_v61 = vpop.permute.xlu1 %3104 }
 0x37c   : > { %v1133_v59 = vsel %vm5072_vm6, %v3097_v3, %v3092_v57  ;;  %v1132_v60 = vsel %vm5072_vm6, %v3096_v4, %v3091_v58  ;;  %2728 = vmatpush1.bf16.msk.msra.mxu1 %vm3814_vm8, %v2727_v54  ;;  %v1123_v62 = vsel %vm5072_vm6, %v3091_v58, %v3096_v4  ;;  %v1124_v63 = vsel %vm5072_vm6, %v3092_v57, %v3097_v3 }
 0x37d   : > { %v3100_v1 = vpop.permute.xlu0 %3099  ;;  %v1161_v15 = vpack.c.bf16 %v1124_v63, %v1123_v62  ;;  %v2730_v5 = vpack.c.bf16 %v1133_v59, %v1132_v60  ;;  %v3107_v26 = vunpack.i.h.bf16 %v3105_v61  ;;  %vm5113_vm6 = vcmp.lt.s32.totalorder %v3678_v37, 240 }
 0x37e   : > { %v3102_v9 = vunpack.i.h.bf16 %v3100_v1  ;;  %v3101_v16 = vunpack.i.l.bf16 %v3100_v1  ;;  %v3106_v39 = vunpack.i.l.bf16 %v3105_v61 }
 0x37f   : > { %1195 = vmatprep.subr.bf16.mxu1 %v1161_v15  ;;  %v3110_v21 = vpop.permute.xlu1 %3109 }
 0x380   : > { %v1341_v20 = vsel %vm5111_vm3, %v3102_v9, %v3101_v16  ;;  %2731 = vmatpush1.bf16.msk.msra.mxu1 %vm3814_vm8, %v2730_v5  ;;  %v1332_v24 = vsel %vm5112_vm10, %v3101_v16, %v3102_v9  ;;  %vm5114_vm3 = vcmask 1043456   ;;  %v3112_v50 = vunpack.i.h.bf16 %v3110_v21 }
 0x381   : > { %v3115_v27 = vpop.permute.xlu0 %3114  ;;  %v1359_v28 = vsel %vm5113_vm6, %v1341_v20, 0.0  ;;  %v1370_v29 = vpack.c.bf16 %v1332_v24, %v1332_v24  ;;  %vm5117_vm6 = vmmov %vm5112_vm10  ;;  %v3111_v10 = vunpack.i.l.bf16 %v3110_v21 }
 0x382   : > { %v3117_v40 = vunpack.i.h.bf16 %v3115_v27  ;;  %v3116_v17 = vunpack.i.l.bf16 %v3115_v27  ;;  %v1371_v30 = vpack.c.bf16 %v1359_v28, %v1359_v28  ;;  %vm5118_vm15 = vmmov %vm5114_vm3 }
 0x383   : > { %2732 = vmatmul.mubr.msk.bf16.vlgmr.msra.gmra.mxu1 %vm1170_vm1, %v1159_v22  ;;  %v1376_v31 = vsel %vm5114_vm3, %v1370_v29, 0  ;;  %v3125_v45 = vpop.permute.xlu1 %3124  ;;  %vm5122_vm3 = vmmov %vm5117_vm6 }
 0x384   : > { %v1331_v11 = vsel %vm5115_vm12, %v3107_v26, %v3117_v40  ;;  %v1340_v18 = vsel %vm5116_vm13, %v3117_v40, %v3107_v26  ;;  %v1330_v41 = vsel %vm5112_vm10, %v3106_v39, %v3116_v17  ;;  %v1339_v44 = vsel %vm5117_vm6, %v3116_v17, %v3106_v39  ;;  %2755 = vmatprep.subr.msk.bf16.mxu1 %vm5118_vm15, %v1371_v30  ;;  %vm5119_vm12 = vmmov %vm5117_vm6  ;;  %v2754_v40 = vld [vmem:[%s5046_s7 + $0x8] sm:$0xf]  ;;  %v4230_v30 = vld [vmem:[%s3639_s30 + $0x20] sm:$0xff] }
 0x385   : > { %v3120_v46 = vpop.permute.xlu0 %3119  ;;  %1388 = vmatpush1.bf16.msra.mxu1 %v1376_v31  ;;  %v2757_v49 = vpack.c.bf16 %v1340_v18, %v1339_v44  ;;  %1413 = vmatprep.mubr.bf16.mxu1 %v3511_v2  ;;  %v1368_v33 = vpack.c.bf16 %v1331_v11, %v1330_v41  ;;  %vm5120_vm13 = vmmov %vm5117_vm6  ;;  %v3127_v7 = vunpack.i.h.bf16 %v3125_v45  ;;  %v3126_v56 = vunpack.i.l.bf16 %v3125_v45  ;;  %v4227_v17 = vld [vmem:[%s3639_s30 + $0x28] sm:$0xff] }
 0x386   : > { %v3122_v51 = vunpack.i.h.bf16 %v3120_v46  ;;  %v3121_v0 = vunpack.i.l.bf16 %v3120_v46  ;;  %vm5121_vm15 = vmmov %vm5117_vm6  ;;  %v1443_v31 = vunpack.c.l.bf16 %v4227_v17  ;;  %v1444_v11 = vunpack.c.h.bf16 %v4227_v17 }
 0x387   : > { %2758 = vmatprep.subr.msk.bf16.mxu1 %vm3899_vm7, %v2757_v49  ;;  %v3135_v59 = vpop.permute.xlu1 %3134  ;;  %vm5123_vm10 = vmmov %vm5122_vm3  ;;  %v1441_v41 = vunpack.c.l.bf16 %v4230_v30  ;;  %v1442_v44 = vunpack.c.h.bf16 %v4230_v30 }
 0x388   : > { %v1329_v8 = vsel %vm5119_vm12, %v3112_v50, %v3122_v51  ;;  %v1338_v47 = vsel %vm5120_vm13, %v3122_v51, %v3112_v50  ;;  %v1328_v12 = vsel %vm5121_vm15, %v3111_v10, %v3121_v0  ;;  %v1337_v52 = vsel %vm5122_vm3, %v3121_v0, %v3111_v10  ;;  %vm5124_vm6 = vmmov %vm5122_vm3 }
 0x389   : > { %v2760_v3 = vpack.c.bf16 %v1338_v47, %v1337_v52  ;;  %v3130_v4 = vpop.permute.xlu0 %3129  ;;  %1390 = vmatpush1.bf16.msra.mxu1 %v1368_v33  ;;  %v1366_v58 = vpack.c.bf16 %v1329_v8, %v1328_v12  ;;  %vm5125_vm12 = vmmov %vm5122_vm3  ;;  %v3137_v5 = vunpack.i.h.bf16 %v3135_v59  ;;  %v3136_v9 = vunpack.i.l.bf16 %v3135_v59 }
 0x38a   : > { %v3132_v54 = vunpack.i.h.bf16 %v3130_v4  ;;  %v3131_v57 = vunpack.i.l.bf16 %v3130_v4  ;;  %vm5126_vm13 = vmmov %vm5122_vm3 }
 0x38b   : > { %2761 = vmatprep.subr.msk.bf16.mxu1 %vm3899_vm7, %v2760_v3  ;;  %vm5127_vm15 = vmmov %vm5122_vm3 }
 0x38c   : > { %v1327_v60 = vsel %vm5123_vm10, %v3127_v7, %v3132_v54  ;;  %v1336_v61 = vsel %vm5124_vm6, %v3132_v54, %v3127_v7  ;;  %v1326_v62 = vsel %vm5125_vm12, %v3126_v56, %v3131_v57  ;;  %v1335_v63 = vsel %vm5126_vm13, %v3131_v57, %v3126_v56  ;;  %vm5128_vm10 = vmmov %vm5122_vm3 }
 0x38d   : > { %v2763_v1 = vpack.c.bf16 %v1336_v61, %v1335_v63  ;;  %v3140_v15 = vpop.permute.xlu0 %3139  ;;  %1392 = vmatpush1.bf16.msra.mxu1 %v1366_v58  ;;  %v1364_v21 = vpack.c.bf16 %v1327_v60, %v1326_v62  ;;  %vm5129_vm6 = vmmov %vm5122_vm3 }
 0x38e   : > { %v3142_v16 = vunpack.i.h.bf16 %v3140_v15  ;;  %v3141_v20 = vunpack.i.l.bf16 %v3140_v15 }
 0x38f   : > { %2764 = vmatprep.subr.msk.bf16.mxu1 %vm3899_vm7, %v2763_v1 }
 0x390   : > { %v1325_v22 = vsel %vm5127_vm15, %v3137_v5, %v3142_v16  ;;  %v1334_v24 = vsel %vm5122_vm3, %v3142_v16, %v3137_v5  ;;  %v1324_v26 = vsel %vm5128_vm10, %v3136_v9, %v3141_v20  ;;  %v1333_v27 = vsel %vm5129_vm6, %v3141_v20, %v3136_v9 }
 0x391   : > { %v2766_v28 = vpack.c.bf16 %v1334_v24, %v1333_v27  ;;  %1394 = vmatpush1.bf16.msra.mxu1 %v1364_v21  ;;  %v1362_v29 = vpack.c.bf16 %v1325_v22, %v1324_v26 }
 0x393   : > { %2767 = vmatprep.subr.msk.bf16.mxu1 %vm3899_vm7, %v2766_v28 }
 0x394   : > { %v4221_v39 = vpop.permute.xlu1 %1084 }
 0x395   : > { %1396 = vmatpush1.bf16.msra.mxu1 %v1362_v29 }
 0x398   : > { %2768 = vmatmul.mubr.msk.bf16.vlgmr.msra.gmra.mxu1 %vm1170_vm1, %v2754_v40  ;;  %v1467_v18 = vpop.permute.xlu1 %1466  ;;  %vm5131_vm1 = vcmp.lt.s32.totalorder %v3675_v36, 127 }
 0x399   : > { %1792 = vmatprep.mubr.bf16.mxu1 %v3511_v2  ;;  %v1475_v46 = vmul.f32 %v1467_v18, %v1443_v31  ;;  %v1476_v49 = vmul.f32 %v1467_v18, %v1444_v11  ;;  %vm5132_vm12 = vmmov %vm5131_vm1 }
 0x39a   : > { %v1462_v45 = vpop.permute.xlu0 %1461  ;;  %vm5133_vm13 = vmmov %vm5131_vm1 }
 0x39b   : > { %v1473_v50 = vmul.f32 %v1462_v45, %v1441_v41  ;;  %v1474_v10 = vmul.f32 %v1462_v45, %v1442_v44  ;;  %vm5134_vm15 = vmmov %vm5131_vm1 }
 0x39c   : > { %v1499_v51 = vpop.permute.xlu1 %1498  ;;  %vm5136_vm3 = vmmov %vm5131_vm1 }
 0x39d   : > { %v1507_v0 = vadd.f32 %v1499_v51, %v1475_v46  ;;  %v1508_v33 = vadd.f32 %v1499_v51, %v1476_v49  ;;  %vm5137_vm10 = vmmov %vm5131_vm1 }
 0x39e   : > { %v1494_v8 = vpop.permute.xlu0 %1493  ;;  %vm5138_vm6 = vmmov %vm5131_vm1 }
 0x39f   : > { %v1505_v47 = vadd.f32 %v1494_v8, %v1473_v50  ;;  %v1506_v12 = vadd.f32 %v1494_v8, %v1474_v10  ;;  %v1515_v52 = vmax.f32 %v1507_v0, 0.0  ;;  %v1516_v3 = vmax.f32 %v1508_v33, 0.0 }
 0x3a0   : > { %v1457_v63 = vpop.permute.xlu1 %1456 }
 0x3a1   : > { %v1513_v4 = vmax.f32 %v1505_v47, 0.0  ;;  %v1514_v7 = vmax.f32 %v1506_v12, 0.0 }
 0x3a2   : > { %v1452_v1 = vpop.permute.xlu0 %1451 }
 0x3a3   : > { %v4246_v56 = vpack.i.bf16 %v1516_v3, %v1514_v7  ;;  %v4248_v54 = vpack.i.bf16 %v1515_v52, %v1513_v4  ;;  %v4250_v57 = vpack.c.bf16 %v1516_v3, %v1514_v7  ;;  %v4252_v58 = vpack.c.bf16 %v1515_v52, %v1513_v4 }
 0x3a4   : > { %v1489_v15 = vpop.permute.xlu1 %1488 }
 0x3a5   : > { %3149 = vrot.lane.b32.xlu1 %v4246_v56, %s5130_s26  ;;  %3144 = vrot.lane.b32.xlu0 %v4248_v54, %s5130_s26 }
 0x3a6   : > { %v1484_v5 = vpop.permute.xlu0 %1483 }
 0x3c8   : > { %v1279_v59 = vpop.f32.mrf.mxu0 }
 0x3ca   : > { %v1281_v60 = vpop.f32.mrf.mxu0 }
 0x3cc   : > { %v1283_v61 = vpop.f32.mrf.mxu0 }
 0x3ce   : > { %v1284_v62 = vpop.f32.mrf.mxu0 }
 0x417   : > { %v3150_v9 = vpop.permute.xlu1 %3149  ;;  %v3145_v16 = vpop.permute.xlu0 %3144 }
 0x418   : > { %v3152_v20 = vunpack.i.h.bf16 %v3150_v9  ;;  %v3151_v21 = vunpack.i.l.bf16 %v3150_v9  ;;  %v3147_v22 = vunpack.i.h.bf16 %v3145_v16  ;;  %v3146_v24 = vunpack.i.l.bf16 %v3145_v16 }
 0x41a   : > { %v1568_v26 = vsel %vm5131_vm1, %v3147_v22, %v3152_v20  ;;  %v1572_v27 = vsel %vm5132_vm12, %v3152_v20, %v3147_v22  ;;  %v1567_v28 = vsel %vm5133_vm13, %v3146_v24, %v3151_v21  ;;  %v1571_v29 = vsel %vm5134_vm15, %v3151_v21, %v3146_v24 }
 0x41b   : > { %v2791_v40 = vpack.c.bf16 %v1572_v27, %v1571_v29  ;;  %v2794_v18 = vpack.c.bf16 %v1568_v26, %v1567_v28  ;;  %v1578_v45 = vsel %vm3682_vm0, %v1571_v29, 0.0  ;;  %v1580_v46 = vsel %vm3682_vm0, %v1572_v27, 0.0 }
 0x41c   : > { %v4270_v49 = vpack.i.bf16 %v1580_v46, %v1578_v45  ;;  %v1577_v50 = vsel %vm3687_vm2, %v1567_v28, 0.0  ;;  %v1579_v10 = vsel %vm3687_vm2, %v1568_v26, 0.0  ;;  %v1471_v22 = vmul.f32 %v1457_v63, %v973_v23 }
 0x41d   : > { %2792 = vmatprep.subr.msk.bf16.mxu1 %vm3841_vm9, %v2791_v40  ;;  %v4278_v51 = vpack.i.bf16 %v1579_v10, %v1577_v50  ;;  %v1472_v24 = vmul.f32 %v1457_v63, %v974_v19  ;;  %vm5139_vm12 = vcmp.lt.s32.totalorder %v3675_v36, 1 }
 0x41e   : > { %2795 = vmatpush1.bf16.msk.msra.mxu1 %vm3858_vm11, %v2794_v18  ;;  %vm5140_vm13 = vmmov %vm5139_vm12 }
 0x41f   : > { %v1504_v26 = vadd.f32 %v1489_v15, %v1472_v24  ;;  %vm5141_vm15 = vmmov %vm5139_vm12 }
 0x421   : > { %v1512_v18 = vmax.f32 %v1504_v26, 0.0 }
 0x443   : > { %v1215_v0 = vpop.f32.mrf.mxu1 }
 0x444   : > { %v1222_v12 = vadd.f32 %v1215_v0, %v4221_v39 }
 0x445   : > { %v1217_v33 = vpop.f32.mrf.mxu1 }
 0x446   : > { %v1223_v52 = vadd.f32 %v1217_v33, %v4221_v39  ;;  %v1286_v4 = vadd.f32 %v1279_v59, %v1222_v12 }
 0x447   : > { %v1219_v8 = vpop.f32.mrf.mxu1 }
 0x448   : > { %v1287_v7 = vadd.f32 %v1281_v60, %v1223_v52  ;;  %v1503_v60 = vadd.f32 %v1489_v15, %v1471_v22 }
 0x449   : > { %v1220_v47 = vpop.f32.mrf.mxu1 }
 0x44a   : > { %v1511_v23 = vmax.f32 %v1503_v60, 0.0 }
 0x458   : > { %v1415_v3 = vpop.f32.mrf.mxu1 }
 0x459   : > { %v1422_v62 = vadd.f32 %v1415_v3, %v1286_v4 }
 0x45a   : > { %v1417_v61 = vpop.f32.mrf.mxu1 }
 0x45b   : > { %v1423_v9 = vadd.f32 %v1417_v61, %v1287_v7 }
 0x45c   : > { %v1419_v16 = vpop.f32.mrf.mxu1 }
 0x45d   : > { %v4284_v20 = vpack.c.bf16 %v1423_v9, %v1422_v62 }
 0x45e   : > { %v1420_v21 = vpop.f32.mrf.mxu1 }
 0x45f   : > { %1432 = vst [vmem:[%s3639_s30 + $0x10] sm:$0xff] %v4284_v20  ;;  %v1438_v39 = vunpack.c.h.bf16 %v4284_v20  ;;  %v1437_v59 = vunpack.c.l.bf16 %v4284_v20 }
 0x461   : > { %v1470_v27 = vmul.f32 %v1452_v1, %v1438_v39  ;;  %v1469_v28 = vmul.f32 %v1452_v1, %v1437_v59 }
 0x463   : > { %v1502_v29 = vadd.f32 %v1484_v5, %v1470_v27  ;;  %v1501_v40 = vadd.f32 %v1484_v5, %v1469_v28 }
 0x465   : > { %v1510_v14 = vmax.f32 %v1502_v29, 0.0  ;;  %v1509_v19 = vmax.f32 %v1501_v40, 0.0 }
 0x467   : > { %v4298_v63 = vpack.i.bf16 %v1512_v18, %v1510_v14  ;;  %v4300_v45 = vpack.i.bf16 %v1511_v23, %v1509_v19  ;;  %v1750_v46 = vpack.c.bf16 %v1512_v18, %v1510_v14  ;;  %v4302_v50 = vpack.c.bf16 %v1511_v23, %v1509_v19 }
 0x469   : > { %3159 = vrot.lane.b32.xlu1 %v4298_v63, %s5130_s26  ;;  %3154 = vrot.lane.b32.xlu0 %v4300_v45, %s5130_s26 }
 0x46d   : > { %3169 = vrot.lane.b32.xlu1 %v4246_v56, %s5135_s27  ;;  %3164 = vrot.lane.b32.xlu0 %v4248_v54, %s5135_s27 }
 0x471   : > { %3179 = vrot.lane.b32.xlu1 %v4298_v63, %s5135_s27  ;;  %3174 = vrot.lane.b32.xlu0 %v4300_v45, %s5135_s27 }
 0x475   : > { %3189 = vrot.lane.b32.xlu1 %v4270_v49, %s5104_s20  ;;  %3184 = vrot.lane.b32.xlu0 %v4278_v51, %s5104_s20 }
 0x4db   : > { %v3160_v1 = vpop.permute.xlu1 %3159  ;;  %v3155_v15 = vpop.permute.xlu0 %3154 }
 0x4dc   : > { %v3162_v5 = vunpack.i.h.bf16 %v3160_v1  ;;  %v3161_v10 = vunpack.i.l.bf16 %v3160_v1  ;;  %v3157_v0 = vunpack.i.h.bf16 %v3155_v15  ;;  %v3156_v33 = vunpack.i.l.bf16 %v3155_v15 }
 0x4de   : > { %v1566_v8 = vsel %vm5136_vm3, %v3157_v0, %v3162_v5  ;;  %v1570_v47 = vsel %vm5137_vm10, %v3162_v5, %v3157_v0  ;;  %v1565_v12 = vsel %vm5138_vm6, %v3156_v33, %v3161_v10  ;;  %v1569_v52 = vsel %vm5131_vm1, %v3161_v10, %v3156_v33  ;;  %vm5142_vm3 = vmmov %vm5139_vm12 }
 0x4df   : > { %v2797_v3 = vpack.c.bf16 %v1570_v47, %v1569_v52  ;;  %v2800_v4 = vpack.c.bf16 %v1566_v8, %v1565_v12  ;;  %v3170_v7 = vpop.permute.xlu1 %3169  ;;  %v3165_v61 = vpop.permute.xlu0 %3164  ;;  %v1574_v62 = vsel %vm3682_vm0, %v1569_v52, 0.0  ;;  %v1576_v9 = vsel %vm3682_vm0, %v1570_v47, 0.0  ;;  %vm5143_vm10 = vmmov %vm5142_vm3 }
 0x4e0   : > { %v3172_v16 = vunpack.i.h.bf16 %v3170_v7  ;;  %v3171_v21 = vunpack.i.l.bf16 %v3170_v7  ;;  %v3167_v22 = vunpack.i.h.bf16 %v3165_v61  ;;  %v3166_v24 = vunpack.i.l.bf16 %v3165_v61  ;;  %vm5144_vm6 = vmmov %vm5142_vm3 }
 0x4e1   : > { %2798 = vmatprep.subr.msk.bf16.mxu1 %vm3841_vm9, %v2797_v3  ;;  %v4334_v60 = vpack.i.bf16 %v1576_v9, %v1574_v62  ;;  %v1573_v26 = vsel %vm3687_vm2, %v1565_v12, 0.0  ;;  %v1575_v27 = vsel %vm3687_vm2, %v1566_v8, 0.0  ;;  %vm5145_vm1 = vcmp.lt.s32.totalorder %v3675_v36, 16 }
 0x4e2   : > { %2801 = vmatpush1.bf16.msk.msra.mxu1 %vm3858_vm11, %v2800_v4  ;;  %v4342_v28 = vpack.i.bf16 %v1575_v27, %v1573_v26  ;;  %v1536_v23 = vsel %vm5139_vm12, %v3167_v22, %v3172_v16  ;;  %v1535_v18 = vsel %vm5140_vm13, %v3166_v24, %v3171_v21  ;;  %v1539_v0 = vsel %vm5141_vm15, %v3171_v21, %v3166_v24  ;;  %vm5146_vm12 = vmmov %vm5145_vm1 }
 0x4e3   : > { %3204 = vrot.lane.b32.xlu1 %v4334_v60, %s5104_s20  ;;  %v3180_v29 = vpop.permute.xlu1 %3179  ;;  %v3175_v40 = vpop.permute.xlu0 %3174  ;;  %1768 = vmatprep.subr.bf16.mxu1 %v4250_v57  ;;  %v2803_v5 = vpack.c.bf16 %v1536_v23, %v1535_v18  ;;  %v1540_v33 = vsel %vm5142_vm3, %v3172_v16, %v3167_v22  ;;  %v1548_v4 = vsel %vm3736_vm4, %v1536_v23, 0.0  ;;  %vm5147_vm13 = vmmov %vm5145_vm1  ;;  %v1545_v22 = vsel %vm3747_vm5, %v1539_v0, 0.0 }
 0x4e4   : > { %3194 = vrot.lane.b32.xlu0 %v4342_v28, %s5104_s20  ;;  %v3182_v14 = vunpack.i.h.bf16 %v3180_v29  ;;  %v3181_v19 = vunpack.i.l.bf16 %v3180_v29  ;;  %v3177_v1 = vunpack.i.h.bf16 %v3175_v40  ;;  %v3176_v15 = vunpack.i.l.bf16 %v3175_v40  ;;  %vm5148_vm15 = vmmov %vm5145_vm1 }
 0x4e5   : > { %v2806_v24 = vpack.c.bf16 %v1540_v33, %v1539_v0  ;;  %v2023_v0 = vld [vmem:[%s5053_s14] sm:$0xff] }
 0x4e6   : > { %1769 = vmatpush1.bf16.msra.mxu1 %v4252_v58  ;;  %v1534_v52 = vsel %vm5143_vm10, %v3177_v1, %v3182_v14  ;;  %v1533_v3 = vsel %vm5144_vm6, %v3176_v15, %v3181_v19  ;;  %v1537_v26 = vsel %vm5142_vm3, %v3181_v19, %v3176_v15  ;;  %vm5149_vm10 = vmmov %vm5142_vm3  ;;  %vm5150_vm6 = vnez %v5101_v53 }
 0x4e7   : > { %3209 = vrot.lane.b32.xlu1 %v4246_v56, %s5104_s20  ;;  %v3190_v57 = vpop.permute.xlu1 %3189  ;;  %v3185_v10 = vpop.permute.xlu0 %3184  ;;  %1770 = vmatprep.subr.bf16.mxu1 %v1750_v46  ;;  %v1546_v46 = vsel %vm3736_vm4, %v1535_v18, 0.0  ;;  %v1538_v27 = vsel %vm5149_vm10, %v3182_v14, %v3177_v1  ;;  %v2809_v29 = vpack.c.bf16 %v1534_v52, %v1533_v3  ;;  %v1542_v18 = vsel %vm3736_vm4, %v1533_v3, 0.0  ;;  %vm5153_vm3 = vmmov %vm5146_vm12 }
 0x4e8   : > { %3199 = vrot.lane.b32.xlu0 %v4248_v54, %s5104_s20  ;;  %v3192_v8 = vunpack.i.h.bf16 %v3190_v57  ;;  %v3191_v47 = vunpack.i.l.bf16 %v3190_v57  ;;  %v3187_v12 = vunpack.i.h.bf16 %v3185_v10  ;;  %v3186_v58 = vunpack.i.l.bf16 %v3185_v10  ;;  %v2789_v10 = vld [vmem:[%s5050_s11 + $0x4] sm:$0xf]  ;;  %vm5154_vm10 = vmmov %vm5153_vm3 }
 0x4e9   : > { %v3228_v40 = vpack.i.bf16 %v1548_v4, %v1546_v46  ;;  %v1541_v14 = vsel %vm3747_vm5, %v1537_v26, 0.0  ;;  %v1543_v19 = vsel %vm3747_vm5, %v1538_v27, 0.0  ;;  %v2812_v1 = vpack.c.bf16 %v1538_v27, %v1537_v26 }
 0x4ea   : > { %v1658_v7 = vsel %vm5145_vm1, %v3192_v8, %v3187_v12  ;;  %v1657_v61 = vsel %vm5146_vm12, %v3191_v47, %v3186_v58  ;;  %1771 = vmatpush1.bf16.msra.mxu1 %v4302_v50  ;;  %v1645_v62 = vsel %vm5147_vm13, %v3186_v58, %v3191_v47  ;;  %v1646_v9 = vsel %vm5148_vm15, %v3187_v12, %v3192_v8  ;;  %v2024_v8 = vld [vmem:[%s5053_s14 + $0x8] sm:$0xff]  ;;  %vm5151_vm13 = vmmov %vm5146_vm12 }
 0x4eb   : > { %v2771_v16 = vpack.c.bf16 %v1658_v7, %v1657_v61  ;;  %3219 = vrot.lane.b32.xlu1 %v4298_v63, %s5104_s20  ;;  %2804 = vmatprep.subr.msk.bf16.mxu1 %vm3875_vm14, %v2803_v5  ;;  %v1695_v21 = vpack.c.bf16 %v1646_v9, %v1645_v62  ;;  %v1547_v50 = vsel %vm3747_vm5, %v1540_v33, 0.0  ;;  %v1544_v5 = vsel %vm3736_vm4, %v1534_v52, 0.0  ;;  %v1984_v33 = vld [vmem:[%s5052_s13 + $0x8] sm:$0xff]  ;;  %vm5152_vm15 = vmmov %vm5146_vm12 }
 0x4ec   : > { %3214 = vrot.lane.b32.xlu0 %v4300_v45, %s5104_s20  ;;  %v3223_v23 = vpack.i.bf16 %v1547_v50, %v1545_v22  ;;  %v3243_v15 = vpack.i.bf16 %v1544_v5, %v1542_v18  ;;  %v3233_v57 = vpack.i.bf16 %v1543_v19, %v1541_v14  ;;  %vm1696_vm1 = vcmask 785408  }
 0x4ed   : > { %1704 = vmatprep.subr.bf16.mxu0 %v1695_v21 }
 0x4ee   : > { %2772 = vmatpush1.bf16.msk.msra.mxu0 %vm3814_vm8, %v2771_v16  ;;  %2807 = vmatpush1.bf16.msk.msra.mxu1 %vm5150_vm6, %v2806_v24 }
 0x4ef   : > { %3229 = vrot.lane.b32.xlu1 %v3228_v40, %s5104_s20  ;;  %2810 = vmatprep.subr.msk.bf16.mxu1 %vm3875_vm14, %v2809_v29 }
 0x4f0   : > { %3224 = vrot.lane.b32.xlu0 %v3223_v23, %s5104_s20 }
 0x4f2   : > { %2813 = vmatpush1.bf16.msk.msra.mxu1 %vm5150_vm6, %v2812_v1 }
 0x4f3   : > { %3244 = vrot.lane.b32.xlu1 %v3243_v15, %s5104_s20 }
 0x4f4   : > { %3234 = vrot.lane.b32.xlu0 %v3233_v57, %s5104_s20 }
 0x4f5   : > { %2814 = vmatmul.mubr.msk.bf16.vlgmr.msra.gmra.mxu1 %vm1696_vm1, %v2789_v10 }
 0x4f6   : > { %2338 = vmatprep.mubr.bf16.mxu1 %v3511_v2 }
 0x4f7   : > { %3249 = vrot.lane.b32.xlu1 %v4270_v49, %s5110_s23  ;;  %v1985_v49 = vld [vmem:[%s5052_s13 + $0x10] sm:$0xff] }
 0x4f8   : > { %3239 = vrot.lane.b32.xlu0 %v4278_v51, %s5110_s23  ;;  %v2027_v51 = vld [vmem:[%s5053_s14 + $0x20] sm:$0xff] }
 0x4fb   : > { %3264 = vrot.lane.b32.xlu1 %v4334_v60, %s5110_s23  ;;  %v1983_v60 = vld [vmem:[%s5052_s13] sm:$0xff] }
 0x4fc   : > { %3254 = vrot.lane.b32.xlu0 %v4342_v28, %s5110_s23  ;;  %v2026_v28 = vld [vmem:[%s5053_s14 + $0x18] sm:$0xff] }
 0x4ff   : > { %3269 = vrot.lane.b32.xlu1 %v4246_v56, %s5110_s23  ;;  %v1987_v56 = vld [vmem:[%s5052_s13 + $0x20] sm:$0xff] }
 0x500   : > { %3259 = vrot.lane.b32.xlu0 %v4248_v54, %s5110_s23  ;;  %v1581_v54 = vld [vmem:[%s5051_s12] sm:$0xff] }
 0x503   : > { %3279 = vrot.lane.b32.xlu1 %v4298_v63, %s5110_s23  ;;  %v2025_v63 = vld [vmem:[%s5053_s14 + $0x10] sm:$0xff] }
 0x504   : > { %3274 = vrot.lane.b32.xlu0 %v4300_v45, %s5110_s23  ;;  %v1986_v45 = vld [vmem:[%s5052_s13 + $0x18] sm:$0xff] }
 0x507   : > { %3289 = vrot.lane.b32.xlu1 %v3228_v40, %s5110_s23 }
 0x508   : > { %3284 = vrot.lane.b32.xlu0 %v3223_v23, %s5110_s23 }
 0x50b   : > { %3299 = vrot.lane.b32.xlu1 %v3243_v15, %s5110_s23 }
 0x50c   : > { %3294 = vrot.lane.b32.xlu0 %v3233_v57, %s5110_s23 }
 0x50f   : > { %2010 = vperm.xlu1 %2942, %v1987_v56  }
 0x510   : > { %1584 = vperm.xlu0 %2941, %v1581_v54  }
 0x513   : > { %2000 = vperm.xlu1 %2942, %v1985_v49  }
 0x514   : > { %2050 = vperm.xlu0 %2941, %v2027_v51  }
 0x517   : > { %2040 = vperm.xlu1 %2942, %v2025_v63  }
 0x518   : > { %2005 = vperm.xlu0 %2941, %v1986_v45  }
 0x51b   : > { %1990 = vperm.xlu1 %2942, %v1983_v60  }
 0x51c   : > { %2045 = vperm.xlu0 %2941, %v2026_v28  }
 0x51f   : > { %2030 = vperm.xlu1 %2942, %v2023_v0  }
 0x520   : > { %1995 = vperm.xlu0 %2941, %v1984_v33  }
 0x524   : > { %2035 = vperm.xlu0 %2941, %v2024_v8  }
 0x555   : > { %v3205_v47 = vpop.permute.xlu1 %3204 }
 0x556   : > { %v3207_v12 = vunpack.i.h.bf16 %v3205_v47  ;;  %v3206_v58 = vunpack.i.l.bf16 %v3205_v47  ;;  %v3195_v52 = vpop.permute.xlu0 %3194 }
 0x557   : > { %v3197_v3 = vunpack.i.h.bf16 %v3195_v52  ;;  %v3196_v46 = vunpack.i.l.bf16 %v3195_v52 }
 0x559   : > { %v1656_v4 = vsel %vm5146_vm12, %v3207_v12, %v3197_v3  ;;  %v1655_v7 = vsel %vm5151_vm13, %v3206_v58, %v3196_v46  ;;  %v3210_v61 = vpop.permute.xlu1 %3209  ;;  %v1643_v62 = vsel %vm5152_vm15, %v3196_v46, %v3206_v58  ;;  %v1644_v9 = vsel %vm5153_vm3, %v3197_v3, %v3207_v12  ;;  %vm5155_vm12 = vmmov %vm5153_vm3 }
 0x55a   : > { %v2774_v16 = vpack.c.bf16 %v1656_v4, %v1655_v7  ;;  %v3212_v21 = vunpack.i.h.bf16 %v3210_v61  ;;  %v3211_v22 = vunpack.i.l.bf16 %v3210_v61  ;;  %v3200_v50 = vpop.permute.xlu0 %3199  ;;  %v1693_v24 = vpack.c.bf16 %v1644_v9, %v1643_v62  ;;  %vm5156_vm13 = vmmov %vm5153_vm3 }
 0x55b   : > { %v3202_v26 = vunpack.i.h.bf16 %v3200_v50  ;;  %v3201_v27 = vunpack.i.l.bf16 %v3200_v50  ;;  %vm5157_vm15 = vmmov %vm5153_vm3 }
 0x55c   : > { %1706 = vmatprep.subr.bf16.mxu0 %v1693_v24 }
 0x55d   : > { %v1654_v29 = vsel %vm5154_vm10, %v3212_v21, %v3202_v26  ;;  %v1653_v40 = vsel %vm5155_vm12, %v3211_v22, %v3201_v27  ;;  %2775 = vmatpush1.bf16.msk.msra.mxu0 %vm3814_vm8, %v2774_v16  ;;  %v3220_v23 = vpop.permute.xlu1 %3219  ;;  %v1641_v18 = vsel %vm5156_vm13, %v3201_v27, %v3211_v22  ;;  %v1642_v5 = vsel %vm5157_vm15, %v3202_v26, %v3212_v21  ;;  %vm5158_vm10 = vmmov %vm5153_vm3 }
 0x55e   : > { %v2777_v14 = vpack.c.bf16 %v1654_v29, %v1653_v40  ;;  %v3222_v19 = vunpack.i.h.bf16 %v3220_v23  ;;  %v3221_v1 = vunpack.i.l.bf16 %v3220_v23  ;;  %v3215_v15 = vpop.permute.xlu0 %3214  ;;  %v1691_v57 = vpack.c.bf16 %v1642_v5, %v1641_v18  ;;  %vm5159_vm12 = vmmov %vm5153_vm3 }
 0x55f   : > { %v3217_v10 = vunpack.i.h.bf16 %v3215_v15  ;;  %v3216_v56 = vunpack.i.l.bf16 %v3215_v15  ;;  %vm5160_vm13 = vmmov %vm5153_vm3 }
 0x560   : > { %1708 = vmatprep.subr.bf16.mxu0 %v1691_v57  ;;  %vm5161_vm15 = vmmov %vm5153_vm3 }
 0x561   : > { %v1652_v54 = vsel %vm5153_vm3, %v3222_v19, %v3217_v10  ;;  %v1651_v49 = vsel %vm5158_vm10, %v3221_v1, %v3216_v56  ;;  %2778 = vmatpush1.bf16.msk.msra.mxu0 %vm3814_vm8, %v2777_v14  ;;  %v3230_v51 = vpop.permute.xlu1 %3229  ;;  %v1639_v63 = vsel %vm5159_vm12, %v3216_v56, %v3221_v1  ;;  %v1640_v45 = vsel %vm5160_vm13, %v3217_v10, %v3222_v19  ;;  %vm5162_vm10 = vmmov %vm5153_vm3 }
 0x562   : > { %v2780_v60 = vpack.c.bf16 %v1652_v54, %v1651_v49  ;;  %v3232_v28 = vunpack.i.h.bf16 %v3230_v51  ;;  %v3231_v0 = vunpack.i.l.bf16 %v3230_v51  ;;  %v3225_v33 = vpop.permute.xlu0 %3224  ;;  %v1689_v8 = vpack.c.bf16 %v1640_v45, %v1639_v63  ;;  %vm5163_vm12 = vmmov %vm5153_vm3  ;;  %v1683_v49 = vld [vmem:[%s5050_s11] sm:$0xf] }
 0x563   : > { %v3227_v47 = vunpack.i.h.bf16 %v3225_v33  ;;  %v3226_v12 = vunpack.i.l.bf16 %v3225_v33  ;;  %vm5164_vm13 = vmmov %vm5153_vm3 }
 0x564   : > { %1710 = vmatprep.subr.bf16.mxu0 %v1689_v8 }
 0x565   : > { %v1650_v58 = vsel %vm5161_vm15, %v3232_v28, %v3227_v47  ;;  %v1649_v52 = vsel %vm5153_vm3, %v3231_v0, %v3226_v12  ;;  %2781 = vmatpush1.bf16.msk.msra.mxu0 %vm3814_vm8, %v2780_v60  ;;  %v3245_v3 = vpop.permute.xlu1 %3244  ;;  %v1637_v46 = vsel %vm5162_vm10, %v3226_v12, %v3231_v0  ;;  %v1638_v4 = vsel %vm5163_vm12, %v3227_v47, %v3232_v28  ;;  %vm5165_vm15 = vmmov %vm5153_vm3 }
 0x566   : > { %v2783_v7 = vpack.c.bf16 %v1650_v58, %v1649_v52  ;;  %v3247_v61 = vunpack.i.h.bf16 %v3245_v3  ;;  %v3246_v62 = vunpack.i.l.bf16 %v3245_v3  ;;  %v3235_v9 = vpop.permute.xlu0 %3234  ;;  %v1687_v16 = vpack.c.bf16 %v1638_v4, %v1637_v46  ;;  %vm5166_vm10 = vmmov %vm5153_vm3 }
 0x567   : > { %v3237_v21 = vunpack.i.h.bf16 %v3235_v9  ;;  %v3236_v22 = vunpack.i.l.bf16 %v3235_v9  ;;  %vm5167_vm12 = vcmp.lt.s32.totalorder %v3675_v36, 112 }
 0x568   : > { %1712 = vmatprep.subr.bf16.mxu0 %v1687_v16 }
 0x569   : > { %v1648_v50 = vsel %vm5164_vm13, %v3247_v61, %v3237_v21  ;;  %v1647_v24 = vsel %vm5165_vm15, %v3246_v62, %v3236_v22  ;;  %2784 = vmatpush1.bf16.msk.msra.mxu0 %vm3814_vm8, %v2783_v7  ;;  %v3250_v26 = vpop.permute.xlu1 %3249  ;;  %v1635_v27 = vsel %vm5153_vm3, %v3236_v22, %v3246_v62  ;;  %v1636_v29 = vsel %vm5166_vm10, %v3237_v21, %v3247_v61  ;;  %vm5168_vm13 = vmmov %vm5167_vm12 }
 0x56a   : > { %v2786_v40 = vpack.c.bf16 %v1648_v50, %v1647_v24  ;;  %v3252_v23 = vunpack.i.h.bf16 %v3250_v26  ;;  %v3251_v18 = vunpack.i.l.bf16 %v3250_v26  ;;  %v3240_v5 = vpop.permute.xlu0 %3239  ;;  %v1685_v14 = vpack.c.bf16 %v1636_v29, %v1635_v27  ;;  %vm5169_vm15 = vmmov %vm5167_vm12 }
 0x56b   : > { %v3242_v19 = vunpack.i.h.bf16 %v3240_v5  ;;  %v3241_v1 = vunpack.i.l.bf16 %v3240_v5  ;;  %vm5170_vm3 = vmmov %vm5167_vm12 }
 0x56c   : > { %1714 = vmatprep.subr.bf16.mxu0 %v1685_v14  ;;  %vm5171_vm10 = vmmov %vm5170_vm3 }
 0x56d   : > { %v1862_v15 = vsel %vm5167_vm12, %v3242_v19, %v3252_v23  ;;  %v1874_v57 = vsel %vm5168_vm13, %v3252_v23, %v3242_v19  ;;  %v1861_v10 = vsel %vm5169_vm15, %v3241_v1, %v3251_v18  ;;  %v1873_v56 = vsel %vm5170_vm3, %v3251_v18, %v3241_v1  ;;  %2787 = vmatpush1.bf16.msk.msra.mxu0 %vm3814_vm8, %v2786_v40  ;;  %v3265_v54 = vpop.permute.xlu1 %3264  ;;  %vm5172_vm12 = vmmov %vm5170_vm3 }
 0x56e   : > { %v1911_v51 = vpack.c.bf16 %v1862_v15, %v1861_v10  ;;  %v2817_v63 = vpack.c.bf16 %v1874_v57, %v1873_v56  ;;  %v3267_v45 = vunpack.i.h.bf16 %v3265_v54  ;;  %v3266_v60 = vunpack.i.l.bf16 %v3265_v54  ;;  %v3255_v28 = vpop.permute.xlu0 %3254  ;;  %vm5173_vm13 = vmmov %vm5170_vm3 }
 0x56f   : > { %v3257_v0 = vunpack.i.h.bf16 %v3255_v28  ;;  %v3256_v33 = vunpack.i.l.bf16 %v3255_v28  ;;  %vm5174_vm15 = vmmov %vm5170_vm3 }
 0x570   : > { %2788 = vmatmul.mubr.msk.bf16.vlgmr.msra.gmra.mxu0 %vm1696_vm1, %v1683_v49  ;;  %2818 = vmatprep.subr.msk.bf16.mxu0 %vm3899_vm7, %v2817_v63 }
 0x571   : > { %v1860_v8 = vsel %vm5171_vm10, %v3257_v0, %v3267_v45  ;;  %v1872_v47 = vsel %vm5172_vm12, %v3267_v45, %v3257_v0  ;;  %v1859_v12 = vsel %vm5173_vm13, %v3256_v33, %v3266_v60  ;;  %v1871_v58 = vsel %vm5174_vm15, %v3266_v60, %v3256_v33  ;;  %1921 = vmatpush1.bf16.msra.mxu0 %v1911_v51  ;;  %v3270_v52 = vpop.permute.xlu1 %3269  ;;  %vm5175_vm10 = vmmov %vm5170_vm3 }
 0x572   : > { %v1909_v3 = vpack.c.bf16 %v1860_v8, %v1859_v12  ;;  %v2820_v46 = vpack.c.bf16 %v1872_v47, %v1871_v58  ;;  %v3272_v4 = vunpack.i.h.bf16 %v3270_v52  ;;  %v3271_v7 = vunpack.i.l.bf16 %v3270_v52  ;;  %v3260_v61 = vpop.permute.xlu0 %3259  ;;  %1948 = vmatprep.mubr.bf16.mxu0 %v3511_v2  ;;  %vm5176_vm12 = vmmov %vm5170_vm3 }
 0x573   : > { %v3262_v62 = vunpack.i.h.bf16 %v3260_v61  ;;  %v3261_v9 = vunpack.i.l.bf16 %v3260_v61  ;;  %vm5177_vm13 = vmmov %vm5170_vm3 }
 0x574   : > { %2821 = vmatprep.subr.msk.bf16.mxu0 %vm3899_vm7, %v2820_v46  ;;  %vm5178_vm15 = vmmov %vm5170_vm3 }
 0x575   : > { %v1858_v16 = vsel %vm5170_vm3, %v3262_v62, %v3272_v4  ;;  %v1870_v21 = vsel %vm5175_vm10, %v3272_v4, %v3262_v62  ;;  %v1857_v22 = vsel %vm5176_vm12, %v3261_v9, %v3271_v7  ;;  %v1869_v50 = vsel %vm5177_vm13, %v3271_v7, %v3261_v9  ;;  %1923 = vmatpush1.bf16.msra.mxu0 %v1909_v3  ;;  %v3280_v24 = vpop.permute.xlu1 %3279  ;;  %vm5179_vm10 = vmmov %vm5170_vm3 }
 0x576   : > { %v1907_v26 = vpack.c.bf16 %v1858_v16, %v1857_v22  ;;  %v2823_v27 = vpack.c.bf16 %v1870_v21, %v1869_v50  ;;  %v3282_v29 = vunpack.i.h.bf16 %v3280_v24  ;;  %v3281_v40 = vunpack.i.l.bf16 %v3280_v24  ;;  %v3275_v23 = vpop.permute.xlu0 %3274  ;;  %vm5180_vm12 = vmmov %vm5170_vm3  ;;  %v2815_v22 = vld [vmem:[%s5050_s11 + $0x8] sm:$0xf] }
 0x577   : > { %v3277_v18 = vunpack.i.h.bf16 %v3275_v23  ;;  %v3276_v5 = vunpack.i.l.bf16 %v3275_v23  ;;  %vm5181_vm13 = vmmov %vm5170_vm3 }
 0x578   : > { %2824 = vmatprep.subr.msk.bf16.mxu0 %vm3899_vm7, %v2823_v27 }
 0x579   : > { %v1856_v14 = vsel %vm5178_vm15, %v3277_v18, %v3282_v29  ;;  %v1868_v19 = vsel %vm5170_vm3, %v3282_v29, %v3277_v18  ;;  %v1855_v1 = vsel %vm5179_vm10, %v3276_v5, %v3281_v40  ;;  %v1867_v15 = vsel %vm5180_vm12, %v3281_v40, %v3276_v5  ;;  %1925 = vmatpush1.bf16.msra.mxu0 %v1907_v26  ;;  %v3290_v57 = vpop.permute.xlu1 %3289  ;;  %vm5182_vm15 = vmmov %vm5170_vm3  ;;  %v1970_v40 = vld [vmem:[%s3639_s30 + $0x18] sm:$0xff] }
 0x57a   : > { %v1905_v10 = vpack.c.bf16 %v1856_v14, %v1855_v1  ;;  %v2826_v56 = vpack.c.bf16 %v1868_v19, %v1867_v15  ;;  %v3292_v54 = vunpack.i.h.bf16 %v3290_v57  ;;  %v3291_v49 = vunpack.i.l.bf16 %v3290_v57  ;;  %v3285_v51 = vpop.permute.xlu0 %3284  ;;  %vm5183_vm10 = vmmov %vm5170_vm3 }
 0x57b   : > { %v3287_v63 = vunpack.i.h.bf16 %v3285_v51  ;;  %v3286_v45 = vunpack.i.l.bf16 %v3285_v51  ;;  %vm5184_vm12 = vmmov %vm5170_vm3  ;;  %v1977_v14 = vunpack.c.l.bf16 %v1970_v40  ;;  %v1978_v19 = vunpack.c.h.bf16 %v1970_v40 }
 0x57c   : > { %2827 = vmatprep.subr.msk.bf16.mxu0 %vm3899_vm7, %v2826_v56 }
 0x57d   : > { %v1854_v60 = vsel %vm5181_vm13, %v3287_v63, %v3292_v54  ;;  %v1866_v28 = vsel %vm5182_vm15, %v3292_v54, %v3287_v63  ;;  %v1853_v0 = vsel %vm5170_vm3, %v3286_v45, %v3291_v49  ;;  %v1865_v33 = vsel %vm5183_vm10, %v3291_v49, %v3286_v45  ;;  %1927 = vmatpush1.bf16.msra.mxu0 %v1905_v10  ;;  %v3300_v8 = vpop.permute.xlu1 %3299  ;;  %vm5185_vm13 = vmmov %vm5170_vm3 }
 0x57e   : > { %v1903_v47 = vpack.c.bf16 %v1854_v60, %v1853_v0  ;;  %v2829_v12 = vpack.c.bf16 %v1866_v28, %v1865_v33  ;;  %v3302_v58 = vunpack.i.h.bf16 %v3300_v8  ;;  %v3301_v52 = vunpack.i.l.bf16 %v3300_v8  ;;  %v3295_v3 = vpop.permute.xlu0 %3294  ;;  %vm5186_vm15 = vmmov %vm5170_vm3 }
 0x57f   : > { %v3297_v46 = vunpack.i.h.bf16 %v3295_v3  ;;  %v3296_v4 = vunpack.i.l.bf16 %v3295_v3 }
 0x580   : > { %2830 = vmatprep.subr.msk.bf16.mxu0 %vm3899_vm7, %v2829_v12 }
 0x581   : > { %v1852_v7 = vsel %vm5184_vm12, %v3297_v46, %v3302_v58  ;;  %v1864_v61 = vsel %vm5185_vm13, %v3302_v58, %v3297_v46  ;;  %v1851_v62 = vsel %vm5186_vm15, %v3296_v4, %v3301_v52  ;;  %v1863_v9 = vsel %vm5170_vm3, %v3301_v52, %v3296_v4  ;;  %1929 = vmatpush1.bf16.msra.mxu0 %v1903_v47 }
 0x582   : > { %v1901_v16 = vpack.c.bf16 %v1852_v7, %v1851_v62  ;;  %v2832_v21 = vpack.c.bf16 %v1864_v61, %v1863_v9  ;;  %vm5189_vm12 = vcmask 1043456  }
 0x583   : > { %vm5190_vm13 = vmmov %vm5189_vm12 }
 0x584   : > { %2833 = vmatprep.subr.msk.bf16.mxu0 %vm3899_vm7, %v2832_v21 }
 0x585   : > { %1931 = vmatpush1.bf16.msra.mxu0 %v1901_v16 }
 0x588   : > { %2834 = vmatmul.mubr.msk.bf16.vlgmr.msra.gmra.mxu0 %vm1696_vm1, %v2815_v22  ;;  %vm5187_vm1 = vcmp.lt.s32.totalorder %v3675_v36, 127 }
 0x589   : > { %2408 = vmatprep.mubr.bf16.mxu0 %v3511_v2  ;;  %vm5188_vm10 = vmmov %vm5187_vm1 }
 0x58a   : > { %v2011_v50 = vpop.permute.xlu1 %2010  ;;  %vm5191_vm15 = vmmov %vm5187_vm1 }
 0x58b   : > { %v4591_v24 = vpop.permute.xlu0 %1584  ;;  %v2021_v26 = vmul.f32 %v2011_v50, %v1443_v31  ;;  %v2022_v27 = vmul.f32 %v2011_v50, %v1444_v11  ;;  %vm5192_vm3 = vmmov %vm5187_vm1 }
 0x58e   : > { %v2001_v29 = vpop.permute.xlu1 %2000 }
 0x58f   : > { %v2051_v23 = vpop.permute.xlu0 %2050  ;;  %v2017_v56 = vmul.f32 %v2001_v29, %v1977_v14  ;;  %v2018_v54 = vmul.f32 %v2001_v29, %v1978_v19 }
 0x590   : > { %v2061_v18 = vadd.f32 %v2051_v23, %v2021_v26  ;;  %v2062_v5 = vadd.f32 %v2051_v23, %v2022_v27 }
 0x592   : > { %v4598_v1 = vmax.f32 %v2061_v18, 0.0  ;;  %v4600_v15 = vmax.f32 %v2062_v5, 0.0  ;;  %v2041_v57 = vpop.permute.xlu1 %2040 }
 0x593   : > { %v2006_v10 = vpop.permute.xlu0 %2005  ;;  %v2057_v17 = vadd.f32 %v2041_v57, %v2017_v56  ;;  %v2058_v11 = vadd.f32 %v2041_v57, %v2018_v54 }
 0x594   : > { %v4604_v31 = vpack.i.bf16 %v4600_v15, %v4598_v1  ;;  %v2019_v49 = vmul.f32 %v2006_v10, %v1441_v41  ;;  %v2020_v51 = vmul.f32 %v2006_v10, %v1442_v44 }
 0x595   : > { %v4612_v28 = vmax.f32 %v2057_v17, 0.0  ;;  %v4614_v0 = vmax.f32 %v2058_v11, 0.0 }
 0x596   : > { %3304 = vrot.lane.b32.xlu1 %v4604_v31, %s5130_s26  ;;  %v1991_v7 = vpop.permute.xlu1 %1990 }
 0x597   : > { %v2046_v63 = vpop.permute.xlu0 %2045 }
 0x598   : > { %v2059_v45 = vadd.f32 %v2046_v63, %v2019_v49  ;;  %v2060_v60 = vadd.f32 %v2046_v63, %v2020_v51 }
 0x59a   : > { %v4616_v33 = vmax.f32 %v2059_v45, 0.0  ;;  %v4618_v8 = vmax.f32 %v2060_v60, 0.0  ;;  %v2031_v61 = vpop.permute.xlu1 %2030 }
 0x59b   : > { %v1996_v62 = vpop.permute.xlu0 %1995 }
 0x59c   : > { %v4622_v41 = vpack.i.bf16 %v4618_v8, %v4614_v0  ;;  %v4626_v30 = vpack.i.bf16 %v4616_v33, %v4612_v28  ;;  %v2360_v44 = vpack.c.bf16 %v4600_v15, %v4618_v8  ;;  %v4632_v47 = vpack.i.bf16 %v4600_v15, %v4618_v8 }
 0x59d   : > { %v2359_v12 = vpack.c.bf16 %v4598_v1, %v4616_v33  ;;  %v4642_v58 = vpack.i.bf16 %v4598_v1, %v4616_v33 }
 0x59e   : > { %3314 = vrot.lane.b32.xlu1 %v4622_v41, %s5130_s26  ;;  %3309 = vrot.lane.b32.xlu0 %v4626_v30, %s5130_s26 }
 0x59f   : > { %v2036_v26 = vpop.permute.xlu0 %2035 }
 0x5b5   : > { %v1794_v52 = vpop.f32.mrf.mxu1 }
 0x5b7   : > { %v1796_v3 = vpop.f32.mrf.mxu1 }
 0x5b9   : > { %v1798_v46 = vpop.f32.mrf.mxu1 }
 0x5bb   : > { %v1799_v4 = vpop.f32.mrf.mxu1 }
 0x608   : > { %v3305_v9 = vpop.permute.xlu1 %3304 }
 0x609   : > { %v3307_v16 = vunpack.i.h.bf16 %v3305_v9  ;;  %v3306_v21 = vunpack.i.l.bf16 %v3305_v9 }
 0x60b   : > { %v2137_v22 = vsel %vm5187_vm1, %v3306_v21, %v3307_v16  ;;  %v2142_v50 = vsel %vm5188_vm10, %v3307_v16, %v3306_v21  ;;  %vm5193_vm10 = vmmov %vm5187_vm1 }
 0x60c   : > { %v2151_v27 = vsel %vm3687_vm2, %v2137_v22, 0.0  ;;  %v2152_v29 = vsel %vm3682_vm0, %v2142_v50, 0.0 }
 0x60d   : > { %v2366_v40 = vpack.c.bf16 %v2152_v29, %v2152_v29  ;;  %v2365_v23 = vpack.c.bf16 %v2151_v27, %v2151_v27  ;;  %v4652_v18 = vpack.i.bf16 %v2152_v29, %v2151_v27 }
 0x60f   : > { %2860 = vmatprep.subr.msk.bf16.mxu0 %vm5189_vm12, %v2366_v40  ;;  %v2371_v5 = vsel %vm5190_vm13, %v2365_v23, 0  ;;  %vm5194_vm12 = vmmov %vm5187_vm1 }
 0x610   : > { %v3315_v14 = vpop.permute.xlu1 %3314  ;;  %v3310_v19 = vpop.permute.xlu0 %3309  ;;  %2377 = vmatpush1.bf16.msra.mxu0 %v2371_v5  ;;  %vm5195_vm13 = vmmov %vm5187_vm1 }
 0x611   : > { %v3317_v57 = vunpack.i.h.bf16 %v3315_v14  ;;  %v3316_v10 = vunpack.i.l.bf16 %v3315_v14  ;;  %v3312_v56 = vunpack.i.h.bf16 %v3310_v19  ;;  %v3311_v54 = vunpack.i.l.bf16 %v3310_v19 }
 0x613   : > { %v2136_v17 = vsel %vm5191_vm15, %v3312_v56, %v3317_v57  ;;  %v2141_v11 = vsel %vm5192_vm3, %v3317_v57, %v3312_v56  ;;  %v2135_v49 = vsel %vm5187_vm1, %v3311_v54, %v3316_v10  ;;  %v2140_v51 = vsel %vm5193_vm10, %v3316_v10, %v3311_v54  ;;  %vm5196_vm15 = vmmov %vm5187_vm1 }
 0x614   : > { %v2149_v63 = vsel %vm3687_vm2, %v2136_v17, 0.0  ;;  %v2150_v45 = vsel %vm3682_vm0, %v2141_v11, 0.0  ;;  %v2147_v60 = vsel %vm3687_vm2, %v2135_v49, 0.0  ;;  %v2148_v46 = vsel %vm3682_vm0, %v2140_v51, 0.0  ;;  %vm5197_vm3 = vmmov %vm5187_vm1 }
 0x615   : > { %v2862_v4 = vpack.c.bf16 %v2141_v11, %v2140_v51  ;;  %v2865_v9 = vpack.c.bf16 %v2136_v17, %v2135_v49  ;;  %v4672_v16 = vpack.i.bf16 %v2150_v45, %v2148_v46  ;;  %v4674_v21 = vpack.i.bf16 %v2149_v63, %v2147_v60 }
 0x616   : > { %v2015_v49 = vmul.f32 %v1996_v62, %v1437_v59  ;;  %v2016_v51 = vmul.f32 %v1996_v62, %v1438_v39 }
 0x617   : > { %2863 = vmatprep.subr.msk.bf16.mxu0 %vm3841_vm9, %v2862_v4 }
 0x618   : > { %2866 = vmatpush1.bf16.msk.msra.mxu0 %vm3858_vm11, %v2865_v9  ;;  %v2055_v60 = vadd.f32 %v2036_v26, %v2015_v49 }
 0x61a   : > { %v4687_v9 = vmax.f32 %v2055_v60, 0.0 }
 0x61c   : > { %v2357_v8 = vpack.c.bf16 %v4612_v28, %v4687_v9 }
 0x630   : > { %v1734_v22 = vpop.f32.mrf.mxu0 }
 0x631   : > { %v1741_v40 = vadd.f32 %v1734_v22, %v4591_v24 }
 0x632   : > { %v1736_v50 = vpop.f32.mrf.mxu0 }
 0x633   : > { %v1742_v23 = vadd.f32 %v1736_v50, %v4591_v24  ;;  %v1801_v14 = vadd.f32 %v1794_v52, %v1741_v40  ;;  %v2056_v24 = vadd.f32 %v2036_v26, %v2016_v51 }
 0x634   : > { %v1738_v27 = vpop.f32.mrf.mxu0 }
 0x635   : > { %v1802_v19 = vadd.f32 %v1796_v3, %v1742_v23  ;;  %v4689_v22 = vmax.f32 %v2056_v24, 0.0 }
 0x636   : > { %v1739_v29 = vpop.f32.mrf.mxu0 }
 0x637   : > { %v2358_v38 = vpack.c.bf16 %v4614_v0, %v4689_v22  ;;  %v4758_v15 = vpack.i.bf16 %v4614_v0, %v4689_v22 }
 0x648   : > { %v1950_v5 = vpop.f32.mrf.mxu0 }
 0x649   : > { %v1957_v10 = vadd.f32 %v1950_v5, %v1801_v14 }
 0x64a   : > { %v1952_v57 = vpop.f32.mrf.mxu0 }
 0x64b   : > { %v1958_v56 = vadd.f32 %v1952_v57, %v1802_v19 }
 0x64c   : > { %v1954_v54 = vpop.f32.mrf.mxu0 }
 0x64d   : > { %v2924_v17 = vpack.c.bf16 %v1958_v56, %v1957_v10 }
 0x64e   : > { %v1955_v11 = vpop.f32.mrf.mxu0 }
 0x64f   : > { %1967 = vst [vmem:[%s3639_s30 + $0x8] sm:$0xff] %v2924_v17  ;;  %v1974_v63 = vunpack.c.h.bf16 %v2924_v17  ;;  %v1973_v45 = vunpack.c.l.bf16 %v2924_v17 }
 0x651   : > { %v2014_v46 = vmul.f32 %v1991_v7, %v1974_v63  ;;  %v2013_v52 = vmul.f32 %v1991_v7, %v1973_v45 }
 0x653   : > { %v2054_v3 = vadd.f32 %v2031_v61, %v2014_v46  ;;  %v2053_v4 = vadd.f32 %v2031_v61, %v2013_v52 }
 0x655   : > { %v4691_v50 = vmax.f32 %v2054_v3, 0.0  ;;  %v4693_v27 = vmax.f32 %v2053_v4, 0.0 }
 0x657   : > { %v3323_v20 = vpack.i.bf16 %v4689_v22, %v4691_v50  ;;  %v3318_v39 = vpack.i.bf16 %v4687_v9, %v4693_v27 }
 0x659   : > { %3324 = vrot.lane.b32.xlu1 %v3323_v20, %s5130_s26  ;;  %3319 = vrot.lane.b32.xlu0 %v3318_v39, %s5130_s26 }
 0x65d   : > { %3334 = vrot.lane.b32.xlu1 %v4626_v30, %s5135_s27  ;;  %3329 = vrot.lane.b32.xlu0 %v4604_v31, %s5135_s27 }
 0x661   : > { %3344 = vrot.lane.b32.xlu1 %v3318_v39, %s5135_s27  ;;  %3339 = vrot.lane.b32.xlu0 %v4622_v41, %s5135_s27 }
 0x665   : > { %3354 = vrot.lane.b32.xlu1 %v4652_v18, %s5104_s20  ;;  %3349 = vrot.lane.b32.xlu0 %v3323_v20, %s5135_s27 }
 0x669   : > { %3364 = vrot.lane.b32.xlu1 %v4672_v16, %s5104_s20  ;;  %3359 = vrot.lane.b32.xlu0 %v4674_v21, %s5104_s20 }
 0x6cb   : > { %v3325_v59 = vpop.permute.xlu1 %3324  ;;  %v3320_v30 = vpop.permute.xlu0 %3319 }
 0x6cc   : > { %v3327_v7 = vunpack.i.h.bf16 %v3325_v59  ;;  %v3326_v31 = vunpack.i.l.bf16 %v3325_v59  ;;  %v3322_v61 = vunpack.i.h.bf16 %v3320_v30  ;;  %v3321_v62 = vunpack.i.l.bf16 %v3320_v30 }
 0x6ce   : > { %v2134_v41 = vsel %vm5194_vm12, %v3322_v61, %v3327_v7  ;;  %v2139_v26 = vsel %vm5195_vm13, %v3327_v7, %v3322_v61  ;;  %v2133_v29 = vsel %vm5196_vm15, %v3321_v62, %v3326_v31  ;;  %v2138_v40 = vsel %vm5197_vm3, %v3326_v31, %v3321_v62 }
 0x6cf   : > { %v2145_v23 = vsel %vm3687_vm2, %v2134_v41, 0.0  ;;  %v2146_v5 = vsel %vm3682_vm0, %v2139_v26, 0.0  ;;  %v2143_v14 = vsel %vm3687_vm2, %v2133_v29, 0.0  ;;  %v2144_v19 = vsel %vm3682_vm0, %v2138_v40, 0.0  ;;  %v3335_v57 = vpop.permute.xlu1 %3334  ;;  %v3330_v10 = vpop.permute.xlu0 %3329 }
 0x6d0   : > { %v2868_v56 = vpack.c.bf16 %v2139_v26, %v2138_v40  ;;  %v2871_v54 = vpack.c.bf16 %v2134_v41, %v2133_v29  ;;  %v3332_v17 = vunpack.i.h.bf16 %v3330_v10  ;;  %v3331_v11 = vunpack.i.l.bf16 %v3330_v10 }
 0x6d1   : > { %v4731_v49 = vpack.i.bf16 %v2146_v5, %v2144_v19  ;;  %v4733_v51 = vpack.i.bf16 %v2145_v23, %v2143_v14  ;;  %vm5198_vm0 = vcmp.lt.s32.totalorder %v3675_v36, 1  ;;  %v3337_v24 = vunpack.i.h.bf16 %v3335_v57 }
 0x6d2   : > { %2869 = vmatprep.subr.msk.bf16.mxu0 %vm3841_vm9, %v2868_v56  ;;  %v2097_v32 = vsel %vm5198_vm0, %v3331_v11, %v3332_v17  ;;  %vm5199_vm2 = vmmov %vm5198_vm0  ;;  %v3336_v3 = vunpack.i.l.bf16 %v3335_v57  ;;  %vm5204_vm12 = vcmp.lt.s32.totalorder %v3675_v36, 16  ;;  %vm5206_vm15 = vnez %v5106_v25 }
 0x6d3   : > { %3379 = vrot.lane.b32.xlu1 %v4731_v49, %s5104_s20  ;;  %2872 = vmatpush1.bf16.msk.msra.mxu0 %vm3858_vm11, %v2871_v54  ;;  %v4741_v42 = vpop.permute.xlu1 %3344  ;;  %v3340_v43 = vpop.permute.xlu0 %3339  ;;  %v2102_v63 = vsel %vm5199_vm2, %v3332_v17, %v3331_v11  ;;  %v2112_v20 = vsel %vm3736_vm4, %v2097_v32, 0.0  ;;  %v2874_v39 = vpack.c.bf16 %v4691_v50, %v2097_v32  ;;  %vm5200_vm9 = vmmov %vm5198_vm0  ;;  %vm5208_vm2 = vcmask 1043456  }
 0x6d4   : > { %3369 = vrot.lane.b32.xlu0 %v4733_v51, %s5104_s20  ;;  %2382 = vmatprep.subr.bf16.mxu0 %v2360_v44  ;;  %v3342_v45 = vunpack.i.h.bf16 %v3340_v43  ;;  %v3341_v60 = vunpack.i.l.bf16 %v3340_v43  ;;  %v4764_v44 = vpack.i.bf16 %v4612_v28, %v4687_v9  ;;  %v2111_v4 = vsel %vm3747_vm5, %v2102_v63, 0.0  ;;  %vm5201_vm11 = vmmov %vm5198_vm0 }
 0x6d5   : > { %vm5202_vm1 = vmmov %vm5198_vm0  ;;  %v3347_v7 = vunpack.i.h.bf16 %v4741_v42  ;;  %v3346_v31 = vunpack.i.l.bf16 %v4741_v42  ;;  %v4794_v40 = vpack.i.bf16 %v4691_v50, %v2112_v20  ;;  %v3398_v23 = vpack.i.bf16 %v4693_v27, %v2111_v4 }
 0x6d6   : > { %v2096_v28 = vsel %vm5200_vm9, %v3337_v24, %v3342_v45  ;;  %v2101_v0 = vsel %vm5201_vm11, %v3342_v45, %v3337_v24  ;;  %v2095_v59 = vsel %vm5202_vm1, %v3336_v3, %v3341_v60  ;;  %vm5203_vm10 = vmmov %vm5198_vm0  ;;  %vm5209_vm9 = vcmp.ge.s32.totalorder %v3675_v36, 16 }
 0x6d7   : > { %3384 = vrot.lane.b32.xlu1 %v4632_v47, %s5104_s20  ;;  %v3355_v46 = vpop.permute.xlu1 %3354  ;;  %v3350_v52 = vpop.permute.xlu0 %3349  ;;  %2383 = vmatpush1.bf16.msra.mxu0 %v2359_v12  ;;  %v2100_v30 = vsel %vm5203_vm10, %v3341_v60, %v3336_v3  ;;  %v2877_v12 = vpack.c.bf16 %v4693_v27, %v2102_v63  ;;  %vm5205_vm13 = vmmov %vm5204_vm12  ;;  %v2109_v5 = vsel %vm3747_vm5, %v2101_v0, 0.0  ;;  %v2110_v14 = vsel %vm3736_vm4, %v2096_v28, 0.0 }
 0x6d8   : > { %3374 = vrot.lane.b32.xlu0 %v4642_v58, %s5104_s20  ;;  %v3357_v9 = vunpack.i.h.bf16 %v3355_v46  ;;  %v3356_v22 = vunpack.i.l.bf16 %v3355_v46  ;;  %2384 = vmatprep.subr.bf16.mxu0 %v2358_v38  ;;  %v3352_v1 = vunpack.i.h.bf16 %v3350_v52  ;;  %v3351_v33 = vunpack.i.l.bf16 %v3350_v52  ;;  %vm5207_vm3 = vmmov %vm5198_vm0 }
 0x6d9   : > { %v2107_v19 = vsel %vm3747_vm5, %v2100_v30, 0.0  ;;  %v2108_v57 = vsel %vm3736_vm4, %v2095_v59, 0.0  ;;  %v2880_v50 = vpack.c.bf16 %v2096_v28, %v2095_v59  ;;  %v2883_v42 = vpack.c.bf16 %v2101_v0, %v2100_v30  ;;  %vm5210_vm11 = vmmov %vm5198_vm0 }
 0x6da   : > { %v2233_v61 = vsel %vm5204_vm12, %v3356_v22, %v3357_v9  ;;  %v2248_v41 = vsel %vm5205_vm13, %v3357_v9, %v3356_v22  ;;  %v2094_v27 = vsel %vm5207_vm3, %v3347_v7, %v3352_v1  ;;  %v2093_v10 = vsel %vm5198_vm0, %v3346_v31, %v3351_v33  ;;  %vm5212_vm10 = vmmov %vm5198_vm0  ;;  %v2859_v22 = vld [vmem:[%s5054_s15 + $0x4] sm:$0xf] }
 0x6db   : > { %3394 = vrot.lane.b32.xlu1 %v4758_v15, %s5104_s20  ;;  %v3365_v62 = vpop.permute.xlu1 %3364  ;;  %v2295_v26 = vpack.c.bf16 %v2233_v61, %v2233_v61  ;;  %2385 = vmatpush1.bf16.msra.mxu0 %v2357_v8  ;;  %v3360_v29 = vpop.permute.xlu0 %3359  ;;  %v2277_v25 = vsel %vm5209_vm9, %v2248_v41, 0.0  ;;  %v2099_v43 = vsel %vm5210_vm11, %v3352_v1, %v3347_v7  ;;  %vm5211_vm1 = vnez %v5108_v35  ;;  %vm5213_vm13 = vmmov %vm5204_vm12 }
 0x6dc   : > { %3389 = vrot.lane.b32.xlu0 %v4764_v44, %s5104_s20  ;;  %2875 = vmatprep.subr.msk.bf16.mxu0 %vm5206_vm15, %v2874_v39  ;;  %v3367_v56 = vunpack.i.h.bf16 %v3365_v62  ;;  %v3366_v54 = vunpack.i.l.bf16 %v3365_v62  ;;  %v3362_v17 = vunpack.i.h.bf16 %v3360_v29  ;;  %v3361_v11 = vunpack.i.l.bf16 %v3360_v29  ;;  %vm5214_vm15 = vmmov %vm5204_vm12 }
 0x6dd   : > { %2836 = vmatprep.subr.msk.bf16.mxu1 %vm5208_vm2, %v2295_v26  ;;  %v2294_v32 = vpack.c.bf16 %v2277_v25, %v2277_v25  ;;  %v3413_v63 = vpack.i.bf16 %v2110_v14, %v2108_v57  ;;  %v2106_v45 = vsel %vm3736_vm4, %v2094_v27, 0.0  ;;  %v2098_v60 = vsel %vm5212_vm10, %v3351_v33, %v3346_v31  ;;  %vm5215_vm3 = vmmov %vm5208_vm2 }
 0x6de   : > { %v2104_v38 = vsel %vm3736_vm4, %v2093_v10, 0.0  ;;  %v2231_v35 = vsel %vm5204_vm12, %v3361_v11, %v3366_v54  ;;  %v2247_v24 = vsel %vm5213_vm13, %v3367_v56, %v3362_v17  ;;  %v2246_v46 = vsel %vm5214_vm15, %v3366_v54, %v3361_v11  ;;  %vm5216_vm0 = vmmov %vm5204_vm12 }
 0x6df   : > { %3404 = vrot.lane.b32.xlu1 %v4794_v40, %s5104_s20  ;;  %2878 = vmatpush1.bf16.msk.msra.mxu0 %vm5211_vm1, %v2877_v12  ;;  %v2301_v52 = vsel %vm5215_vm3, %v2294_v32, 0  ;;  %v2232_v6 = vsel %vm5216_vm0, %v3362_v17, %v3367_v56  ;;  %v3408_v3 = vpack.i.bf16 %v2109_v5, %v2107_v19  ;;  %v2105_v4 = vsel %vm3747_vm5, %v2099_v43, 0.0  ;;  %vm5220_vm2 = vmmov %vm5216_vm0 }
 0x6e0   : > { %3399 = vrot.lane.b32.xlu0 %v3398_v23, %s5104_s20  ;;  %2881 = vmatprep.subr.msk.bf16.mxu0 %vm3875_vm14, %v2880_v50  ;;  %v2293_v8 = vpack.c.bf16 %v2232_v6, %v2231_v35  ;;  %v2103_v20 = vsel %vm3747_vm5, %v2098_v60, 0.0  ;;  %v2886_v39 = vpack.c.bf16 %v2094_v27, %v2093_v10  ;;  %v2838_v28 = vpack.c.bf16 %v2247_v24, %v2246_v46  ;;  %vm5217_vm5 = vmmov %vm5216_vm0 }
 0x6e1   : > { %2307 = vmatpush1.bf16.msra.mxu1 %v2301_v52  ;;  %v3423_v0 = vpack.i.bf16 %v2106_v45, %v2104_v38  ;;  %v2889_v9 = vpack.c.bf16 %v2099_v43, %v2098_v60  ;;  %v3418_v13 = vpack.i.bf16 %v2105_v4, %v2103_v20  ;;  %vm2296_vm4 = vcmask 982016   ;;  %vm5221_vm9 = vmmov %vm5216_vm0 }
 0x6e2   : > { %2308 = vmatprep.subr.bf16.mxu1 %v2293_v8  ;;  %vm5222_vm11 = vmmov %vm5216_vm0 }
 0x6e3   : > { %3414 = vrot.lane.b32.xlu1 %v3413_v63, %s5104_s20  ;;  %2884 = vmatpush1.bf16.msk.msra.mxu0 %vm5150_vm6, %v2883_v42  ;;  %vm5223_vm1 = vmmov %vm5216_vm0 }
 0x6e4   : > { %3409 = vrot.lane.b32.xlu0 %v3408_v3, %s5104_s20  ;;  %2887 = vmatprep.subr.msk.bf16.mxu0 %vm3875_vm14, %v2886_v39  ;;  %vm5218_vm14 = vmmov %vm5216_vm0 }
 0x6e5   : > { %2839 = vmatpush1.bf16.msk.msra.mxu1 %vm3814_vm8, %v2838_v28  ;;  %vm5224_vm10 = vmmov %vm5216_vm0 }
 0x6e6   : > { %vm5225_vm12 = vmmov %vm5216_vm0 }
 0x6e7   : > { %3424 = vrot.lane.b32.xlu1 %v3423_v0, %s5104_s20  ;;  %2890 = vmatpush1.bf16.msk.msra.mxu0 %vm5150_vm6, %v2889_v9  ;;  %vm5219_vm6 = vmmov %vm5216_vm0 }
 0x6e8   : > { %3419 = vrot.lane.b32.xlu0 %v3418_v13, %s5104_s20  ;;  %vm5226_vm13 = vmmov %vm5216_vm0 }
 0x6e9   : > { %vm5227_vm15 = vmmov %vm5216_vm0 }
 0x6ea   : > { %2891 = vmatmul.mubr.msk.bf16.vlgmr.msra.gmra.mxu0 %vm2296_vm4, %v2859_v22  ;;  %vm5228_vm3 = vmmov %vm5216_vm0 }
 0x6eb   : > { %3434 = vrot.lane.b32.xlu1 %v4674_v21, %s5110_s23 }
 0x6ec   : > { %3429 = vrot.lane.b32.xlu0 %v4652_v18, %s5110_s23 }
 0x6ef   : > { %3444 = vrot.lane.b32.xlu1 %v4733_v51, %s5110_s23 }
 0x6f0   : > { %3439 = vrot.lane.b32.xlu0 %v4672_v16, %s5110_s23 }
 0x6f3   : > { %3449 = vrot.lane.b32.xlu1 %v4642_v58, %s5110_s23 }
 0x6f4   : > { %3454 = vrot.lane.b32.xlu0 %v4731_v49, %s5110_s23 }
 0x6f7   : > { %3464 = vrot.lane.b32.xlu1 %v4764_v44, %s5110_s23 }
 0x6f8   : > { %3459 = vrot.lane.b32.xlu0 %v4632_v47, %s5110_s23 }
 0x6fb   : > { %3474 = vrot.lane.b32.xlu1 %v3398_v23, %s5110_s23 }
 0x6fc   : > { %3469 = vrot.lane.b32.xlu0 %v4758_v15, %s5110_s23 }
 0x6ff   : > { %3484 = vrot.lane.b32.xlu1 %v3408_v3, %s5110_s23 }
 0x700   : > { %3479 = vrot.lane.b32.xlu0 %v4794_v40, %s5110_s23 }
 0x703   : > { %3494 = vrot.lane.b32.xlu1 %v3418_v13, %s5110_s23 }
 0x704   : > { %3489 = vrot.lane.b32.xlu0 %v3413_v63, %s5110_s23 }
 0x707   : > { %2156 = vperm.xlu1 %2942, %v2153_v48  }
 0x708   : > { %3499 = vrot.lane.b32.xlu0 %v3423_v0, %s5110_s23 }
 0x745   : > { %v3380_v53 = vpop.permute.xlu1 %3379 }
 0x746   : > { %v3382_v47 = vunpack.i.h.bf16 %v3380_v53  ;;  %v3381_v58 = vunpack.i.l.bf16 %v3380_v53  ;;  %v3370_v18 = vpop.permute.xlu0 %3369 }
 0x747   : > { %v3372_v16 = vunpack.i.h.bf16 %v3370_v18  ;;  %v3371_v21 = vunpack.i.l.bf16 %v3370_v18 }
 0x749   : > { %v2245_v49 = vsel %vm5217_vm5, %v3382_v47, %v3372_v16  ;;  %v2244_v51 = vsel %vm5218_vm14, %v3381_v58, %v3371_v21  ;;  %v3385_v15 = vpop.permute.xlu1 %3384  ;;  %v2229_v44 = vsel %vm5219_vm6, %v3371_v21, %v3381_v58  ;;  %v2230_v59 = vsel %vm5220_vm2, %v3372_v16, %v3382_v47  ;;  %vm5229_vm5 = vmmov %vm5216_vm0 }
 0x74a   : > { %v2841_v30 = vpack.c.bf16 %v2245_v49, %v2244_v51  ;;  %v3387_v1 = vunpack.i.h.bf16 %v3385_v15  ;;  %v3386_v33 = vunpack.i.l.bf16 %v3385_v15  ;;  %v3375_v12 = vpop.permute.xlu0 %3374  ;;  %v2291_v7 = vpack.c.bf16 %v2230_v59, %v2229_v44  ;;  %vm5230_vm14 = vmmov %vm5216_vm0 }
 0x74b   : > { %v3377_v31 = vunpack.i.h.bf16 %v3375_v12  ;;  %v3376_v61 = vunpack.i.l.bf16 %v3375_v12  ;;  %vm5231_vm6 = vmmov %vm5216_vm0 }
 0x74c   : > { %2310 = vmatprep.subr.bf16.mxu1 %v2291_v7  ;;  %vm5232_vm2 = vmmov %vm5216_vm0 }
 0x74d   : > { %v2243_v62 = vsel %vm5221_vm9, %v3387_v1, %v3377_v31  ;;  %v2242_v41 = vsel %vm5222_vm11, %v3386_v33, %v3376_v61  ;;  %2842 = vmatpush1.bf16.msk.msra.mxu1 %vm3814_vm8, %v2841_v30  ;;  %v3395_v26 = vpop.permute.xlu1 %3394  ;;  %v2227_v29 = vsel %vm5223_vm1, %v3376_v61, %v3386_v33  ;;  %v2228_v40 = vsel %vm5224_vm10, %v3377_v31, %v3387_v1  ;;  %vm5233_vm9 = vmmov %vm5216_vm0 }
 0x74e   : > { %v2844_v23 = vpack.c.bf16 %v2243_v62, %v2242_v41  ;;  %v3397_v5 = vunpack.i.h.bf16 %v3395_v26  ;;  %v3396_v14 = vunpack.i.l.bf16 %v3395_v26  ;;  %v2289_v19 = vpack.c.bf16 %v2228_v40, %v2227_v29  ;;  %v3390_v57 = vpop.permute.xlu0 %3389  ;;  %vm5234_vm11 = vmmov %vm5216_vm0 }
 0x74f   : > { %v3392_v50 = vunpack.i.h.bf16 %v3390_v57  ;;  %v3391_v27 = vunpack.i.l.bf16 %v3390_v57  ;;  %vm5235_vm1 = vmmov %vm5216_vm0 }
 0x750   : > { %2312 = vmatprep.subr.bf16.mxu1 %v2289_v19  ;;  %vm5236_vm10 = vmmov %vm5216_vm0 }
 0x751   : > { %2845 = vmatpush1.bf16.msk.msra.mxu1 %vm3814_vm8, %v2844_v23  ;;  %v3405_v10 = vpop.permute.xlu1 %3404  ;;  %v2241_v56 = vsel %vm5225_vm12, %v3397_v5, %v3392_v50  ;;  %v2240_v54 = vsel %vm5226_vm13, %v3396_v14, %v3391_v27  ;;  %v2225_v43 = vsel %vm5227_vm15, %v3391_v27, %v3396_v14  ;;  %v2226_v32 = vsel %vm5228_vm3, %v3392_v50, %v3397_v5  ;;  %vm5237_vm12 = vmmov %vm5216_vm0  ;;  %v2279_v23 = vld [vmem:[%s5054_s15] sm:$0xf] }
 0x752   : > { %v3407_v17 = vunpack.i.h.bf16 %v3405_v10  ;;  %v3406_v11 = vunpack.i.l.bf16 %v3405_v10  ;;  %v2847_v25 = vpack.c.bf16 %v2241_v56, %v2240_v54  ;;  %v3400_v42 = vpop.permute.xlu0 %3399  ;;  %v2287_v60 = vpack.c.bf16 %v2226_v32, %v2225_v43  ;;  %vm5238_vm13 = vmmov %vm5216_vm0 }
 0x753   : > { %v3402_v63 = vunpack.i.h.bf16 %v3400_v42  ;;  %v3401_v45 = vunpack.i.l.bf16 %v3400_v42  ;;  %vm5239_vm15 = vmmov %vm5216_vm0  ;;  %vm5240_vm3 = vcmp.lt.s32.totalorder %v3675_v36, 112 }
 0x754   : > { %2314 = vmatprep.subr.bf16.mxu1 %v2287_v60 }
 0x755   : > { %v3415_v38 = vpop.permute.xlu1 %3414  ;;  %v2239_v35 = vsel %vm5216_vm0, %v3407_v17, %v3402_v63  ;;  %v2238_v24 = vsel %vm5229_vm5, %v3406_v11, %v3401_v45  ;;  %2848 = vmatpush1.bf16.msk.msra.mxu1 %vm3814_vm8, %v2847_v25  ;;  %v2223_v3 = vsel %vm5230_vm14, %v3401_v45, %v3406_v11  ;;  %v2224_v4 = vsel %vm5231_vm6, %v3402_v63, %v3407_v17  ;;  %vm5241_vm0 = vmmov %vm5240_vm3 }
 0x756   : > { %v3417_v46 = vunpack.i.h.bf16 %v3415_v38  ;;  %v3416_v52 = vunpack.i.l.bf16 %v3415_v38  ;;  %v2850_v6 = vpack.c.bf16 %v2239_v35, %v2238_v24  ;;  %v3410_v8 = vpop.permute.xlu0 %3409  ;;  %v2285_v28 = vpack.c.bf16 %v2224_v4, %v2223_v3  ;;  %vm5244_vm6 = vmmov %vm5241_vm0 }
 0x757   : > { %v3412_v20 = vunpack.i.h.bf16 %v3410_v8  ;;  %v3411_v39 = vunpack.i.l.bf16 %v3410_v8  ;;  %vm5242_vm5 = vcmp.lt.s32.totalorder %v3678_v37, 240  ;;  %vm5243_vm14 = vcmask 1043456  }
 0x758   : > { %2316 = vmatprep.subr.bf16.mxu1 %v2285_v28 }
 0x759   : > { %v3425_v0 = vpop.permute.xlu1 %3424  ;;  %v2237_v9 = vsel %vm5232_vm2, %v3417_v46, %v3412_v20  ;;  %v2236_v13 = vsel %vm5233_vm9, %v3416_v52, %v3411_v39  ;;  %2851 = vmatpush1.bf16.msk.msra.mxu1 %vm3814_vm8, %v2850_v6  ;;  %v2221_v58 = vsel %vm5234_vm11, %v3411_v39, %v3416_v52  ;;  %v2222_v18 = vsel %vm5235_vm1, %v3412_v20, %v3417_v46  ;;  %vm5245_vm2 = vmmov %vm5241_vm0 }
 0x75a   : > { %v3427_v22 = vunpack.i.h.bf16 %v3425_v0  ;;  %v3426_v48 = vunpack.i.l.bf16 %v3425_v0  ;;  %v2853_v53 = vpack.c.bf16 %v2237_v9, %v2236_v13  ;;  %v3420_v47 = vpop.permute.xlu0 %3419  ;;  %v2283_v49 = vpack.c.bf16 %v2222_v18, %v2221_v58  ;;  %vm5247_vm9 = vmmov %vm5241_vm0 }
 0x75b   : > { %v3422_v16 = vunpack.i.h.bf16 %v3420_v47  ;;  %v3421_v21 = vunpack.i.l.bf16 %v3420_v47  ;;  %vm5248_vm11 = vmmov %vm5243_vm14 }
 0x75c   : > { %2318 = vmatprep.subr.bf16.mxu1 %v2283_v49  ;;  %vm5249_vm1 = vmmov %vm5241_vm0 }
 0x75d   : > { %v3435_v51 = vpop.permute.xlu1 %3434  ;;  %v2235_v15 = vsel %vm5236_vm10, %v3427_v22, %v3422_v16  ;;  %v2234_v44 = vsel %vm5237_vm12, %v3426_v48, %v3421_v21  ;;  %2854 = vmatpush1.bf16.msk.msra.mxu1 %vm3814_vm8, %v2853_v53  ;;  %v2219_v1 = vsel %vm5238_vm13, %v3421_v21, %v3426_v48  ;;  %v2220_v33 = vsel %vm5239_vm15, %v3422_v16, %v3427_v22  ;;  %vm5250_vm10 = vmmov %vm5241_vm0 }
 0x75e   : > { %v2856_v59 = vpack.c.bf16 %v2235_v15, %v2234_v44  ;;  %v3430_v30 = vpop.permute.xlu0 %3429  ;;  %v2281_v31 = vpack.c.bf16 %v2220_v33, %v2219_v1  ;;  %v3437_v26 = vunpack.i.h.bf16 %v3435_v51  ;;  %v3436_v14 = vunpack.i.l.bf16 %v3435_v51  ;;  %vm5251_vm12 = vmmov %vm5241_vm0 }
 0x75f   : > { %v3432_v12 = vunpack.i.h.bf16 %v3430_v30  ;;  %v3431_v7 = vunpack.i.l.bf16 %v3430_v30  ;;  %vm5252_vm13 = vmmov %vm5241_vm0 }
 0x760   : > { %2320 = vmatprep.subr.bf16.mxu1 %v2281_v31  ;;  %vm5253_vm15 = vmmov %vm5241_vm0 }
 0x761   : > { %v3445_v61 = vpop.permute.xlu1 %3444  ;;  %v2508_v62 = vsel %vm5240_vm3, %v3432_v12, %v3431_v7  ;;  %v2493_v41 = vsel %vm5241_vm0, %v3431_v7, %v3432_v12  ;;  %2857 = vmatpush1.bf16.msk.msra.mxu1 %vm3814_vm8, %v2856_v59  ;;  %vm5246_vm8 = vmmov %vm5241_vm0 }
 0x762   : > { %v2538_v29 = vsel %vm5242_vm5, %v2508_v62, 0.0  ;;  %v3440_v40 = vpop.permute.xlu0 %3439  ;;  %v2555_v5 = vpack.c.bf16 %v2493_v41, %v2493_v41  ;;  %v3447_v25 = vunpack.i.h.bf16 %v3445_v61  ;;  %v3446_v42 = vunpack.i.l.bf16 %v3445_v61  ;;  %vm5254_vm3 = vmmov %vm5241_vm0 }
 0x763   : > { %v3442_v19 = vunpack.i.h.bf16 %v3440_v40  ;;  %v3441_v57 = vunpack.i.l.bf16 %v3440_v40  ;;  %v2556_v50 = vpack.c.bf16 %v2538_v29, %v2538_v29  ;;  %vm5255_vm5 = vmmov %vm5241_vm0 }
 0x764   : > { %v2561_v10 = vsel %vm5243_vm14, %v2555_v5, 0  ;;  %2858 = vmatmul.mubr.msk.bf16.vlgmr.msra.gmra.mxu1 %vm2296_vm4, %v2279_v23  ;;  %vm5256_vm14 = vmmov %vm5241_vm0 }
 0x765   : > { %v3450_v27 = vpop.permute.xlu1 %3449  ;;  %v2507_v37 = vsel %vm5244_vm6, %v3442_v19, %v3437_v26  ;;  %v2506_v55 = vsel %vm5245_vm2, %v3441_v57, %v3436_v14  ;;  %v2492_v56 = vsel %vm5246_vm8, %v3437_v26, %v3442_v19  ;;  %v2491_v54 = vsel %vm5247_vm9, %v3436_v14, %v3441_v57  ;;  %2893 = vmatprep.subr.msk.bf16.mxu1 %vm5248_vm11, %v2556_v50  ;;  %vm5257_vm6 = vmmov %vm5241_vm0 }
 0x766   : > { %v2895_v17 = vpack.c.bf16 %v2507_v37, %v2506_v55  ;;  %v3455_v11 = vpop.permute.xlu0 %3454  ;;  %2598 = vmatprep.mubr.bf16.mxu1 %v3511_v2  ;;  %2567 = vmatpush1.bf16.msra.mxu1 %v2561_v10  ;;  %v2553_v45 = vpack.c.bf16 %v2492_v56, %v2491_v54  ;;  %v3452_v52 = vunpack.i.h.bf16 %v3450_v27  ;;  %v3451_v6 = vunpack.i.l.bf16 %v3450_v27  ;;  %vm5258_vm2 = vmmov %vm5241_vm0 }
 0x767   : > { %v3457_v43 = vunpack.i.h.bf16 %v3455_v11  ;;  %v3456_v32 = vunpack.i.l.bf16 %v3455_v11  ;;  %vm5259_vm8 = vmmov %vm5241_vm0 }
 0x768   : > { %2896 = vmatprep.subr.msk.bf16.mxu1 %vm3899_vm7, %v2895_v17  ;;  %vm5260_vm9 = vmmov %vm5241_vm0 }
 0x769   : > { %v3465_v63 = vpop.permute.xlu1 %3464  ;;  %v2505_v60 = vsel %vm5249_vm1, %v3457_v43, %v3447_v25  ;;  %v2504_v38 = vsel %vm5250_vm10, %v3456_v32, %v3446_v42  ;;  %v2490_v35 = vsel %vm5251_vm12, %v3447_v25, %v3457_v43  ;;  %v2489_v2 = vsel %vm5252_vm13, %v3446_v42, %v3456_v32  ;;  %vm5261_vm11 = vmmov %vm5241_vm0 }
 0x76a   : > { %v2898_v24 = vpack.c.bf16 %v2505_v60, %v2504_v38  ;;  %v3460_v46 = vpop.permute.xlu0 %3459  ;;  %2569 = vmatpush1.bf16.msra.mxu1 %v2553_v45  ;;  %v2551_v20 = vpack.c.bf16 %v2490_v35, %v2489_v2  ;;  %v3467_v48 = vunpack.i.h.bf16 %v3465_v63  ;;  %v3466_v53 = vunpack.i.l.bf16 %v3465_v63  ;;  %vm5262_vm1 = vmmov %vm5241_vm0  ;;  %v2892_v35 = vld [vmem:[%s5054_s15 + $0x8] sm:$0xf] }
 0x76b   : > { %v3462_v8 = vunpack.i.h.bf16 %v3460_v46  ;;  %v3461_v3 = vunpack.i.l.bf16 %v3460_v46  ;;  %vm5263_vm10 = vmmov %vm5241_vm0 }
 0x76c   : > { %2899 = vmatprep.subr.msk.bf16.mxu1 %vm3899_vm7, %v2898_v24  ;;  %vm5264_vm12 = vmmov %vm5241_vm0 }
 0x76d   : > { %v3475_v4 = vpop.permute.xlu1 %3474  ;;  %v2503_v39 = vsel %vm5253_vm15, %v3462_v8, %v3452_v52  ;;  %v2502_v28 = vsel %vm5254_vm3, %v3461_v3, %v3451_v6  ;;  %v2488_v0 = vsel %vm5241_vm0, %v3452_v52, %v3462_v8  ;;  %v2487_v9 = vsel %vm5255_vm5, %v3451_v6, %v3461_v3  ;;  %vm5265_vm13 = vmmov %vm5241_vm0 }
 0x76e   : > { %v2901_v13 = vpack.c.bf16 %v2503_v39, %v2502_v28  ;;  %v3470_v22 = vpop.permute.xlu0 %3469  ;;  %2571 = vmatpush1.bf16.msra.mxu1 %v2551_v20  ;;  %v2549_v18 = vpack.c.bf16 %v2488_v0, %v2487_v9  ;;  %v3477_v30 = vunpack.i.h.bf16 %v3475_v4  ;;  %v3476_v1 = vunpack.i.l.bf16 %v3475_v4  ;;  %vm5266_vm15 = vmmov %vm5241_vm0 }
 0x76f   : > { %v3472_v47 = vunpack.i.h.bf16 %v3470_v22  ;;  %v3471_v58 = vunpack.i.l.bf16 %v3470_v22  ;;  %vm5267_vm3 = vmmov %vm5241_vm0 }
 0x770   : > { %2902 = vmatprep.subr.msk.bf16.mxu1 %vm3899_vm7, %v2901_v13  ;;  %vm5268_vm5 = vmmov %vm5241_vm0 }
 0x771   : > { %v2501_v16 = vsel %vm5256_vm14, %v3472_v47, %v3467_v48  ;;  %v2500_v21 = vsel %vm5257_vm6, %v3471_v58, %v3466_v53  ;;  %v2486_v49 = vsel %vm5258_vm2, %v3467_v48, %v3472_v47  ;;  %v2485_v51 = vsel %vm5259_vm8, %v3466_v53, %v3471_v58  ;;  %v3485_v44 = vpop.permute.xlu1 %3484  ;;  %vm5269_vm14 = vmmov %vm5241_vm0 }
 0x772   : > { %v2904_v15 = vpack.c.bf16 %v2501_v16, %v2500_v21  ;;  %v3480_v59 = vpop.permute.xlu0 %3479  ;;  %2573 = vmatpush1.bf16.msra.mxu1 %v2549_v18  ;;  %v2547_v7 = vpack.c.bf16 %v2486_v49, %v2485_v51  ;;  %v3487_v40 = vunpack.i.h.bf16 %v3485_v44  ;;  %v3486_v23 = vunpack.i.l.bf16 %v3485_v44  ;;  %vm5270_vm6 = vmmov %vm5241_vm0 }
 0x773   : > { %v3482_v33 = vunpack.i.h.bf16 %v3480_v59  ;;  %v3481_v12 = vunpack.i.l.bf16 %v3480_v59 }
 0x774   : > { %2905 = vmatprep.subr.msk.bf16.mxu1 %vm3899_vm7, %v2904_v15 }
 0x775   : > { %v2499_v31 = vsel %vm5260_vm9, %v3482_v33, %v3477_v30  ;;  %v2498_v61 = vsel %vm5261_vm11, %v3481_v12, %v3476_v1  ;;  %v2484_v62 = vsel %vm5262_vm1, %v3477_v30, %v3482_v33  ;;  %v2483_v41 = vsel %vm5263_vm10, %v3476_v1, %v3481_v12  ;;  %v3495_v19 = vpop.permute.xlu1 %3494 }
 0x776   : > { %v2907_v26 = vpack.c.bf16 %v2499_v31, %v2498_v61  ;;  %v3490_v29 = vpop.permute.xlu0 %3489  ;;  %2575 = vmatpush1.bf16.msra.mxu1 %v2547_v7  ;;  %v2545_v57 = vpack.c.bf16 %v2484_v62, %v2483_v41  ;;  %v3497_v54 = vunpack.i.h.bf16 %v3495_v19  ;;  %v3496_v17 = vunpack.i.l.bf16 %v3495_v19 }
 0x777   : > { %v3492_v5 = vunpack.i.h.bf16 %v3490_v29  ;;  %v3491_v14 = vunpack.i.l.bf16 %v3490_v29 }
 0x778   : > { %2908 = vmatprep.subr.msk.bf16.mxu1 %vm3899_vm7, %v2907_v26 }
 0x779   : > { %v2497_v50 = vsel %vm5264_vm12, %v3492_v5, %v3487_v40  ;;  %v2496_v27 = vsel %vm5265_vm13, %v3491_v14, %v3486_v23  ;;  %v2482_v10 = vsel %vm5266_vm15, %v3487_v40, %v3492_v5  ;;  %v2481_v37 = vsel %vm5267_vm3, %v3486_v23, %v3491_v14 }
 0x77a   : > { %v2910_v55 = vpack.c.bf16 %v2497_v50, %v2496_v27  ;;  %v3500_v56 = vpop.permute.xlu0 %3499  ;;  %2577 = vmatpush1.bf16.msra.mxu1 %v2545_v57  ;;  %v2543_v42 = vpack.c.bf16 %v2482_v10, %v2481_v37 }
 0x77b   : > { %v3502_v11 = vunpack.i.h.bf16 %v3500_v56  ;;  %v3501_v25 = vunpack.i.l.bf16 %v3500_v56 }
 0x77c   : > { %2911 = vmatprep.subr.msk.bf16.mxu1 %vm3899_vm7, %v2910_v55 }
 0x77d   : > { %v2495_v43 = vsel %vm5241_vm0, %v3502_v11, %v3497_v54  ;;  %v2494_v32 = vsel %vm5268_vm5, %v3501_v25, %v3496_v17  ;;  %v2480_v63 = vsel %vm5269_vm14, %v3497_v54, %v3502_v11  ;;  %v2479_v45 = vsel %vm5270_vm6, %v3496_v17, %v3501_v25 }
 0x77e   : > { %v2913_v60 = vpack.c.bf16 %v2495_v43, %v2494_v32  ;;  %2579 = vmatpush1.bf16.msra.mxu1 %v2543_v42  ;;  %v2541_v38 = vpack.c.bf16 %v2480_v63, %v2479_v45 }
 0x780   : > { %2914 = vmatprep.subr.msk.bf16.mxu1 %vm3899_vm7, %v2913_v60 }
 0x782   : > { %2581 = vmatpush1.bf16.msra.mxu1 %v2541_v38  ;;  %v2157_v4 = vpop.permute.xlu1 %2156 }
 0x785   : > { %2915 = vmatmul.mubr.msk.bf16.vlgmr.msra.gmra.mxu1 %vm2296_vm4, %v2892_v35 }
 0x7aa   : > { %v2410_v2 = vpop.f32.mrf.mxu0 }
 0x7ac   : > { %v2412_v24 = vpop.f32.mrf.mxu0 }
 0x7ae   : > { %v2414_v46 = vpop.f32.mrf.mxu0 }
 0x7b0   : > { %v2415_v52 = vpop.f32.mrf.mxu0 }
 0x824   : > { %v2340_v6 = vpop.f32.mrf.mxu1 }
 0x825   : > { %v2347_v34 = vadd.f32 %v2340_v6, %v2157_v4 }
 0x826   : > { %v2342_v36 = vpop.f32.mrf.mxu1 }
 0x827   : > { %v2348_v20 = vadd.f32 %v2342_v36, %v2157_v4  ;;  %v2417_v28 = vadd.f32 %v2410_v2, %v2347_v34 }
 0x828   : > { %v2344_v8 = vpop.f32.mrf.mxu1 }
 0x829   : > { %v2418_v0 = vadd.f32 %v2412_v24, %v2348_v20 }
 0x82a   : > { %v2345_v3 = vpop.f32.mrf.mxu1 }
 0x845   : > { %v2600_v39 = vpop.f32.mrf.mxu1 }
 0x846   : > { %v2607_v13 = vadd.f32 %v2600_v39, %v2417_v28 }
 0x847   : > { %v2602_v9 = vpop.f32.mrf.mxu1 }
 0x848   : > { %v2608_v22 = vadd.f32 %v2602_v9, %v2418_v0 }
 0x849   : > { %v2604_v48 = vpop.f32.mrf.mxu1 }
 0x84a   : > { %v2925_v53 = vpack.c.bf16 %v2608_v22, %v2607_v13 }
 0x84b   : > { %v2605_v47 = vpop.f32.mrf.mxu1 }
 0x84c   : > { %2617 = vst [vmem:[%s3639_s30] sm:$0xff] %v2925_v53 }
 0x84d PF: > { %s27_s24 = sadd.s32 1, %s3509_s24  }
 0x84e   : > { %p24_p4 = scmp.ge.s32.totalorder %s27_s24, 4  }
 0x850   :  { %26 = sbr.rel (!%p24_p4) target bundleno = 4 (0x4), region = 126 }

</bundles_post_ra>
